<compile_context>
chip_gen: v7x
topology: tpu7x:2x2x1
jax: 0.10.0
libtpu: 0.0.40
codegen_flags: <defaults>
</compile_context>

<pallas_src>
import functools

import jax
import jax.numpy as jnp
from jax import lax
from jax.experimental import pallas as pl
from jax.experimental.pallas import tpu as pltpu


def _round_up(v, m):
    return -(-v // m) * m


def _decoder_kernel(Bt, H, W, Cin, x_ref, wconv_ref, whead_ref, bhead_ref,
                    out_ref, xp_scr):
    # In-kernel zero padding (padding=1 halo) into VMEM scratch. Re-zeroing every
    # step is cheap (one dense fill) and keeps each grid step self-contained,
    # which is required when the grid axis is sharded across TensorCores.
    xp_scr[...] = jnp.zeros_like(xp_scr)
    xp_scr[:, 1:H + 1, 1:W + 1, :] = x_ref[...]
    xp = xp_scr[...]                                   # (Bt, H+2, W+2, Cin)

    M = Bt * H * W
    # im2col: 9 shifted windows -> (M, 9*Cin), ordered (ky, kx, Cin) to match
    # the (2, 3, 1, 0) weight transpose in the wrapper. A single K = 9*Cin
    # matmul uses the MXU far better than 9 K = Cin matmuls for small Cin.
    cols = [xp[:, ky:ky + H, kx:kx + W, :].reshape(M, Cin)
            for ky in range(3) for kx in range(3)]
    col = jnp.concatenate(cols, axis=-1)               # (M, 9*Cin)

    # Fused conv1 + conv2: one MXU matmul, N = 2*C, then ReLU (VPU).
    x01 = jnp.maximum(
        jnp.dot(col, wconv_ref[...], preferred_element_type=jnp.float32), 0.0)

    # Fused 1x1 heads: block-diagonal (2*C, O_pad) weight, one matmul and one
    # bias broadcast add covering all four heads.
    heads = jnp.dot(x01.astype(whead_ref.dtype), whead_ref[...],
                    preferred_element_type=jnp.float32) + bhead_ref[...]

    # Single lane-dense output slab (last dim = O_pad, multiple of 128).
    out_ref[...] = heads.astype(out_ref.dtype)


def _vmem_bytes_estimate(bt, H, W, Cin, C, O_pad, esz):
    def tb(rows, cols, e):
        return _round_up(max(rows, 1), 8) * _round_up(max(cols, 1), 128) * e

    m = bt * H * W
    est = 0
    est += 2 * bt * H * tb(W, Cin, esz)            # input block (double-buffered)
    est += 2 * tb(9 * Cin, 2 * C, esz)             # fused conv weight
    est += 2 * tb(2 * C, O_pad, esz)               # fused head weight
    est += 2 * tb(8, O_pad, 4)                     # bias
    est += 2 * tb(m, O_pad, 4)                     # output block (double-buffered)
    est += bt * (H + 2) * tb(W + 2, Cin, esz)      # padded scratch
    est += 2 * tb(m, 9 * Cin, esz)                 # col + window slices
    est += 2 * tb(m, 2 * C, 4)                     # x01
    est += 2 * tb(m, O_pad, 4)                     # heads temporary
    return est


def decoder_forward(x_nchw, params, *, compute_dtype=jnp.float32):
    """Decoder.forward. Returns (junction_logits, junction_loc, bin_logits,
    bin_residual), all NCHW float32 — same as the PyTorch module.

    Set compute_dtype=jnp.bfloat16 on v6e/v7x for higher MXU throughput
    (f32 accumulation is kept); re-validate tolerances if you do.
    """
    B, Cin, H, W = x_nchw.shape
    x = jnp.transpose(x_nchw, (0, 2, 3, 1)).astype(compute_dtype)   # NHWC

    # Fused conv weight: (Cout, Cin, 3, 3) -> im2col layout, concat conv1|conv2
    # along the output axis -> (9*Cin, 2*C).
    w1 = params["conv1_w"]
    w2 = params["conv2_w"]
    C = w1.shape[0]
    w1_col = jnp.transpose(w1, (2, 3, 1, 0)).reshape(9 * Cin, C)
    w2_col = jnp.transpose(w2, (2, 3, 1, 0)).reshape(9 * Cin, C)
    w_conv = jnp.concatenate([w1_col, w2_col], axis=1).astype(compute_dtype)

    # Fused head weight: block-diagonal (2*C, O_pad). Rows 0:C act on x0
    # (conv1 branch), rows C:2C act on x1 (conv2 branch). Extra columns are
    # zero padding up to a multiple of 128 for lane-dense stores.
    def head_w(key):
        return params[key][:, :, 0, 0].T  # (C, o)

    w11, w12, w21, w22 = (head_w(k) for k in
                          ("conv1_1_w", "conv1_2_w", "conv2_1_w", "conv2_2_w"))
    o_sizes = [w11.shape[1], w12.shape[1], w21.shape[1], w22.shape[1]]
    Osum = sum(o_sizes)
    O_pad = max(128, _round_up(Osum, 128))

    def zeros(r, c):
        return jnp.zeros((r, c), jnp.float32)

    top = jnp.concatenate(
        [w11, w12, zeros(C, O_pad - o_sizes[0] - o_sizes[1])], axis=1)
    bot = jnp.concatenate(
        [zeros(C, o_sizes[0] + o_sizes[1]), w21, w22, zeros(C, O_pad - Osum)],
        axis=1)
    w_heads = jnp.concatenate([top, bot], axis=0).astype(compute_dtype)
    b_heads = jnp.concatenate(
        [params["conv1_1_b"], params["conv1_2_b"],
         params["conv2_1_b"], params["conv2_2_b"],
         jnp.zeros((O_pad - Osum,), jnp.float32)]).reshape(1, O_pad)

    # Batch tile: fold several samples into one grid step so M = bt*H*W is a
    # healthy multiple of 8 (amortizes per-step overhead). If H*W is not a
    # multiple of 8, process the full batch in one step so block == full array.
    bt = B
    if (H * W) % 8 == 0:
        target_rows = max(512, H * W)
        for d in range(1, B + 1):
            if B % d == 0 and d * H * W <= target_rows:
                bt = d
    grid = (B // bt,)

    esz = jnp.dtype(compute_dtype).itemsize
    est = _vmem_bytes_estimate(bt, H, W, Cin, C, O_pad, esz)
    vmem_limit = int(min(48 * 2**20, max(32 * 2**20, 2 * est)))

    kernel = functools.partial(_decoder_kernel, bt, H, W, Cin)

    in_specs = [
        pl.BlockSpec((bt, H, W, Cin), lambda b: (b, 0, 0, 0)),
        pl.BlockSpec((9 * Cin, 2 * C), lambda b: (0, 0)),
        pl.BlockSpec((2 * C, O_pad), lambda b: (0, 0)),
        pl.BlockSpec((1, O_pad), lambda b: (0, 0)),
    ]
    out_specs = pl.BlockSpec((bt * H * W, O_pad), lambda b: (b, 0))
    out_shape = jax.ShapeDtypeStruct((B * H * W, O_pad), jnp.float32)

    out2d = pl.pallas_call(
        kernel,
        grid=grid,
        in_specs=in_specs,
        out_specs=out_specs,
        out_shape=out_shape,
        scratch_shapes=[pltpu.VMEM((bt, H + 2, W + 2, Cin), compute_dtype)],
        compiler_params=pltpu.CompilerParams(
            dimension_semantics=("parallel",),
            vmem_limit_bytes=vmem_limit),
    )(x, w_conv, w_heads, b_heads)

    # Split the lane-dense slab back into the four heads, NHWC -> NCHW.
    out = out2d.reshape(B, H, W, O_pad)
    results, off = [], 0
    for osz in o_sizes:
        results.append(jnp.transpose(out[..., off:off + osz], (0, 3, 1, 2)))
        off += osz
    return tuple(results)


def _reference_forward(x_nchw, params):
    """Pure-JAX reference (lax.conv) mirroring the PyTorch module."""
    dn = ("NCHW", "OIHW", "NCHW")

    def conv(x, w, pad):
        return lax.conv_general_dilated(
            x, w, window_strides=(1, 1), padding=[(pad, pad), (pad, pad)],
            dimension_numbers=dn, precision=lax.Precision.HIGHEST)

    x0 = jnp.maximum(conv(x_nchw, params["conv1_w"], 1), 0.0)
    x1 = jnp.maximum(conv(x_nchw, params["conv2_w"], 1), 0.0)

    def head(x, wkey, bkey):
        return conv(x, params[wkey], 0) + params[bkey][None, :, None, None]

    return (head(x0, "conv1_1_w", "conv1_1_b"),
            head(x0, "conv1_2_w", "conv1_2_b"),
            head(x1, "conv2_1_w", "conv2_1_b"),
            head(x1, "conv2_2_w", "conv2_2_b"))


def _init_params(key, cin, channel, out1, out2):
    ks = jax.random.split(key, 10)
    p = {}
    p["conv1_w"] = 0.05 * jax.random.normal(ks[0], (channel, cin, 3, 3), jnp.float32)
    p["conv2_w"] = 0.05 * jax.random.normal(ks[1], (channel, cin, 3, 3), jnp.float32)
    p["conv1_1_w"] = 0.05 * jax.random.normal(ks[2], (out1[0], channel, 1, 1), jnp.float32)
    p["conv1_1_b"] = 0.05 * jax.random.normal(ks[3], (out1[0],), jnp.float32)
    p["conv1_2_w"] = 0.05 * jax.random.normal(ks[4], (out1[1], channel, 1, 1), jnp.float32)
    p["conv1_2_b"] = 0.05 * jax.random.normal(ks[5], (out1[1],), jnp.float32)
    p["conv2_1_w"] = 0.05 * jax.random.normal(ks[6], (out2[0], channel, 1, 1), jnp.float32)
    p["conv2_1_b"] = 0.05 * jax.random.normal(ks[7], (out2[0],), jnp.float32)
    p["conv2_2_w"] = 0.05 * jax.random.normal(ks[8], (out2[1], channel, 1, 1), jnp.float32)
    p["conv2_2_b"] = 0.05 * jax.random.normal(ks[9], (out2[1],), jnp.float32)
    return p


if __name__ == "__main__":
    # Small synthetic hyperparameters consistent with the Decoder as used in
    # Wireframe3 (DecodeNet): input_dim=16, channel=32, max_len=4, num_bin=4
    # -> out1=(8, 8), out2=(32, 16). Total head channels = 64 (padded to 128).
    B, Cin, Hs, Ws = 2, 16, 16, 16
    channel = 32
    max_len, num_bin = 4, 4
    out1 = (2 * max_len, 2 * max_len)                   # (8, 8)
    out2 = (2 * num_bin * max_len, num_bin * max_len)   # (32, 16)

    key = jax.random.PRNGKey(0)
    k_x, k_p = jax.random.split(key)
    x = jax.random.normal(k_x, (B, Cin, Hs, Ws), jnp.float32)
    params = _init_params(k_p, Cin, channel, out1, out2)

    outs = decoder_forward(x, params)
    outs = jax.block_until_ready(outs)

    refs = _reference_forward(x, params)
    for o, r in zip(outs, refs):
        assert o.shape == r.shape and o.dtype == r.dtype
        assert jnp.allclose(o, r, rtol=1e-3, atol=1e-3), "mismatch vs reference"

    print("KERNEL_OK")
</pallas_src>

<mosaic_0001>
module attributes {stable_mosaic.version = 11 : i64} {
  func.func @_decoder_kernel(%arg0: i32, %arg1: memref<2x16x16x16xf32, #tpu.memory_space<vmem>>, %arg2: memref<144x64xf32, #tpu.memory_space<vmem>>, %arg3: memref<64x128xf32, #tpu.memory_space<vmem>>, %arg4: memref<1x128xf32, #tpu.memory_space<vmem>>, %arg5: memref<512x128xf32, #tpu.memory_space<vmem>>, %arg6: memref<2x18x18x16xf32, #tpu.memory_space<vmem>>) attributes {dimension_semantics = [#tpu.dimension_semantics<parallel>], iteration_bounds = array<i64: 1>, scalar_prefetch = 0 : i64, scratch_operands = 1 : i64, tpu.core_type = #tpu.core_type<tc>, window_params = [{transform_indices = @transform_0, window_bounds = array<i64: 2, 16, 16, 16>}, {pipeline_mode = #tpu.pipeline_mode<synchronous>, transform_indices = @transform_1, window_bounds = array<i64: 144, 64>}, {pipeline_mode = #tpu.pipeline_mode<synchronous>, transform_indices = @transform_2, window_bounds = array<i64: 64, 128>}, {pipeline_mode = #tpu.pipeline_mode<synchronous>, transform_indices = @transform_3, window_bounds = array<i64: 1, 128>}, {transform_indices = @transform_4, window_bounds = array<i64: 512, 128>}]} {
    %cst = arith.constant 0.000000e+00 : f32
    %0 = vector.broadcast %cst : f32 to vector<2x18x18x16xf32>
    %c0 = arith.constant 0 : index
    %c0_0 = arith.constant 0 : index
    %c0_1 = arith.constant 0 : index
    %c0_2 = arith.constant 0 : index
    %1 = vector.load %arg6[%c0, %c0_0, %c0_1, %c0_2] : memref<2x18x18x16xf32, #tpu.memory_space<vmem>>, vector<2x18x18x16xf32>
    tpu.vector_store %arg6[%c0, %c0_0, %c0_1, %c0_2], %0 {strides = array<i32>} : memref<2x18x18x16xf32, #tpu.memory_space<vmem>>, vector<2x18x18x16xf32>,
    %c0_3 = arith.constant 0 : index
    %c0_4 = arith.constant 0 : index
    %c0_5 = arith.constant 0 : index
    %c0_6 = arith.constant 0 : index
    %2 = vector.load %arg1[%c0_3, %c0_4, %c0_5, %c0_6] : memref<2x16x16x16xf32, #tpu.memory_space<vmem>>, vector<2x16x16x16xf32>
    %c0_7 = arith.constant 0 : index
    %c1 = arith.constant 1 : index
    %c1_8 = arith.constant 1 : index
    %c0_9 = arith.constant 0 : index
    %3 = vector.load %arg6[%c0_7, %c1, %c1_8, %c0_9] : memref<2x18x18x16xf32, #tpu.memory_space<vmem>>, vector<2x16x16x16xf32>
    tpu.vector_store %arg6[%c0_7, %c1, %c1_8, %c0_9], %2 {strides = array<i32>} : memref<2x18x18x16xf32, #tpu.memory_space<vmem>>, vector<2x16x16x16xf32>,
    %c0_10 = arith.constant 0 : index
    %c0_11 = arith.constant 0 : index
    %c0_12 = arith.constant 0 : index
    %c0_13 = arith.constant 0 : index
    %4 = vector.load %arg6[%c0_10, %c0_11, %c0_12, %c0_13] : memref<2x18x18x16xf32, #tpu.memory_space<vmem>>, vector<2x18x18x16xf32>
    %5 = vector.extract_strided_slice %4 {offsets = [0, 0, 0, 0], sizes = [2, 16, 16, 16], strides = [1, 1, 1, 1]} : vector<2x18x18x16xf32> to vector<2x16x16x16xf32>
    %6 = vector.shape_cast %5 : vector<2x16x16x16xf32> to vector<512x16xf32>
    %7 = vector.extract_strided_slice %4 {offsets = [0, 0, 1, 0], sizes = [2, 16, 16, 16], strides = [1, 1, 1, 1]} : vector<2x18x18x16xf32> to vector<2x16x16x16xf32>
    %8 = vector.shape_cast %7 : vector<2x16x16x16xf32> to vector<512x16xf32>
    %9 = vector.extract_strided_slice %4 {offsets = [0, 0, 2, 0], sizes = [2, 16, 16, 16], strides = [1, 1, 1, 1]} : vector<2x18x18x16xf32> to vector<2x16x16x16xf32>
    %10 = vector.shape_cast %9 : vector<2x16x16x16xf32> to vector<512x16xf32>
    %11 = vector.extract_strided_slice %4 {offsets = [0, 1, 0, 0], sizes = [2, 16, 16, 16], strides = [1, 1, 1, 1]} : vector<2x18x18x16xf32> to vector<2x16x16x16xf32>
    %12 = vector.shape_cast %11 : vector<2x16x16x16xf32> to vector<512x16xf32>
    %13 = vector.extract_strided_slice %4 {offsets = [0, 1, 1, 0], sizes = [2, 16, 16, 16], strides = [1, 1, 1, 1]} : vector<2x18x18x16xf32> to vector<2x16x16x16xf32>
    %14 = vector.shape_cast %13 : vector<2x16x16x16xf32> to vector<512x16xf32>
    %15 = vector.extract_strided_slice %4 {offsets = [0, 1, 2, 0], sizes = [2, 16, 16, 16], strides = [1, 1, 1, 1]} : vector<2x18x18x16xf32> to vector<2x16x16x16xf32>
    %16 = vector.shape_cast %15 : vector<2x16x16x16xf32> to vector<512x16xf32>
    %17 = vector.extract_strided_slice %4 {offsets = [0, 2, 0, 0], sizes = [2, 16, 16, 16], strides = [1, 1, 1, 1]} : vector<2x18x18x16xf32> to vector<2x16x16x16xf32>
    %18 = vector.shape_cast %17 : vector<2x16x16x16xf32> to vector<512x16xf32>
    %19 = vector.extract_strided_slice %4 {offsets = [0, 2, 1, 0], sizes = [2, 16, 16, 16], strides = [1, 1, 1, 1]} : vector<2x18x18x16xf32> to vector<2x16x16x16xf32>
    %20 = vector.shape_cast %19 : vector<2x16x16x16xf32> to vector<512x16xf32>
    %21 = vector.extract_strided_slice %4 {offsets = [0, 2, 2, 0], sizes = [2, 16, 16, 16], strides = [1, 1, 1, 1]} : vector<2x18x18x16xf32> to vector<2x16x16x16xf32>
    %22 = vector.shape_cast %21 : vector<2x16x16x16xf32> to vector<512x16xf32>
    %23 = tpu.concatenate %6, %8, %10, %12, %14, %16, %18, %20, %22 in 1 : vector<512x16xf32>, vector<512x16xf32>, vector<512x16xf32>, vector<512x16xf32>, vector<512x16xf32>, vector<512x16xf32>, vector<512x16xf32>, vector<512x16xf32>, vector<512x16xf32> -> vector<512x144xf32>
    %c0_14 = arith.constant 0 : index
    %c0_15 = arith.constant 0 : index
    %24 = vector.load %arg2[%c0_14, %c0_15] : memref<144x64xf32, #tpu.memory_space<vmem>>, vector<144x64xf32>
    %cst_16 = arith.constant dense<0.000000e+00> : vector<512x64xf32>
    %25 = tpu.matmul %23, %24, %cst_16 {dimension_numbers = #tpu.dot_dimension_numbers<[1], [0], [0], [1], [0, 0, 1, 1], [], []>} : vector<512x144xf32>, vector<144x64xf32>, vector<512x64xf32> -> vector<512x64xf32>
    %cst_17 = arith.constant 0.000000e+00 : f32
    %26 = vector.broadcast %cst_17 : f32 to vector<512x64xf32>
    %27 = arith.maximumf %25, %26 : vector<512x64xf32>
    %c0_18 = arith.constant 0 : index
    %c0_19 = arith.constant 0 : index
    %28 = vector.load %arg3[%c0_18, %c0_19] : memref<64x128xf32, #tpu.memory_space<vmem>>, vector<64x128xf32>
    %cst_20 = arith.constant dense<0.000000e+00> : vector<512x128xf32>
    %29 = tpu.matmul %27, %28, %cst_20 {dimension_numbers = #tpu.dot_dimension_numbers<[1], [0], [0], [1], [0, 0, 1, 1], [], []>} : vector<512x64xf32>, vector<64x128xf32>, vector<512x128xf32> -> vector<512x128xf32>
    %c0_21 = arith.constant 0 : index
    %c0_22 = arith.constant 0 : index
    %30 = vector.load %arg4[%c0_21, %c0_22] : memref<1x128xf32, #tpu.memory_space<vmem>>, vector<1x128xf32>
    %31 = vector.broadcast %30 : vector<1x128xf32> to vector<512x128xf32>
    %32 = arith.addf %29, %31 : vector<512x128xf32>
    %c0_23 = arith.constant 0 : index
    %c0_24 = arith.constant 0 : index
    %33 = vector.load %arg5[%c0_23, %c0_24] : memref<512x128xf32, #tpu.memory_space<vmem>>, vector<512x128xf32>
    tpu.vector_store %arg5[%c0_23, %c0_24], %32 {strides = array<i32>} : memref<512x128xf32, #tpu.memory_space<vmem>>, vector<512x128xf32>,
    return
  }
  func.func @transform_0(%arg0: i32) -> (i32, i32, i32, i32) {
    %c0_i32 = arith.constant 0 : i32
    %c0_i32_0 = arith.constant 0 : i32
    %c0_i32_1 = arith.constant 0 : i32
    %c0_i32_2 = arith.constant 0 : i32
    return %arg0, %c0_i32, %c0_i32_0, %c0_i32_1 : i32, i32, i32, i32
  }
  func.func @transform_1(%arg0: i32) -> (i32, i32) {
    %c0_i32 = arith.constant 0 : i32
    %c0_i32_0 = arith.constant 0 : i32
    %c0_i32_1 = arith.constant 0 : i32
    return %c0_i32, %c0_i32_0 : i32, i32
  }
  func.func @transform_2(%arg0: i32) -> (i32, i32) {
    %c0_i32 = arith.constant 0 : i32
    %c0_i32_0 = arith.constant 0 : i32
    %c0_i32_1 = arith.constant 0 : i32
    return %c0_i32, %c0_i32_0 : i32, i32
  }
  func.func @transform_3(%arg0: i32) -> (i32, i32) {
    %c0_i32 = arith.constant 0 : i32
    %c0_i32_0 = arith.constant 0 : i32
    %c0_i32_1 = arith.constant 0 : i32
    return %c0_i32, %c0_i32_0 : i32, i32
  }
  func.func @transform_4(%arg0: i32) -> (i32, i32) {
    %c0_i32 = arith.constant 0 : i32
    %c0_i32_0 = arith.constant 0 : i32
    return %arg0, %c0_i32 : i32, i32
  }
}

</mosaic_0001>

<bundles_post_ra>
// kernel: tpu_custom_call.1
= control target key start
LH: loop header
LB: loop body
LE: loop exit
PB: predicated region body
PF: predicated region fallthrough
CT: control target
= control target key end

     0   :  { %9 = vsyncpa [#allocation4], 0  ;;  %s8368_s0 = inlined_call_operand.hbm [shape: f32[2,16,16,16], index: 0, kind: input, shape index: {}]   ;;  %s8369_s1 = inlined_call_operand.vmem [shape: f32[144,64], index: 1, kind: input, shape index: {}]   ;;  %s8370_s2 = inlined_call_operand.vmem [shape: f32[64,128], index: 2, kind: input, shape index: {}]   ;;  %s8371_s3 = inlined_call_operand.vmem [shape: f32[1,128], index: 3, kind: input, shape index: {}]   ;;  %s8372_s4 = inlined_call_operand.hbm [shape: f32[512,128], index: 4, kind: output, shape index: {}]  }
   0x1   :  { %10 = vsyncpa [#allocation5], 0  ;;  %s5585_s15 = smov [#allocation3]   ;;  %s5537_s19 = scalar_lea.hbm %s8368_s0, 8192 }
   0x2   :  { %s16_s16 = sshll.u32 %s5585_s15, 4  ;;  %p5538_p0 = scmp.ne.s32.totalorder %s8368_s0, %s5537_s19  ;;  %s17_s16 = int_to_ptr.vmem [resolvable:$true] %s16_s16 }
   0x3   :  { %p5541_p1 = scmp.lt.u32.totalorder %s5537_s19, %s8368_s0 }
   0x5   :  { %p5543_p2 = pnand %p5541_p1, %p5538_p0 }
   0x7   :  { %5546 = shalt.err (!%p5543_p2)
}
   0x8   :  { %s5547_s24 = scalar_lea.vmem %s17_s16, 8192  ;;  %p5552_p4 = scmp.lt.s32.totalorder %s17_s16, %s17_s16 }
   0x9   :  { %p5548_p3 = scmp.ne.s32.totalorder %s17_s16, %s5547_s24  ;;  %p5553_p5 = scmp.lt.s32.totalorder %s5547_s24, %s5547_s24 }
   0xb   :  { %p5554_p6 = por %p5553_p5, %p5552_p4 }
   0xd   :  { %p5555_p7 = pnand %p5554_p6, %p5548_p3 }
   0xf   :  { %5558 = shalt.err (!%p5555_p7)
}
  0x10   :  { %s5586_s25 = smov 128   ;;  %s5587_s26 = smov 8  }
  0x11   :  { %22 = dma.hbm_to_vmem [thread:$0]  %s8368_s0, 8192, %s17_s16, [#allocation4], %s5586_s25, %s5586_s25, %s5587_s26  }
  0x12   :  { %5581 = dma.done.wait [#allocation4], 8192  }
  0x13   :  { %5582 = vsyncadd [#allocation4], 4294959104  ;;  %vm32_vm0 = vcmask 130048   ;;  %vm35_vm1 = vcmask 123904   ;;  %v5588_v0 = vmov 0.0   ;;  %v144_v1 = vld [vmem:[#allocation3 + $0x10] sm:$0xff] }
  0x14   :  { %33 = vst.msk [vmem:[#allocation2] sm:$0xff] %vm32_vm0, %v5588_v0  ;;  %34 = vst.msk [vmem:[#allocation2 + $0x8] sm:$0xff] %vm32_vm0, %v5588_v0  ;;  %v145_v2 = vld [vmem:[#allocation3 + $0x18] sm:$0xff]  ;;  %v142_v3 = vld [vmem:[#allocation3] sm:$0xff]  ;;  %vm475_vm2 = vcmask 1046528   ;;  %s5589_s0 = smov 16  }
  0x15   :  { %36 = vst.msk [vmem:[#allocation2 + $0x10] sm:$0x3] %vm35_vm1, %v5588_v0  ;;  %39 = vst.msk [vmem:[#allocation2 + $0x28] sm:$0x3] %vm35_vm1, %v5588_v0  ;;  %v143_v10 = vld [vmem:[#allocation3 + $0x8] sm:$0xff]  ;;  %v146_v11 = vld [vmem:[#allocation3 + $0x20] sm:$0xff] }
  0x16   :  { %37 = vst.msk [vmem:[#allocation2 + $0x18] sm:$0xff] %vm32_vm0, %v5588_v0  ;;  %38 = vst.msk [vmem:[#allocation2 + $0x20] sm:$0xff] %vm32_vm0, %v5588_v0  ;;  %v147_v12 = vld [vmem:[#allocation3 + $0x28] sm:$0xff]  ;;  %v148_v13 = vld [vmem:[#allocation3 + $0x30] sm:$0xff]  ;;  %vm636_vm3 = vcmask 1045504   ;;  %s5590_s29 = smov 32  }
  0x17   :  { %40 = vst.msk [vmem:[#allocation2 + $0x30] sm:$0xff] %vm32_vm0, %v5588_v0  ;;  %41 = vst.msk [vmem:[#allocation2 + $0x38] sm:$0xff] %vm32_vm0, %v5588_v0  ;;  %v149_v14 = vld [vmem:[#allocation3 + $0x38] sm:$0xff]  ;;  %v150_v17 = vld [vmem:[#allocation3 + $0x40] sm:$0xff]  ;;  %s5592_s24 = smov 48   ;;  %s5593_s27 = smov 64  }
  0x18   :  { %42 = vst.msk [vmem:[#allocation2 + $0x40] sm:$0x3] %vm35_vm1, %v5588_v0  ;;  %45 = vst.msk [vmem:[#allocation2 + $0x58] sm:$0x3] %vm35_vm1, %v5588_v0  ;;  %v151_v18 = vld [vmem:[#allocation3 + $0x48] sm:$0xff]  ;;  %v152_v19 = vld [vmem:[#allocation3 + $0x50] sm:$0xff] }
  0x19   :  { %43 = vst.msk [vmem:[#allocation2 + $0x48] sm:$0xff] %vm32_vm0, %v5588_v0  ;;  %44 = vst.msk [vmem:[#allocation2 + $0x50] sm:$0xff] %vm32_vm0, %v5588_v0  ;;  %v153_v21 = vld [vmem:[#allocation3 + $0x58] sm:$0xff]  ;;  %v154_v22 = vld [vmem:[#allocation3 + $0x60] sm:$0xff]  ;;  %s5594_s6 = smov 80   ;;  %s5595_s7 = smov 96  }
  0x1a   :  { %46 = vst.msk [vmem:[#allocation2 + $0x60] sm:$0xff] %vm32_vm0, %v5588_v0  ;;  %47 = vst.msk [vmem:[#allocation2 + $0x68] sm:$0xff] %vm32_vm0, %v5588_v0  ;;  %v155_v23 = vld [vmem:[#allocation3 + $0x68] sm:$0xff]  ;;  %v156_v24 = vld [vmem:[#allocation3 + $0x70] sm:$0xff]  ;;  %s5596_s12 = smov 112   ;;  %vm2257_vm4 = vcmask 261120  }
  0x1b   :  { %48 = vst.msk [vmem:[#allocation2 + $0x70] sm:$0x3] %vm35_vm1, %v5588_v0  ;;  %51 = vst.msk [vmem:[#allocation2 + $0x88] sm:$0x3] %vm35_vm1, %v5588_v0  ;;  %v5854_v4 = vld [vmem:[#allocation2] sm:$0xff]  ;;  %v5856_v5 = vld [vmem:[#allocation2 + $0x8] sm:$0xff] }
  0x1c   :  { %49 = vst.msk [vmem:[#allocation2 + $0x78] sm:$0xff] %vm32_vm0, %v5588_v0  ;;  %50 = vst.msk [vmem:[#allocation2 + $0x80] sm:$0xff] %vm32_vm0, %v5588_v0  ;;  %v5858_v6 = vld [vmem:[#allocation2 + $0x10] sm:$0x3]  ;;  %v476_v7 = vrot.slane %v5854_v4, 1  ;;  %v477_v8 = vrot.slane %v5856_v5, 1 }
  0x1d   :  { %52 = vst.msk [vmem:[#allocation2 + $0x90] sm:$0xff] %vm32_vm0, %v5588_v0  ;;  %53 = vst.msk [vmem:[#allocation2 + $0x98] sm:$0xff] %vm32_vm0, %v5588_v0  ;;  %v479_v9 = vrot.slane %v5858_v6, 1  ;;  %v157_v25 = vld [vmem:[#allocation3 + $0x78] sm:$0xff]  ;;  %v158_v26 = vld [vmem:[#allocation3 + $0x80] sm:$0xff]  ;;  %vm2322_vm5 = vcmask 392192  }
  0x1e   :  { %54 = vst.msk [vmem:[#allocation2 + $0xa0] sm:$0x3] %vm35_vm1, %v5588_v0  ;;  %57 = vst.msk [vmem:[#allocation2 + $0xb8] sm:$0x3] %vm35_vm1, %v5588_v0  ;;  %v478_v15 = vsel %vm475_vm2, %v476_v7, %v477_v8  ;;  %v159_v27 = vld [vmem:[#allocation3 + $0x88] sm:$0xff]  ;;  %v160_v28 = vld [vmem:[#allocation3 + $0x90] sm:$0xff] }
  0x1f   :  { %55 = vst.msk [vmem:[#allocation2 + $0xa8] sm:$0xff] %vm32_vm0, %v5588_v0  ;;  %56 = vst.msk [vmem:[#allocation2 + $0xb0] sm:$0xff] %vm32_vm0, %v5588_v0  ;;  %v480_v16 = vsel %vm475_vm2, %v477_v8, %v479_v9  ;;  %v161_v29 = vld [vmem:[#allocation3 + $0x98] sm:$0xff]  ;;  %v162_v37 = vld [vmem:[#allocation3 + $0xa0] sm:$0xff]  ;;  %vm2387_vm6 = vcmask 523264   ;;  %vm2452_vm7 = vcmask 654336  }
  0x20   :  { %58 = vst.msk [vmem:[#allocation2 + $0xc0] sm:$0xff] %vm32_vm0, %v5588_v0  ;;  %59 = vst.msk [vmem:[#allocation2 + $0xc8] sm:$0xff] %vm32_vm0, %v5588_v0  ;;  %v4302_v20 = vpack.i.bf16 %v480_v16, %v478_v15  ;;  %vm2517_vm8 = vcmask 785408   ;;  %vm2582_vm9 = vcmask 916480  }
  0x21   :  { %60 = vst.msk [vmem:[#allocation2 + $0xd0] sm:$0x3] %vm35_vm1, %v5588_v0  ;;  %63 = vst.msk [vmem:[#allocation2 + $0xe8] sm:$0x3] %vm35_vm1, %v5588_v0 }
  0x22   :  { %61 = vst.msk [vmem:[#allocation2 + $0xd8] sm:$0xff] %vm32_vm0, %v5588_v0  ;;  %62 = vst.msk [vmem:[#allocation2 + $0xe0] sm:$0xff] %vm32_vm0, %v5588_v0  ;;  %4303 = vrot.lane.b32.xlu0 %v4302_v20, %s5589_s0 }
  0x23   :  { %64 = vst.msk [vmem:[#allocation2 + $0xf0] sm:$0xff] %vm32_vm0, %v5588_v0  ;;  %65 = vst.msk [vmem:[#allocation2 + $0xf8] sm:$0xff] %vm32_vm0, %v5588_v0 }
  0x24   :  { %66 = vst.msk [vmem:[#allocation2 + $0x100] sm:$0x3] %vm35_vm1, %v5588_v0  ;;  %69 = vst.msk [vmem:[#allocation2 + $0x118] sm:$0x3] %vm35_vm1, %v5588_v0 }
  0x25   :  { %67 = vst.msk [vmem:[#allocation2 + $0x108] sm:$0xff] %vm32_vm0, %v5588_v0  ;;  %68 = vst.msk [vmem:[#allocation2 + $0x110] sm:$0xff] %vm32_vm0, %v5588_v0 }
  0x26   :  { %70 = vst.msk [vmem:[#allocation2 + $0x120] sm:$0xff] %vm32_vm0, %v5588_v0  ;;  %71 = vst.msk [vmem:[#allocation2 + $0x128] sm:$0xff] %vm32_vm0, %v5588_v0 }
  0x27   :  { %72 = vst.msk [vmem:[#allocation2 + $0x130] sm:$0x3] %vm35_vm1, %v5588_v0  ;;  %75 = vst.msk [vmem:[#allocation2 + $0x148] sm:$0x3] %vm35_vm1, %v5588_v0 }
  0x28   :  { %73 = vst.msk [vmem:[#allocation2 + $0x138] sm:$0xff] %vm32_vm0, %v5588_v0  ;;  %74 = vst.msk [vmem:[#allocation2 + $0x140] sm:$0xff] %vm32_vm0, %v5588_v0 }
  0x29   :  { %76 = vst.msk [vmem:[#allocation2 + $0x150] sm:$0xff] %vm32_vm0, %v5588_v0  ;;  %77 = vst.msk [vmem:[#allocation2 + $0x158] sm:$0xff] %vm32_vm0, %v5588_v0 }
  0x2a   :  { %78 = vst.msk [vmem:[#allocation2 + $0x160] sm:$0x3] %vm35_vm1, %v5588_v0  ;;  %81 = vst.msk [vmem:[#allocation2 + $0x178] sm:$0x3] %vm35_vm1, %v5588_v0 }
  0x2b   :  { %79 = vst.msk [vmem:[#allocation2 + $0x168] sm:$0xff] %vm32_vm0, %v5588_v0  ;;  %80 = vst.msk [vmem:[#allocation2 + $0x170] sm:$0xff] %vm32_vm0, %v5588_v0 }
  0x2c   :  { %82 = vst.msk [vmem:[#allocation2 + $0x180] sm:$0xff] %vm32_vm0, %v5588_v0  ;;  %83 = vst.msk [vmem:[#allocation2 + $0x188] sm:$0xff] %vm32_vm0, %v5588_v0 }
  0x2d   :  { %84 = vst.msk [vmem:[#allocation2 + $0x190] sm:$0x3] %vm35_vm1, %v5588_v0  ;;  %87 = vst.msk [vmem:[#allocation2 + $0x1a8] sm:$0x3] %vm35_vm1, %v5588_v0 }
  0x2e   :  { %85 = vst.msk [vmem:[#allocation2 + $0x198] sm:$0xff] %vm32_vm0, %v5588_v0  ;;  %86 = vst.msk [vmem:[#allocation2 + $0x1a0] sm:$0xff] %vm32_vm0, %v5588_v0 }
  0x2f   :  { %88 = vst.msk [vmem:[#allocation2 + $0x1b0] sm:$0xff] %vm32_vm0, %v5588_v0  ;;  %89 = vst.msk [vmem:[#allocation2 + $0x1b8] sm:$0xff] %vm32_vm0, %v5588_v0 }
  0x30   :  { %90 = vst.msk [vmem:[#allocation2 + $0x1c0] sm:$0x3] %vm35_vm1, %v5588_v0  ;;  %93 = vst.msk [vmem:[#allocation2 + $0x1d8] sm:$0x3] %vm35_vm1, %v5588_v0 }
  0x31   :  { %91 = vst.msk [vmem:[#allocation2 + $0x1c8] sm:$0xff] %vm32_vm0, %v5588_v0  ;;  %92 = vst.msk [vmem:[#allocation2 + $0x1d0] sm:$0xff] %vm32_vm0, %v5588_v0 }
  0x32   :  { %94 = vst.msk [vmem:[#allocation2 + $0x1e0] sm:$0xff] %vm32_vm0, %v5588_v0  ;;  %95 = vst.msk [vmem:[#allocation2 + $0x1e8] sm:$0xff] %vm32_vm0, %v5588_v0 }
  0x33   :  { %96 = vst.msk [vmem:[#allocation2 + $0x1f0] sm:$0x3] %vm35_vm1, %v5588_v0  ;;  %99 = vst.msk [vmem:[#allocation2 + $0x208] sm:$0x3] %vm35_vm1, %v5588_v0 }
  0x34   :  { %97 = vst.msk [vmem:[#allocation2 + $0x1f8] sm:$0xff] %vm32_vm0, %v5588_v0  ;;  %98 = vst.msk [vmem:[#allocation2 + $0x200] sm:$0xff] %vm32_vm0, %v5588_v0 }
  0x35   :  { %100 = vst.msk [vmem:[#allocation2 + $0x210] sm:$0xff] %vm32_vm0, %v5588_v0  ;;  %101 = vst.msk [vmem:[#allocation2 + $0x218] sm:$0xff] %vm32_vm0, %v5588_v0 }
  0x36   :  { %102 = vst.msk [vmem:[#allocation2 + $0x220] sm:$0x3] %vm35_vm1, %v5588_v0  ;;  %105 = vst.msk [vmem:[#allocation2 + $0x238] sm:$0x3] %vm35_vm1, %v5588_v0 }
  0x37   :  { %103 = vst.msk [vmem:[#allocation2 + $0x228] sm:$0xff] %vm32_vm0, %v5588_v0  ;;  %104 = vst.msk [vmem:[#allocation2 + $0x230] sm:$0xff] %vm32_vm0, %v5588_v0 }
  0x38   :  { %106 = vst.msk [vmem:[#allocation2 + $0x240] sm:$0xff] %vm32_vm0, %v5588_v0  ;;  %107 = vst.msk [vmem:[#allocation2 + $0x248] sm:$0xff] %vm32_vm0, %v5588_v0 }
  0x39   :  { %108 = vst.msk [vmem:[#allocation2 + $0x250] sm:$0x3] %vm35_vm1, %v5588_v0  ;;  %111 = vst.msk [vmem:[#allocation2 + $0x268] sm:$0x3] %vm35_vm1, %v5588_v0 }
  0x3a   :  { %109 = vst.msk [vmem:[#allocation2 + $0x258] sm:$0xff] %vm32_vm0, %v5588_v0  ;;  %110 = vst.msk [vmem:[#allocation2 + $0x260] sm:$0xff] %vm32_vm0, %v5588_v0 }
  0x3b   :  { %112 = vst.msk [vmem:[#allocation2 + $0x270] sm:$0xff] %vm32_vm0, %v5588_v0  ;;  %113 = vst.msk [vmem:[#allocation2 + $0x278] sm:$0xff] %vm32_vm0, %v5588_v0 }
  0x3c   :  { %114 = vst.msk [vmem:[#allocation2 + $0x280] sm:$0x3] %vm35_vm1, %v5588_v0  ;;  %117 = vst.msk [vmem:[#allocation2 + $0x298] sm:$0x3] %vm35_vm1, %v5588_v0 }
  0x3d   :  { %115 = vst.msk [vmem:[#allocation2 + $0x288] sm:$0xff] %vm32_vm0, %v5588_v0  ;;  %116 = vst.msk [vmem:[#allocation2 + $0x290] sm:$0xff] %vm32_vm0, %v5588_v0 }
  0x3e   :  { %118 = vst.msk [vmem:[#allocation2 + $0x2a0] sm:$0xff] %vm32_vm0, %v5588_v0  ;;  %119 = vst.msk [vmem:[#allocation2 + $0x2a8] sm:$0xff] %vm32_vm0, %v5588_v0 }
  0x3f   :  { %120 = vst.msk [vmem:[#allocation2 + $0x2b0] sm:$0x3] %vm35_vm1, %v5588_v0  ;;  %123 = vst.msk [vmem:[#allocation2 + $0x2c8] sm:$0x3] %vm35_vm1, %v5588_v0 }
  0x40   :  { %121 = vst.msk [vmem:[#allocation2 + $0x2b8] sm:$0xff] %vm32_vm0, %v5588_v0  ;;  %122 = vst.msk [vmem:[#allocation2 + $0x2c0] sm:$0xff] %vm32_vm0, %v5588_v0 }
  0x41   :  { %124 = vst.msk [vmem:[#allocation2 + $0x2d0] sm:$0xff] %vm32_vm0, %v5588_v0  ;;  %125 = vst.msk [vmem:[#allocation2 + $0x2d8] sm:$0xff] %vm32_vm0, %v5588_v0 }
  0x42   :  { %126 = vst.msk [vmem:[#allocation2 + $0x2e0] sm:$0x3] %vm35_vm1, %v5588_v0  ;;  %129 = vst.msk [vmem:[#allocation2 + $0x2f8] sm:$0x3] %vm35_vm1, %v5588_v0 }
  0x43   :  { %127 = vst.msk [vmem:[#allocation2 + $0x2e8] sm:$0xff] %vm32_vm0, %v5588_v0  ;;  %128 = vst.msk [vmem:[#allocation2 + $0x2f0] sm:$0xff] %vm32_vm0, %v5588_v0 }
  0x44   :  { %130 = vst.msk [vmem:[#allocation2 + $0x300] sm:$0xff] %vm32_vm0, %v5588_v0  ;;  %131 = vst.msk [vmem:[#allocation2 + $0x308] sm:$0xff] %vm32_vm0, %v5588_v0 }
  0x45   :  { %132 = vst.msk [vmem:[#allocation2 + $0x310] sm:$0x3] %vm35_vm1, %v5588_v0  ;;  %135 = vst.msk [vmem:[#allocation2 + $0x328] sm:$0x3] %vm35_vm1, %v5588_v0 }
  0x46   :  { %133 = vst.msk [vmem:[#allocation2 + $0x318] sm:$0xff] %vm32_vm0, %v5588_v0  ;;  %134 = vst.msk [vmem:[#allocation2 + $0x320] sm:$0xff] %vm32_vm0, %v5588_v0 }
  0x47   :  { %136 = vst.msk [vmem:[#allocation2 + $0x330] sm:$0xff] %vm32_vm0, %v5588_v0  ;;  %137 = vst.msk [vmem:[#allocation2 + $0x338] sm:$0xff] %vm32_vm0, %v5588_v0 }
  0x48   :  { %138 = vst.msk [vmem:[#allocation2 + $0x340] sm:$0x3] %vm35_vm1, %v5588_v0  ;;  %141 = vst.msk [vmem:[#allocation2 + $0x358] sm:$0x3] %vm35_vm1, %v5588_v0 }
  0x49   :  { %139 = vst.msk [vmem:[#allocation2 + $0x348] sm:$0xff] %vm32_vm0, %v5588_v0  ;;  %140 = vst.msk [vmem:[#allocation2 + $0x350] sm:$0xff] %vm32_vm0, %v5588_v0 }
  0x4a   :  { %209 = vst.msk [vmem:[#allocation2 + $0x31] sm:$0xff] %vm32_vm0, %v144_v1  ;;  %210 = vst.msk [vmem:[#allocation2 + $0x39] sm:$0xff] %vm32_vm0, %v145_v2 }
  0x4b   :  { %207 = vst.msk [vmem:[#allocation2 + $0x19] sm:$0xff] %vm32_vm0, %v142_v3  ;;  %208 = vst.msk [vmem:[#allocation2 + $0x21] sm:$0xff] %vm32_vm0, %v143_v10 }
  0x4c   :  { %211 = vst.msk [vmem:[#allocation2 + $0x49] sm:$0xff] %vm32_vm0, %v146_v11  ;;  %212 = vst.msk [vmem:[#allocation2 + $0x51] sm:$0xff] %vm32_vm0, %v147_v12 }
  0x4d   :  { %213 = vst.msk [vmem:[#allocation2 + $0x61] sm:$0xff] %vm32_vm0, %v148_v13  ;;  %214 = vst.msk [vmem:[#allocation2 + $0x69] sm:$0xff] %vm32_vm0, %v149_v14 }
  0x4e   :  { %215 = vst.msk [vmem:[#allocation2 + $0x79] sm:$0xff] %vm32_vm0, %v150_v17  ;;  %216 = vst.msk [vmem:[#allocation2 + $0x81] sm:$0xff] %vm32_vm0, %v151_v18 }
  0x4f   :  { %217 = vst.msk [vmem:[#allocation2 + $0x91] sm:$0xff] %vm32_vm0, %v152_v19  ;;  %218 = vst.msk [vmem:[#allocation2 + $0x99] sm:$0xff] %vm32_vm0, %v153_v21 }
  0x50   :  { %219 = vst.msk [vmem:[#allocation2 + $0xa9] sm:$0xff] %vm32_vm0, %v154_v22  ;;  %220 = vst.msk [vmem:[#allocation2 + $0xb1] sm:$0xff] %vm32_vm0, %v155_v23 }
  0x51   :  { %221 = vst.msk [vmem:[#allocation2 + $0xc1] sm:$0xff] %vm32_vm0, %v156_v24  ;;  %222 = vst.msk [vmem:[#allocation2 + $0xc9] sm:$0xff] %vm32_vm0, %v157_v25  ;;  %v5883_v30 = vld [vmem:[#allocation2 + $0x30] sm:$0xff]  ;;  %v5885_v31 = vld [vmem:[#allocation2 + $0x38] sm:$0xff] }
  0x52   :  { %223 = vst.msk [vmem:[#allocation2 + $0xd9] sm:$0xff] %vm32_vm0, %v158_v26  ;;  %v5887_v32 = vld [vmem:[#allocation2 + $0x40] sm:$0x3]  ;;  %224 = vst.msk [vmem:[#allocation2 + $0xe1] sm:$0xff] %vm32_vm0, %v159_v27  ;;  %v486_v33 = vrot.slane %v5883_v30, 1  ;;  %v487_v34 = vrot.slane %v5885_v31, 1 }
  0x53   :  { %225 = vst.msk [vmem:[#allocation2 + $0xf1] sm:$0xff] %vm32_vm0, %v160_v28  ;;  %226 = vst.msk [vmem:[#allocation2 + $0xf9] sm:$0xff] %vm32_vm0, %v161_v29  ;;  %v489_v35 = vrot.slane %v5887_v32, 1  ;;  %v5895_v36 = vld [vmem:[#allocation2 + $0x18] sm:$0xff]  ;;  %v5897_v38 = vld [vmem:[#allocation2 + $0x20] sm:$0xff] }
  0x54   :  { %v5899_v39 = vld [vmem:[#allocation2 + $0x28] sm:$0x3]  ;;  %v481_v40 = vrot.slane %v5895_v36, 1  ;;  %227 = vst.msk [vmem:[#allocation2 + $0x109] sm:$0xff] %vm32_vm0, %v162_v37  ;;  %v488_v42 = vsel %vm475_vm2, %v486_v33, %v487_v34  ;;  %v482_v44 = vrot.slane %v5897_v38, 1  ;;  %v5909_v46 = vld [vmem:[#allocation2 + $0x50] sm:$0xff] }
  0x55   :  { %v5902_v41 = vld [vmem:[#allocation2 + $0x48] sm:$0xff]  ;;  %v490_v43 = vsel %vm475_vm2, %v487_v34, %v489_v35  ;;  %v484_v45 = vrot.slane %v5899_v39, 1  ;;  %v5911_v47 = vld [vmem:[#allocation2 + $0x58] sm:$0x3]  ;;  %v5913_v48 = vld [vmem:[#allocation2 + $0x60] sm:$0xff]  ;;  %v492_v51 = vrot.slane %v5909_v46, 1 }
  0x56   :  { %v5915_v49 = vpack.i.bf16 %v490_v43, %v488_v42  ;;  %v491_v50 = vrot.slane %v5902_v41, 1  ;;  %v494_v52 = vrot.slane %v5911_v47, 1  ;;  %v5920_v53 = vld [vmem:[#allocation2 + $0x68] sm:$0xff]  ;;  %v5922_v54 = vld [vmem:[#allocation2 + $0x70] sm:$0x3]  ;;  %v483_v55 = vsel %vm475_vm2, %v481_v40, %v482_v44  ;;  %v5928_v59 = vld [vmem:[#allocation2 + $0x78] sm:$0xff] }
  0x57   :  { %v485_v56 = vsel %vm475_vm2, %v482_v44, %v484_v45  ;;  %v496_v57 = vrot.slane %v5913_v48, 1  ;;  %v497_v58 = vrot.slane %v5920_v53, 1  ;;  %v5930_v60 = vld [vmem:[#allocation2 + $0x80] sm:$0xff]  ;;  %v5932_v61 = vld [vmem:[#allocation2 + $0x88] sm:$0x3]  ;;  %v499_v1 = vrot.slane %v5922_v54, 1 }
  0x58   :  { %8496 = vst [vmem:[#allocation9_spill] sm:$0xff] %v5915_v49  ;;  %4313 = vrot.lane.b32.xlu1 %v5915_v49, %s5589_s0  ;;  %v5936_v62 = vpack.i.bf16 %v485_v56, %v483_v55  ;;  %v493_v63 = vsel %vm475_vm2, %v491_v50, %v492_v51  ;;  %v495_v0 = vsel %vm475_vm2, %v492_v51, %v494_v52  ;;  %v5941_v2 = vld [vmem:[#allocation2 + $0x90] sm:$0xff]  ;;  %v5943_v3 = vld [vmem:[#allocation2 + $0x98] sm:$0xff]  ;;  %v5945_v7 = vld [vmem:[#allocation2 + $0xa0] sm:$0x3]  ;;  %v501_v10 = vrot.slane %v5928_v59, 1 }
  0x59   :  { %v5947_v8 = vpack.i.bf16 %v495_v0, %v493_v63  ;;  %v498_v9 = vsel %vm475_vm2, %v496_v57, %v497_v58  ;;  %v502_v11 = vrot.slane %v5930_v60, 1  ;;  %v5952_v12 = vld [vmem:[#allocation2 + $0xa8] sm:$0xff]  ;;  %v5954_v13 = vld [vmem:[#allocation2 + $0xb0] sm:$0xff]  ;;  %v5956_v14 = vld [vmem:[#allocation2 + $0xb8] sm:$0x3]  ;;  %v500_v15 = vsel %vm475_vm2, %v497_v58, %v499_v1 }
  0x5a   :  { %8497 = vst [vmem:[#allocation10_spill] sm:$0xff] %v5936_v62  ;;  %4308 = vrot.lane.b32.xlu0 %v5936_v62, %s5589_s0  ;;  %v504_v16 = vrot.slane %v5932_v61, 1  ;;  %v506_v17 = vrot.slane %v5941_v2, 1  ;;  %v507_v18 = vrot.slane %v5943_v3, 1  ;;  %v5964_v19 = vld [vmem:[#allocation2 + $0xc0] sm:$0xff]  ;;  %v5966_v20 = vld [vmem:[#allocation2 + $0xc8] sm:$0xff]  ;;  %v5968_v21 = vpack.i.bf16 %v500_v15, %v498_v9 }
  0x5b   :  { %8498 = vst [vmem:[#allocation11_spill] sm:$0xff] %v5947_v8  ;;  %v503_v22 = vsel %vm475_vm2, %v501_v10, %v502_v11  ;;  %v509_v23 = vrot.slane %v5945_v7, 1  ;;  %v511_v24 = vrot.slane %v5952_v12, 1  ;;  %v5973_v25 = vld [vmem:[#allocation2 + $0xd0] sm:$0x3]  ;;  %v5975_v26 = vld [vmem:[#allocation2 + $0xd8] sm:$0xff] }
  0x5c   :  { %8499 = vst [vmem:[#allocation12_spill] sm:$0xff] %v5968_v21  ;;  %v5977_v27 = vld [vmem:[#allocation2 + $0xe0] sm:$0xff]  ;;  %4318 = vrot.lane.b32.xlu1 %v5947_v8, %s5589_s0  ;;  %v505_v28 = vsel %vm475_vm2, %v502_v11, %v504_v16  ;;  %v508_v29 = vsel %vm475_vm2, %v506_v17, %v507_v18  ;;  %v512_v33 = vrot.slane %v5954_v13, 1  ;;  %v514_v34 = vrot.slane %v5956_v14, 1  ;;  %v5985_v35 = vld [vmem:[#allocation2 + $0xe8] sm:$0x3] }
  0x5d   :  { %v5987_v37 = vld [vmem:[#allocation2 + $0xf0] sm:$0xff]  ;;  %v163_v40 = vld [vmem:[#allocation3 + $0xa8] sm:$0xff]  ;;  %v5989_v42 = vpack.i.bf16 %v505_v28, %v503_v22  ;;  %v510_v43 = vsel %vm475_vm2, %v507_v18, %v509_v23  ;;  %v516_v44 = vrot.slane %v5964_v19, 1  ;;  %v517_v45 = vrot.slane %v5966_v20, 1  ;;  %v5994_v50 = vld [vmem:[#allocation2 + $0xf8] sm:$0xff] }
  0x5e   :  { %v5996_v51 = vld [vmem:[#allocation2 + $0x100] sm:$0x3]  ;;  %228 = vst.msk [vmem:[#allocation2 + $0x111] sm:$0xff] %vm32_vm0, %v163_v40  ;;  %v164_v52 = vld [vmem:[#allocation3 + $0xb0] sm:$0xff]  ;;  %4323 = vrot.lane.b32.xlu0 %v5968_v21, %s5589_s0  ;;  %v6001_v55 = vpack.i.bf16 %v510_v43, %v508_v29  ;;  %v513_v56 = vsel %vm475_vm2, %v511_v24, %v512_v33  ;;  %v515_v57 = vsel %vm475_vm2, %v512_v33, %v514_v34  ;;  %v519_v58 = vrot.slane %v5973_v25, 1  ;;  %v165_v63 = vld [vmem:[#allocation3 + $0xb8] sm:$0xff] }
  0x5f   :  { %8500 = vst [vmem:[#allocation13_spill] sm:$0xff] %v5989_v42  ;;  %229 = vst.msk [vmem:[#allocation2 + $0x121] sm:$0xff] %vm32_vm0, %v164_v52  ;;  %v166_v0 = vld [vmem:[#allocation3 + $0xc0] sm:$0xff]  ;;  %v167_v1 = vld [vmem:[#allocation3 + $0xc8] sm:$0xff]  ;;  %v6007_v9 = vpack.i.bf16 %v515_v57, %v513_v56  ;;  %v518_v10 = vsel %vm475_vm2, %v516_v44, %v517_v45  ;;  %v521_v11 = vrot.slane %v5975_v26, 1  ;;  %v522_v15 = vrot.slane %v5977_v27, 1 }
  0x60   :  { %8501 = vst [vmem:[#allocation14_spill] sm:$0xff] %v6001_v55  ;;  %230 = vst.msk [vmem:[#allocation2 + $0x129] sm:$0xff] %vm32_vm0, %v165_v63  ;;  %v168_v16 = vld [vmem:[#allocation3 + $0xd0] sm:$0xff]  ;;  %v169_v17 = vld [vmem:[#allocation3 + $0xd8] sm:$0xff]  ;;  %4328 = vrot.lane.b32.xlu1 %v5989_v42, %s5589_s0  ;;  %v520_v22 = vsel %vm475_vm2, %v517_v45, %v519_v58  ;;  %v524_v23 = vrot.slane %v5985_v35, 1  ;;  %v526_v24 = vrot.slane %v5987_v37, 1 }
  0x61   :  { %8502 = vst [vmem:[#allocation15_spill] sm:$0xff] %v6007_v9  ;;  %231 = vst.msk [vmem:[#allocation2 + $0x139] sm:$0xff] %vm32_vm0, %v166_v0  ;;  %v170_v18 = vld [vmem:[#allocation3 + $0xe0] sm:$0xff]  ;;  %v527_v28 = vrot.slane %v5994_v50, 1  ;;  %v6021_v29 = vld [vmem:[#allocation2 + $0x108] sm:$0xff]  ;;  %v523_v40 = vsel %vm475_vm2, %v521_v11, %v522_v15  ;;  %v529_v43 = vrot.slane %v5996_v51, 1  ;;  %v6035_v56 = vpack.i.bf16 %v520_v22, %v518_v10 }
  0x62   :  { %232 = vst.msk [vmem:[#allocation2 + $0x141] sm:$0xff] %vm32_vm0, %v167_v1  ;;  %233 = vst.msk [vmem:[#allocation2 + $0x151] sm:$0xff] %vm32_vm0, %v168_v16  ;;  %v171_v33 = vld [vmem:[#allocation3 + $0xe8] sm:$0xff]  ;;  %v6026_v34 = vld [vmem:[#allocation2 + $0x1b0] sm:$0xff]  ;;  %4333 = vrot.lane.b32.xlu0 %v6001_v55, %s5589_s0  ;;  %v525_v57 = vsel %vm475_vm2, %v522_v15, %v524_v23  ;;  %v531_v16 = vrot.slane %v6021_v29, 1 }
  0x63   :  { %234 = vst.msk [vmem:[#allocation2 + $0x159] sm:$0xff] %vm32_vm0, %v169_v17  ;;  %235 = vst.msk [vmem:[#allocation2 + $0x169] sm:$0xff] %vm32_vm0, %v170_v18  ;;  %v6031_v44 = vld [vmem:[#allocation2 + $0x1b8] sm:$0xff]  ;;  %v174_v45 = vld [vmem:[#allocation3 + $0x100] sm:$0xff]  ;;  %v528_v1 = vsel %vm475_vm2, %v526_v24, %v527_v28  ;;  %v530_v11 = vsel %vm475_vm2, %v527_v28, %v529_v43  ;;  %v6048_v18 = vpack.i.bf16 %v525_v57, %v523_v40  ;;  %v556_v40 = vrot.slane %v6026_v34, 1 }
  0x64   :  { %236 = vst.msk [vmem:[#allocation2 + $0x171] sm:$0xff] %vm32_vm0, %v171_v33  ;;  %v175_v52 = vld [vmem:[#allocation3 + $0x108] sm:$0xff]  ;;  %8503 = vst [vmem:[#allocation16_spill] sm:$0xff] %v6035_v56  ;;  %v176_v58 = vld [vmem:[#allocation3 + $0x110] sm:$0xff]  ;;  %4338 = vrot.lane.b32.xlu1 %v6007_v9, %s5589_s0  ;;  %v6065_v57 = vpack.i.bf16 %v530_v11, %v528_v1  ;;  %v557_v34 = vrot.slane %v6031_v44, 1 }
  0x65   :  { %239 = vst.msk [vmem:[#allocation2 + $0x1c9] sm:$0xff] %vm32_vm0, %v174_v45  ;;  %240 = vst.msk [vmem:[#allocation2 + $0x1d1] sm:$0xff] %vm32_vm0, %v175_v52  ;;  %v177_v63 = vld [vmem:[#allocation3 + $0x118] sm:$0xff]  ;;  %v178_v0 = vld [vmem:[#allocation3 + $0x120] sm:$0xff] }
  0x66   :  { %241 = vst.msk [vmem:[#allocation2 + $0x1e1] sm:$0xff] %vm32_vm0, %v176_v58  ;;  %242 = vst.msk [vmem:[#allocation2 + $0x1e9] sm:$0xff] %vm32_vm0, %v177_v63  ;;  %v179_v10 = vld [vmem:[#allocation3 + $0x128] sm:$0xff]  ;;  %v180_v15 = vld [vmem:[#allocation3 + $0x130] sm:$0xff]  ;;  %4343 = vrot.lane.b32.xlu0 %v6035_v56, %s5589_s0 }
  0x67   :  { %243 = vst.msk [vmem:[#allocation2 + $0x1f9] sm:$0xff] %vm32_vm0, %v178_v0  ;;  %v181_v17 = vld [vmem:[#allocation3 + $0x138] sm:$0xff]  ;;  %8504 = vst [vmem:[#allocation17_spill] sm:$0xff] %v6048_v18  ;;  %v6050_v22 = vld [vmem:[#allocation2 + $0x110] sm:$0xff] }
  0x68   :  { %8505 = vst [vmem:[#allocation18_spill] sm:$0xff] %v6050_v22  ;;  %v6052_v23 = vld [vmem:[#allocation2 + $0x118] sm:$0x3]  ;;  %244 = vst.msk [vmem:[#allocation2 + $0x201] sm:$0xff] %vm32_vm0, %v179_v10  ;;  %v182_v24 = vld [vmem:[#allocation3 + $0x140] sm:$0xff]  ;;  %v532_v28 = vrot.slane %v6050_v22, 1  ;;  %4348 = vrot.lane.b32.xlu1 %v6048_v18, %s5589_s0 }
  0x69   :  { %8506 = vst [vmem:[#allocation19_spill] sm:$0xff] %v6052_v23  ;;  %245 = vst.msk [vmem:[#allocation2 + $0x211] sm:$0xff] %vm32_vm0, %v180_v15  ;;  %v534_v33 = vrot.slane %v6052_v23, 1  ;;  %v6059_v43 = vld [vmem:[#allocation2 + $0x120] sm:$0xff]  ;;  %v183_v45 = vld [vmem:[#allocation3 + $0x148] sm:$0xff] }
  0x6a   :  { %246 = vst.msk [vmem:[#allocation2 + $0x219] sm:$0xff] %vm32_vm0, %v181_v17  ;;  %8507 = vst [vmem:[#allocation20_spill] sm:$0xff] %v6059_v43  ;;  %v184_v52 = vld [vmem:[#allocation3 + $0x150] sm:$0xff]  ;;  %v6067_v58 = vld [vmem:[#allocation2 + $0x128] sm:$0xff]  ;;  %v536_v0 = vrot.slane %v6059_v43, 1  ;;  %v533_v17 = vsel %vm475_vm2, %v531_v16, %v532_v28  ;;  %4353 = vrot.lane.b32.xlu0 %v6065_v57, %s5589_s0 }
  0x6b   :  { %247 = vst.msk [vmem:[#allocation2 + $0x229] sm:$0xff] %vm32_vm0, %v182_v24  ;;  %8508 = vst [vmem:[#allocation21_spill] sm:$0xff] %v6065_v57  ;;  %v6069_v63 = vld [vmem:[#allocation2 + $0x130] sm:$0x3]  ;;  %v6072_v10 = vld [vmem:[#allocation2 + $0x138] sm:$0xff]  ;;  %v535_v1 = vsel %vm475_vm2, %v532_v28, %v534_v33  ;;  %v537_v11 = vrot.slane %v6067_v58, 1 }
  0x6c   :  { %8509 = vst [vmem:[#allocation22_spill] sm:$0xff] %v6067_v58  ;;  %8510 = vst [vmem:[#allocation23_spill] sm:$0xff] %v6069_v63  ;;  %v327_v15 = vld [vmem:[#allocation2 + $0x1c0] sm:$0x3]  ;;  %v539_v24 = vrot.slane %v6069_v63, 1  ;;  %v313_v55 = vld [vmem:[#allocation2 + $0x150] sm:$0xff]  ;;  %v6087_v44 = vpack.i.bf16 %v535_v1, %v533_v17 }
  0x6d   :  { %8511 = vst [vmem:[#allocation24_spill] sm:$0xff] %v6072_v10  ;;  %248 = vst.msk [vmem:[#allocation2 + $0x231] sm:$0xff] %vm32_vm0, %v183_v45  ;;  %v6081_v56 = vld [vmem:[#allocation2 + $0x140] sm:$0xff]  ;;  %v6083_v9 = vld [vmem:[#allocation2 + $0x148] sm:$0x3]  ;;  %v541_v45 = vrot.slane %v6072_v10, 1  ;;  %v538_v42 = vsel %vm475_vm2, %v536_v0, %v537_v11 }
  0x6e   :  { %249 = vst.msk [vmem:[#allocation2 + $0x241] sm:$0xff] %vm32_vm0, %v184_v52  ;;  %8512 = vst [vmem:[#allocation25_spill] sm:$0xff] %v6081_v56  ;;  %v542_v16 = vrot.slane %v6081_v56, 1  ;;  %v544_v28 = vrot.slane %v6083_v9, 1  ;;  %v314_v33 = vld [vmem:[#allocation2 + $0x158] sm:$0xff]  ;;  %v540_v21 = vsel %vm475_vm2, %v537_v11, %v539_v24  ;;  %v546_v8 = vrot.slane %v313_v55, 1  ;;  %4358 = vrot.lane.b32.xlu1 %v6087_v44, %s5589_s0 }
  0x6f   :  { %8513 = vst [vmem:[#allocation26_spill] sm:$0xff] %v6083_v9  ;;  %8514 = vst [vmem:[#allocation27_spill] sm:$0xff] %v6087_v44  ;;  %v315_v52 = vld [vmem:[#allocation2 + $0x160] sm:$0x3]  ;;  %v547_v49 = vrot.slane %v314_v33, 1  ;;  %v316_v62 = vld [vmem:[#allocation2 + $0x168] sm:$0xff]  ;;  %v6096_v17 = vpack.i.bf16 %v540_v21, %v538_v42 }
  0x70   :  { %v317_v63 = vld [vmem:[#allocation2 + $0x170] sm:$0xff]  ;;  %v318_v58 = vld [vmem:[#allocation2 + $0x178] sm:$0x3]  ;;  %v543_v1 = vsel %vm475_vm2, %v541_v45, %v542_v16  ;;  %v545_v18 = vsel %vm475_vm2, %v542_v16, %v544_v28  ;;  %v549_v9 = vrot.slane %v315_v52, 1  ;;  %v328_v56 = vld [vmem:[#allocation2 + $0x1c8] sm:$0xff]  ;;  %v551_v55 = vrot.slane %v316_v62, 1 }
  0x71   :  { %8515 = vst [vmem:[#allocation28_spill] sm:$0xff] %v6096_v17  ;;  %v329_v10 = vld [vmem:[#allocation2 + $0x1d0] sm:$0xff]  ;;  %v330_v0 = vld [vmem:[#allocation2 + $0x1d8] sm:$0x3]  ;;  %v548_v11 = vsel %vm475_vm2, %v546_v8, %v547_v49  ;;  %v559_v24 = vrot.slane %v327_v15, 1  ;;  %v331_v33 = vld [vmem:[#allocation2 + $0x1e0] sm:$0xff]  ;;  %v6103_v43 = vpack.i.bf16 %v545_v18, %v543_v1  ;;  %v6107_v28 = vsel %vm475_vm2, %v556_v40, %v557_v34  ;;  %4363 = vrot.lane.b32.xlu0 %v6096_v17, %s5589_s0 }
  0x72   :  { %v550_v21 = vsel %vm475_vm2, %v547_v49, %v549_v9  ;;  %v552_v42 = vrot.slane %v317_v63, 1  ;;  %v554_v45 = vrot.slane %v318_v58, 1  ;;  %v332_v57 = vld [vmem:[#allocation2 + $0x1e8] sm:$0xff]  ;;  %v333_v16 = vld [vmem:[#allocation2 + $0x1f0] sm:$0x3]  ;;  %v561_v52 = vrot.slane %v328_v56, 1 }
  0x73   :  { %8516 = vst [vmem:[#allocation29_spill] sm:$0xff] %v6103_v43  ;;  %v562_v23 = vrot.slane %v329_v10, 1  ;;  %v564_v8 = vrot.slane %v330_v0, 1  ;;  %v6109_v62 = vld [vmem:[#allocation2 + $0x1f8] sm:$0xff]  ;;  %v6111_v15 = vld [vmem:[#allocation2 + $0x200] sm:$0xff]  ;;  %v6115_v18 = vpack.i.bf16 %v550_v21, %v548_v11  ;;  %v566_v58 = vrot.slane %v331_v33, 1  ;;  %4368 = vrot.lane.b32.xlu1 %v6103_v43, %s5589_s0 }
  0x74   :  { %v553_v49 = vsel %vm475_vm2, %v551_v55, %v552_v42  ;;  %v555_v9 = vsel %vm475_vm2, %v552_v42, %v554_v45  ;;  %v336_v63 = vld [vmem:[#allocation2 + $0x208] sm:$0x3]  ;;  %v6119_v40 = vld [vmem:[#allocation2 + $0x210] sm:$0xff]  ;;  %v6121_v56 = vld [vmem:[#allocation2 + $0x218] sm:$0xff]  ;;  %v6124_v10 = vsel %vm475_vm2, %v557_v34, %v559_v24  ;;  %v567_v17 = vrot.slane %v332_v57, 1 }
  0x75   :  { %8517 = vst [vmem:[#allocation30_spill] sm:$0xff] %v6115_v18  ;;  %v563_v1 = vsel %vm475_vm2, %v561_v52, %v562_v23  ;;  %v565_v0 = vsel %vm475_vm2, %v562_v23, %v564_v8  ;;  %v6128_v11 = vld [vmem:[#allocation2 + $0x220] sm:$0x3]  ;;  %v6130_v21 = vld [vmem:[#allocation2 + $0x228] sm:$0xff]  ;;  %v185_v55 = vld [vmem:[#allocation3 + $0x158] sm:$0xff]  ;;  %v6134_v33 = vpack.i.bf16 %v555_v9, %v553_v49  ;;  %v569_v45 = vrot.slane %v333_v16, 1  ;;  %4373 = vrot.lane.b32.xlu0 %v6115_v18, %s5589_s0 }
  0x76   :  { %v6136_v42 = vpack.i.bf16 %v565_v0, %v563_v1  ;;  %v6138_v34 = vld [vmem:[#allocation2 + $0x230] sm:$0xff]  ;;  %v6140_v24 = vld [vmem:[#allocation2 + $0x238] sm:$0x3]  ;;  %250 = vst.msk [vmem:[#allocation2 + $0x249] sm:$0xff] %vm32_vm0, %v185_v55  ;;  %v186_v23 = vld [vmem:[#allocation3 + $0x160] sm:$0xff]  ;;  %v571_v8 = vrot.slane %v6109_v62, 1  ;;  %v4382_v1 = vpack.i.bf16 %v6124_v10, %v6107_v28  ;;  %v568_v62 = vsel %vm475_vm2, %v566_v58, %v567_v17 }
  0x77   :  { %8518 = vst [vmem:[#allocation31_spill] sm:$0xff] %v6134_v33  ;;  %v187_v57 = vld [vmem:[#allocation3 + $0x168] sm:$0xff]  ;;  %v188_v52 = vld [vmem:[#allocation3 + $0x170] sm:$0xff]  ;;  %v572_v44 = vrot.slane %v6111_v15, 1  ;;  %v574_v22 = vrot.slane %v336_v63, 1  ;;  %251 = vst.msk [vmem:[#allocation2 + $0x259] sm:$0xff] %vm32_vm0, %v186_v23  ;;  %v570_v23 = vsel %vm475_vm2, %v567_v17, %v569_v45  ;;  %4378 = vrot.lane.b32.xlu1 %v6134_v33, %s5589_s0 }
  0x78   :  { %8519 = vst [vmem:[#allocation32_spill] sm:$0xff] %v6136_v42  ;;  %252 = vst.msk [vmem:[#allocation2 + $0x261] sm:$0xff] %vm32_vm0, %v187_v57  ;;  %v189_v49 = vld [vmem:[#allocation3 + $0x178] sm:$0xff]  ;;  %v190_v16 = vld [vmem:[#allocation3 + $0x180] sm:$0xff]  ;;  %v576_v57 = vrot.slane %v6119_v40, 1  ;;  %v579_v28 = vrot.slane %v6128_v11, 1 }
  0x79   :  { %253 = vst.msk [vmem:[#allocation2 + $0x271] sm:$0xff] %vm32_vm0, %v188_v52  ;;  %v191_v9 = vld [vmem:[#allocation3 + $0x188] sm:$0xff]  ;;  %v6153_v0 = vld [vmem:[#allocation2 + $0x240] sm:$0xff]  ;;  %254 = vst.msk [vmem:[#allocation2 + $0x279] sm:$0xff] %vm32_vm0, %v189_v49  ;;  %v577_v52 = vrot.slane %v6121_v56, 1  ;;  %v581_v17 = vrot.slane %v6130_v21, 1  ;;  %4383 = vrot.lane.b32.xlu0 %v4382_v1, %s5589_s0 }
  0x7a   :  { %255 = vst.msk [vmem:[#allocation2 + $0x289] sm:$0xff] %vm32_vm0, %v190_v16  ;;  %256 = vst.msk [vmem:[#allocation2 + $0x291] sm:$0xff] %vm32_vm0, %v191_v9  ;;  %v192_v15 = vld [vmem:[#allocation3 + $0x190] sm:$0xff]  ;;  %v193_v63 = vld [vmem:[#allocation3 + $0x198] sm:$0xff]  ;;  %v647_v45 = vrot.slane %v5883_v30, 2  ;;  %v573_v16 = vsel %vm475_vm2, %v571_v8, %v572_v44  ;;  %v575_v9 = vsel %vm475_vm2, %v572_v44, %v574_v22  ;;  %v6180_v30 = vpack.i.bf16 %v570_v23, %v568_v62 }
  0x7b   :  { %v194_v55 = vld [vmem:[#allocation3 + $0x1a0] sm:$0xff]  ;;  %257 = vst.msk [vmem:[#allocation2 + $0x2a1] sm:$0xff] %vm32_vm0, %v192_v15  ;;  %258 = vst.msk [vmem:[#allocation2 + $0x2a9] sm:$0xff] %vm32_vm0, %v193_v63  ;;  %v195_v58 = vld [vmem:[#allocation3 + $0x1a8] sm:$0xff]  ;;  %v582_v15 = vrot.slane %v6138_v34, 1  ;;  %v584_v63 = vrot.slane %v6140_v24, 1  ;;  %v578_v44 = vsel %vm475_vm2, %v576_v57, %v577_v52  ;;  %v580_v34 = vsel %vm475_vm2, %v577_v52, %v579_v28  ;;  %4388 = vrot.lane.b32.xlu1 %v6136_v42, %s5589_s0 }
  0x7c   :  { %259 = vst.msk [vmem:[#allocation2 + $0x2b9] sm:$0xff] %vm32_vm0, %v194_v55  ;;  %v196_v10 = vld [vmem:[#allocation3 + $0x1b0] sm:$0xff]  ;;  %v197_v49 = vld [vmem:[#allocation3 + $0x1b8] sm:$0xff]  ;;  %260 = vst.msk [vmem:[#allocation2 + $0x2c1] sm:$0xff] %vm32_vm0, %v195_v58  ;;  %v8404_v22 = vrot.slane %v5885_v31, 2  ;;  %v6191_v1 = vpack.i.bf16 %v575_v9, %v573_v16 }
  0x7d   :  { %261 = vst.msk [vmem:[#allocation2 + $0x2d1] sm:$0xff] %vm32_vm0, %v196_v10  ;;  %262 = vst.msk [vmem:[#allocation2 + $0x2d9] sm:$0xff] %vm32_vm0, %v197_v49  ;;  %v198_v40 = vld [vmem:[#allocation3 + $0x1c0] sm:$0xff]  ;;  %v199_v56 = vld [vmem:[#allocation3 + $0x1c8] sm:$0xff]  ;;  %v586_v10 = vrot.slane %v6153_v0, 1  ;;  %v6194_v62 = vsel %vm475_vm2, %v581_v17, %v582_v15  ;;  %v6197_v52 = vsel %vm475_vm2, %v582_v15, %v584_v63  ;;  %4393 = vrot.lane.b32.xlu0 %v6180_v30, %s5589_s0 }
  0x7e   :  { %v200_v11 = vld [vmem:[#allocation3 + $0x1d0] sm:$0xff]  ;;  %263 = vst.msk [vmem:[#allocation2 + $0x2e9] sm:$0xff] %vm32_vm0, %v198_v40  ;;  %264 = vst.msk [vmem:[#allocation2 + $0x2f1] sm:$0xff] %vm32_vm0, %v199_v56  ;;  %v201_v21 = vld [vmem:[#allocation3 + $0x1d8] sm:$0xff]  ;;  %v6202_v16 = vsel %vm636_vm3, %v647_v45, %v8404_v22  ;;  %v6206_v17 = vpack.i.bf16 %v580_v34, %v578_v44  ;;  %v6220_v44 = vpack.i.bf16 %v6197_v52, %v6194_v62 }
  0x7f   :  { %265 = vst.msk [vmem:[#allocation2 + $0x301] sm:$0xff] %vm32_vm0, %v200_v11  ;;  %v202_v55 = vld [vmem:[#allocation3 + $0x1e0] sm:$0xff]  ;;  %v203_v58 = vld [vmem:[#allocation3 + $0x1e8] sm:$0xff]  ;;  %8520 = vst [vmem:[#allocation33_spill] sm:$0xff] %v6180_v30  ;;  %3915 = vmatprep.mubr.msk.f32.mxu0 %vm32_vm0, %v6202_v16  ;;  %4398 = vrot.lane.b32.xlu1 %v6191_v1, %s5589_s0 }
  0x80   :  { %266 = vst.msk [vmem:[#allocation2 + $0x309] sm:$0xff] %vm32_vm0, %v201_v21  ;;  %267 = vst.msk [vmem:[#allocation2 + $0x319] sm:$0xff] %vm32_vm0, %v202_v55  ;;  %v344_v24 = vld [vmem:[#allocation2 + $0x248] sm:$0xff]  ;;  %v345_v8 = vld [vmem:[#allocation2 + $0x250] sm:$0x3] }
  0x81   :  { %268 = vst.msk [vmem:[#allocation2 + $0x321] sm:$0xff] %vm32_vm0, %v203_v58  ;;  %8521 = vst [vmem:[#allocation34_spill] sm:$0xff] %v6191_v1  ;;  %v587_v23 = vrot.slane %v344_v24, 1  ;;  %v589_v49 = vrot.slane %v345_v8, 1  ;;  %v346_v40 = vld [vmem:[#allocation2 + $0x258] sm:$0xff]  ;;  %v347_v56 = vld [vmem:[#allocation2 + $0x260] sm:$0xff]  ;;  %4403 = vrot.lane.b32.xlu0 %v6206_v17, %s5589_s0 }
  0x82   :  { %8522 = vst [vmem:[#allocation35_spill] sm:$0xff] %v6194_v62  ;;  %v349_v57 = vld [vmem:[#allocation2 + $0x270] sm:$0xff]  ;;  %8523 = vst [vmem:[#allocation36_spill] sm:$0xff] %v6197_v52  ;;  %v348_v28 = vld [vmem:[#allocation2 + $0x268] sm:$0x3]  ;;  %v591_v11 = vrot.slane %v346_v40, 1 }
  0x83   :  { %v592_v0 = vrot.slane %v347_v56, 1  ;;  %v350_v21 = vld [vmem:[#allocation2 + $0x278] sm:$0xff]  ;;  %8524 = vst [vmem:[#allocation37_spill] sm:$0xff] %v6206_v17  ;;  %v594_v9 = vrot.slane %v348_v28, 1  ;;  %v351_v55 = vld [vmem:[#allocation2 + $0x280] sm:$0x3]  ;;  %v6211_v63 = vsel %vm475_vm2, %v586_v10, %v587_v23  ;;  %v6214_v8 = vsel %vm475_vm2, %v587_v23, %v589_v49  ;;  %4408 = vrot.lane.b32.xlu1 %v6220_v44, %s5589_s0 }
  0x84   :  { %v596_v58 = vrot.slane %v349_v57, 1  ;;  %v352_v24 = vld [vmem:[#allocation2 + $0x288] sm:$0xff]  ;;  %v353_v15 = vld [vmem:[#allocation2 + $0x290] sm:$0xff]  ;;  %8525 = vst [vmem:[#allocation38_spill] sm:$0xff] %v6211_v63  ;;  %8526 = vst [vmem:[#allocation39_spill] sm:$0xff] %v6214_v8  ;;  %v597_v45 = vrot.slane %v350_v21, 1 }
  0x85   :  { %v599_v40 = vrot.slane %v351_v55, 1  ;;  %v354_v56 = vld [vmem:[#allocation2 + $0x298] sm:$0x3]  ;;  %8527 = vst [vmem:[#allocation40_spill] sm:$0xff] %v6220_v44  ;;  %v601_v34 = vrot.slane %v352_v24, 1  ;;  %v602_v57 = vrot.slane %v353_v15, 1  ;;  %v6229_v23 = vsel %vm475_vm2, %v591_v11, %v592_v0 }
  0x86   :  { %v6222_v28 = vld [vmem:[#allocation2 + $0x2a0] sm:$0xff]  ;;  %v6224_v22 = vld [vmem:[#allocation2 + $0x2a8] sm:$0xff]  ;;  %v6226_v10 = vld [vmem:[#allocation2 + $0x2b0] sm:$0x3]  ;;  %8529 = vst [vmem:[#allocation42_spill] sm:$0xff] %v6229_v23  ;;  %v6232_v49 = vsel %vm475_vm2, %v592_v0, %v594_v9  ;;  %v604_v21 = vrot.slane %v354_v56, 1  ;;  %v4412_v55 = vpack.i.bf16 %v6214_v8, %v6211_v63  ;;  %v6239_v24 = vsel %vm475_vm2, %v596_v58, %v597_v45 }
  0x87   :  { %8528 = vst [vmem:[#allocation41_spill] sm:$0xff] %v6226_v10  ;;  %8530 = vst [vmem:[#allocation43_spill] sm:$0xff] %v6232_v49  ;;  %v358_v15 = vld [vmem:[#allocation2 + $0x2b8] sm:$0xff]  ;;  %v359_v52 = vld [vmem:[#allocation2 + $0x2c0] sm:$0xff]  ;;  %v6242_v1 = vsel %vm475_vm2, %v597_v45, %v599_v40  ;;  %v606_v11 = vrot.slane %v6222_v28, 1  ;;  %v607_v0 = vrot.slane %v6224_v22, 1  ;;  %v4417_v58 = vpack.i.bf16 %v6232_v49, %v6229_v23 }
  0x88   :  { %8531 = vst [vmem:[#allocation44_spill] sm:$0xff] %v6239_v24  ;;  %v360_v62 = vld [vmem:[#allocation2 + $0x2c8] sm:$0x3]  ;;  %8532 = vst [vmem:[#allocation45_spill] sm:$0xff] %v6242_v1  ;;  %v609_v9 = vrot.slane %v6226_v10, 1  ;;  %v361_v56 = vld [vmem:[#allocation2 + $0x2d0] sm:$0xff]  ;;  %v6252_v8 = vsel %vm475_vm2, %v601_v34, %v602_v57  ;;  %v6255_v45 = vsel %vm475_vm2, %v602_v57, %v604_v21  ;;  %4413 = vrot.lane.b32.xlu0 %v4412_v55, %s5589_s0 }
  0x89   :  { %v362_v17 = vld [vmem:[#allocation2 + $0x2d8] sm:$0xff]  ;;  %8533 = vst [vmem:[#allocation46_spill] sm:$0xff] %v6252_v8  ;;  %v363_v63 = vld [vmem:[#allocation2 + $0x2e0] sm:$0x3]  ;;  %8534 = vst [vmem:[#allocation47_spill] sm:$0xff] %v6255_v45  ;;  %v611_v40 = vrot.slane %v358_v15, 1  ;;  %v4422_v44 = vpack.i.bf16 %v6242_v1, %v6239_v24  ;;  %v6261_v34 = vsel %vm475_vm2, %v606_v11, %v607_v0  ;;  %4418 = vrot.lane.b32.xlu1 %v4417_v58, %s5589_s0 }
  0x8a   :  { %v612_v30 = vrot.slane %v359_v52, 1  ;;  %v614_v42 = vrot.slane %v360_v62, 1  ;;  %v364_v33 = vld [vmem:[#allocation2 + $0x2e8] sm:$0xff]  ;;  %v365_v18 = vld [vmem:[#allocation2 + $0x2f0] sm:$0xff]  ;;  %v616_v43 = vrot.slane %v361_v56, 1  ;;  %v617_v10 = vrot.slane %v362_v17, 1 }
  0x8b   :  { %v366_v49 = vld [vmem:[#allocation2 + $0x2f8] sm:$0x3]  ;;  %8535 = vst [vmem:[#allocation48_spill] sm:$0xff] %v6261_v34  ;;  %v6264_v23 = vsel %vm475_vm2, %v607_v0, %v609_v9  ;;  %v619_v57 = vrot.slane %v363_v63, 1  ;;  %v4427_v62 = vpack.i.bf16 %v6255_v45, %v6252_v8  ;;  %v621_v52 = vrot.slane %v364_v33, 1  ;;  %v367_v55 = vld [vmem:[#allocation2 + $0x300] sm:$0xff] }
  0x8c   :  { %8536 = vst [vmem:[#allocation49_spill] sm:$0xff] %v6264_v23  ;;  %v622_v21 = vrot.slane %v365_v18, 1  ;;  %v368_v15 = vld [vmem:[#allocation2 + $0x308] sm:$0xff]  ;;  %v369_v1 = vld [vmem:[#allocation2 + $0x310] sm:$0x3]  ;;  %v6270_v17 = vsel %vm475_vm2, %v611_v40, %v612_v30  ;;  %v6273_v11 = vsel %vm475_vm2, %v612_v30, %v614_v42  ;;  %v624_v56 = vrot.slane %v366_v49, 1  ;;  %4423 = vrot.lane.b32.xlu0 %v4422_v44, %s5589_s0 }
  0x8d   :  { %8537 = vst [vmem:[#allocation50_spill] sm:$0xff] %v6270_v17  ;;  %8538 = vst [vmem:[#allocation51_spill] sm:$0xff] %v6273_v11  ;;  %v4432_v63 = vpack.i.bf16 %v6264_v23, %v6261_v34  ;;  %v6279_v0 = vsel %vm475_vm2, %v616_v43, %v617_v10  ;;  %v370_v33 = vld [vmem:[#allocation2 + $0x318] sm:$0xff]  ;;  %v371_v18 = vld [vmem:[#allocation2 + $0x320] sm:$0xff]  ;;  %v6282_v58 = vsel %vm475_vm2, %v617_v10, %v619_v57  ;;  %v626_v40 = vrot.slane %v367_v55, 1 }
  0x8e   :  { %8539 = vst [vmem:[#allocation52_spill] sm:$0xff] %v6279_v0  ;;  %v372_v9 = vld [vmem:[#allocation2 + $0x328] sm:$0x3]  ;;  %8540 = vst [vmem:[#allocation53_spill] sm:$0xff] %v6282_v58  ;;  %v627_v24 = vrot.slane %v368_v15, 1  ;;  %v629_v45 = vrot.slane %v369_v1, 1  ;;  %4428 = vrot.lane.b32.xlu1 %v4427_v62, %s5589_s0  ;;  %v4437_v42 = vpack.i.bf16 %v6273_v11, %v6270_v17  ;;  %v6288_v30 = vsel %vm475_vm2, %v621_v52, %v622_v21 }
  0x8f   :  { %8541 = vst [vmem:[#allocation54_spill] sm:$0xff] %v6288_v30  ;;  %v6291_v43 = vsel %vm475_vm2, %v622_v21, %v624_v56  ;;  %v631_v44 = vrot.slane %v370_v33, 1  ;;  %v632_v49 = vrot.slane %v371_v18, 1  ;;  %v634_v23 = vrot.slane %v372_v9, 1 }
  0x90   :  { %8542 = vst [vmem:[#allocation55_spill] sm:$0xff] %v6291_v43  ;;  %v640_v10 = vrot.slane %v5858_v6, 2  ;;  %4433 = vrot.lane.b32.xlu0 %v4432_v63, %s5589_s0  ;;  %v4442_v1 = vpack.i.bf16 %v6282_v58, %v6279_v0  ;;  %v628_v57 = vsel %vm475_vm2, %v626_v40, %v627_v24  ;;  %v630_v62 = vsel %vm475_vm2, %v627_v24, %v629_v45  ;;  %v8578_v0 = vld [vmem:[#allocation14_spill] sm:$0xff] }
  0x91   :  { %v637_v52 = vrot.slane %v5854_v4, 2  ;;  %v638_v55 = vrot.slane %v5856_v5, 2  ;;  %v6304_v21 = vpack.i.bf16 %v6291_v43, %v6288_v30  ;;  %v642_v6 = vrot.slane %v5895_v36, 2  ;;  %v6665_v43 = vld [vmem:[#allocation2 + $0x90] sm:$0xff] }
  0x92   :  { %4438 = vrot.lane.b32.xlu1 %v4437_v42, %s5589_s0  ;;  %v633_v15 = vsel %vm475_vm2, %v631_v44, %v632_v49  ;;  %v635_v56 = vsel %vm475_vm2, %v632_v49, %v634_v23  ;;  %v643_v63 = vrot.slane %v5897_v38, 2  ;;  %v645_v24 = vrot.slane %v5899_v39, 2 }
  0x93   :  { %8543 = vst [vmem:[#allocation56_spill] sm:$0xff] %v6304_v21  ;;  %v6312_v4 = vpack.i.bf16 %v630_v62, %v628_v57  ;;  %v650_v5 = vrot.slane %v5887_v32, 2  ;;  %v639_v45 = vsel %vm636_vm3, %v637_v52, %v638_v55  ;;  %v641_v33 = vsel %vm636_vm3, %v638_v55, %v640_v10 }
  0x94   :  { %4443 = vrot.lane.b32.xlu0 %v4442_v1, %s5589_s0  ;;  %v6319_v18 = vpack.i.bf16 %v635_v56, %v633_v15  ;;  %v652_v23 = vrot.slane %v5902_v41, 2  ;;  %v653_v9 = vrot.slane %v5909_v46, 2  ;;  %v644_v39 = vsel %vm636_vm3, %v642_v6, %v643_v63 }
  0x95   :  { %8544 = vst [vmem:[#allocation57_spill] sm:$0xff] %v6312_v4  ;;  %v646_v40 = vsel %vm636_vm3, %v643_v63, %v645_v24  ;;  %v655_v42 = vrot.slane %v5911_v47, 2  ;;  %v4462_v32 = vpack.i.bf16 %v641_v33, %v639_v45  ;;  %v8546_v44 = vrot.slane %v5885_v31, 2 }
  0x96   :  { %4448 = vrot.lane.b32.xlu1 %v6304_v21, %s5589_s0  ;;  %8545 = vst [vmem:[#allocation58_spill] sm:$0xff] %v6319_v18  ;;  %v657_v10 = vrot.slane %v5913_v48, 2  ;;  %v658_v41 = vrot.slane %v5920_v53, 2  ;;  %v660_v46 = vrot.slane %v5922_v54, 2  ;;  %v6338_v1 = vpack.i.bf16 %v646_v40, %v644_v39 }
  0x97   :  { %v6331_v49 = vsel %vm636_vm3, %v8546_v44, %v650_v5  ;;  %v6341_v47 = vsel %vm636_vm3, %v652_v23, %v653_v9  ;;  %v6344_v57 = vsel %vm636_vm3, %v653_v9, %v655_v42  ;;  %v662_v31 = vrot.slane %v5928_v59, 2 }
  0x98   :  { %4453 = vrot.lane.b32.xlu0 %v6312_v4, %s5589_s0  ;;  %v663_v62 = vrot.slane %v5930_v60, 2  ;;  %v665_v48 = vrot.slane %v5932_v61, 2  ;;  %v6352_v53 = vpack.i.bf16 %v6331_v49, %v6202_v16  ;;  %v667_v54 = vrot.slane %v5941_v2, 2 }
  0x99   :  { %v668_v52 = vrot.slane %v5943_v3, 2  ;;  %v6357_v55 = vsel %vm636_vm3, %v657_v10, %v658_v41  ;;  %v6360_v59 = vsel %vm636_vm3, %v658_v41, %v660_v46  ;;  %v670_v60 = vrot.slane %v5945_v7, 2  ;;  %v2648_v46 = vld [vmem:[%s8369_s1 + $0x8] sm:$0xff] }
  0x9a   :  { %4458 = vrot.lane.b32.xlu1 %v6319_v18, %s5589_s0  ;;  %v6367_v61 = vpack.i.bf16 %v6344_v57, %v6341_v47  ;;  %v672_v16 = vrot.slane %v5952_v12, 2  ;;  %v673_v2 = vrot.slane %v5954_v13, 2  ;;  %v6372_v3 = vsel %vm636_vm3, %v662_v31, %v663_v62 }
  0x9b   :  { %v6375_v6 = vsel %vm636_vm3, %v663_v62, %v665_v48  ;;  %v675_v15 = vrot.slane %v5956_v14, 2  ;;  %v6382_v7 = vpack.i.bf16 %v6360_v59, %v6357_v55  ;;  %v6385_v56 = vsel %vm636_vm3, %v667_v54, %v668_v52  ;;  %v8555_v62 = vld [vmem:[#allocation20_spill] sm:$0xff]  ;;  %v8556_v54 = vld [vmem:[#allocation22_spill] sm:$0xff] }
  0x9c   :  { %4463 = vrot.lane.b32.xlu0 %v4462_v32, %s5590_s29  ;;  %v6388_v12 = vsel %vm636_vm3, %v668_v52, %v670_v60  ;;  %v677_v13 = vrot.slane %v5964_v19, 2  ;;  %v678_v63 = vrot.slane %v5966_v20, 2  ;;  %v680_v24 = vrot.slane %v5973_v25, 2  ;;  %v8557_v60 = vld [vmem:[#allocation23_spill] sm:$0xff] }
  0x9d   :  { %v6397_v14 = vpack.i.bf16 %v6375_v6, %v6372_v3  ;;  %v6400_v5 = vsel %vm636_vm3, %v672_v16, %v673_v2  ;;  %v6403_v45 = vsel %vm636_vm3, %v673_v2, %v675_v15  ;;  %v682_v33 = vrot.slane %v5975_v26, 2 }
  0x9e   :  { %4468 = vrot.lane.b32.xlu1 %v6338_v1, %s5590_s29  ;;  %v683_v19 = vrot.slane %v5977_v27, 2  ;;  %v685_v20 = vrot.slane %v5985_v35, 2  ;;  %v6412_v25 = vpack.i.bf16 %v6388_v12, %v6385_v56  ;;  %v687_v23 = vrot.slane %v5987_v37, 2  ;;  %v8549_v37 = vld [vmem:[#allocation18_spill] sm:$0xff] }
  0x9f   :  { %v688_v9 = vrot.slane %v5994_v50, 2  ;;  %v6417_v39 = vsel %vm636_vm3, %v677_v13, %v678_v63  ;;  %v6420_v26 = vsel %vm636_vm3, %v678_v63, %v680_v24  ;;  %v690_v27 = vrot.slane %v5996_v51, 2  ;;  %v8550_v50 = vld [vmem:[#allocation19_spill] sm:$0xff]  ;;  %v8560_v63 = vld [vmem:[#allocation24_spill] sm:$0xff] }
  0xa0   :  { %4473 = vrot.lane.b32.xlu0 %v6352_v53, %s5590_s29  ;;  %8547 = vst [vmem:[#allocation59_spill] sm:$0xff] %v6417_v39  ;;  %8548 = vst [vmem:[#allocation60_spill] sm:$0xff] %v6420_v26  ;;  %v6427_v35 = vpack.i.bf16 %v6403_v45, %v6400_v5  ;;  %v692_v40 = vrot.slane %v6021_v29, 2  ;;  %v693_v42 = vrot.slane %v8549_v37, 2  ;;  %v695_v32 = vrot.slane %v8550_v50, 2  ;;  %v2647_v29 = vld [vmem:[%s8369_s1] sm:$0xff] }
  0xa1   :  { %v6433_v44 = vsel %vm636_vm3, %v682_v33, %v683_v19  ;;  %v6436_v10 = vsel %vm636_vm3, %v683_v19, %v685_v20  ;;  %v6442_v51 = vpack.i.bf16 %v6420_v26, %v6417_v39  ;;  %v6445_v41 = vsel %vm636_vm3, %v687_v23, %v688_v9  ;;  %v2649_v33 = vld [vmem:[%s8369_s1 + $0x10] sm:$0xff]  ;;  %v2650_v19 = vld [vmem:[%s8369_s1 + $0x18] sm:$0xff]  ;;  %v8561_v20 = vld [vmem:[#allocation25_spill] sm:$0xff] }
  0xa2   :  { %4478 = vrot.lane.b32.xlu1 %v6367_v61, %s5590_s29  ;;  %8551 = vst [vmem:[#allocation18_spill] sm:$0xff] %v6433_v44  ;;  %8552 = vst [vmem:[#allocation19_spill] sm:$0xff] %v6436_v10  ;;  %v6454_v31 = vsel %vm636_vm3, %v688_v9, %v690_v27  ;;  %v697_v48 = vrot.slane %v8555_v62, 2  ;;  %v698_v52 = vrot.slane %v8556_v54, 2  ;;  %v700_v16 = vrot.slane %v8557_v60, 2  ;;  %v8562_v9 = vld [vmem:[#allocation26_spill] sm:$0xff] }
  0xa3   :  { %8553 = vst [vmem:[#allocation61_spill] sm:$0xff] %v6445_v41  ;;  %8554 = vst [vmem:[#allocation62_spill] sm:$0xff] %v6454_v31  ;;  %v6463_v2 = vpack.i.bf16 %v6436_v10, %v6433_v44  ;;  %v6466_v15 = vsel %vm636_vm3, %v692_v40, %v693_v42  ;;  %v6469_v13 = vsel %vm636_vm3, %v693_v42, %v695_v32  ;;  %v702_v24 = vrot.slane %v8560_v63, 2  ;;  %v6818_v10 = vld [vmem:[#allocation2 + $0x178] sm:$0x3]  ;;  %v5437_v26 = vld [vmem:[#allocation2 + $0x150] sm:$0xff] }
  0xa4   :  { %4483 = vrot.lane.b32.xlu0 %v6382_v7, %s5590_s29  ;;  %8558 = vst [vmem:[#allocation20_spill] sm:$0xff] %v6466_v15  ;;  %8559 = vst [vmem:[#allocation22_spill] sm:$0xff] %v6469_v13  ;;  %v703_v23 = vrot.slane %v8561_v20, 2  ;;  %v705_v27 = vrot.slane %v8562_v9, 2  ;;  %v4229_v37 = vpack.c.bf16 %v2648_v46, %v2647_v29  ;;  %v6484_v40 = vpack.i.bf16 %v6454_v31, %v6445_v41  ;;  %v2651_v46 = vld [vmem:[%s8369_s1 + $0x20] sm:$0xff]  ;;  %v2656_v9 = vld [vmem:[%s8369_s1 + $0x48] sm:$0xff] }
  0xa5   :  { %v5591_v42 = vmov 0.0|0.0   ;;  %v6488_v50 = vsel %vm636_vm3, %v697_v48, %v698_v52  ;;  %v6491_v32 = vsel %vm636_vm3, %v698_v52, %v700_v16  ;;  %v4232_v62 = vpack.c.bf16 %v2650_v19, %v2649_v33  ;;  %v2652_v48 = vld [vmem:[%s8369_s1 + $0x28] sm:$0xff]  ;;  %v2654_v33 = vld [vmem:[%s8369_s1 + $0x38] sm:$0xff] }
  0xa6   :  { %4488 = vrot.lane.b32.xlu1 %v6397_v14, %s5590_s29  ;;  %4228 = vmatprep.subr.bf16.mxu0 %v5591_v42  ;;  %8563 = vst [vmem:[#allocation23_spill] sm:$0xff] %v6488_v50  ;;  %8564 = vst [vmem:[#allocation24_spill] sm:$0xff] %v6491_v32  ;;  %v6497_v29 = vpack.i.bf16 %v6469_v13, %v6466_v15  ;;  %v6507_v54 = vsel %vm636_vm3, %v702_v24, %v703_v23  ;;  %v2653_v24 = vld [vmem:[%s8369_s1 + $0x30] sm:$0xff]  ;;  %v8487_v41 = vrot.slane %v6224_v22, 2 }
  0xa7   :  { %4230 = vmatpush1.bf16.msra.mxu0 %v4229_v37  ;;  %8565 = vst [vmem:[#allocation25_spill] sm:$0xff] %v6507_v54  ;;  %v6510_v52 = vsel %vm636_vm3, %v703_v23, %v705_v27  ;;  %4271 = vmatprep.subr.bf16.mxu1 %v5591_v42  ;;  %v6517_v60 = vpack.i.bf16 %v6491_v32, %v6488_v50  ;;  %v2655_v23 = vld [vmem:[%s8369_s1 + $0x40] sm:$0xff]  ;;  %v6550_v27 = vld [vmem:[#allocation2 + $0x30] sm:$0xff] }
  0xa8   :  { %4493 = vrot.lane.b32.xlu0 %v6412_v25, %s5590_s29  ;;  %4231 = vmatprep.subr.bf16.mxu0 %v5591_v42  ;;  %8566 = vst [vmem:[#allocation26_spill] sm:$0xff] %v6510_v52  ;;  %v4235_v16 = vpack.c.bf16 %v2652_v48, %v2651_v46  ;;  %v6523_v63 = vpack.i.bf16 %v6510_v52, %v6507_v54  ;;  %v2658_v48 = vld [vmem:[%s8369_s1 + $0x58] sm:$0xff]  ;;  %v6691_v52 = vld [vmem:[#allocation2 + $0xb0] sm:$0xff] }
  0xa9   :  { %4280 = vmatpush1.bf16.msra.mxu1 %v4229_v37  ;;  %v4532_v19 = vpack.i.bf16 %v5897_v38, %v5895_v36  ;;  %v4238_v20 = vpack.c.bf16 %v2654_v33, %v2653_v24  ;;  %v4241_v36 = vpack.c.bf16 %v2656_v9, %v2655_v23  ;;  %v8567_v38 = vld [vmem:[#allocation10_spill] sm:$0xff]  ;;  %v6552_v37 = vld [vmem:[#allocation2 + $0x38] sm:$0xff]  ;;  %v2659_v33 = vld [vmem:[%s8369_s1 + $0x60] sm:$0xff]  ;;  %8583 = vst [vmem:[#allocation67_spill] sm:$0xff] %v6691_v52 }
  0xaa   :  { %4498 = vrot.lane.b32.xlu1 %v6427_v35, %s5590_s29  ;;  %4272 = vmatprep.subr.bf16.mxu1 %v5591_v42  ;;  %v4547_v46 = vpack.i.bf16 %v6552_v37, %v6550_v27  ;;  %v172_v23 = vld [vmem:[#allocation3 + $0xf0] sm:$0xff]  ;;  %v173_v9 = vld [vmem:[#allocation3 + $0xf8] sm:$0xff] }
  0xab   :  { %4233 = vmatpush1.bf16.msra.mxu0 %v4232_v62  ;;  %237 = vst.msk [vmem:[#allocation2 + $0x181] sm:$0xff] %vm32_vm0, %v172_v23  ;;  %238 = vst.msk [vmem:[#allocation2 + $0x189] sm:$0xff] %vm32_vm0, %v173_v9  ;;  %v8569_v23 = vld [vmem:[#allocation11_spill] sm:$0xff]  ;;  %v6618_v9 = vld [vmem:[#allocation2 + $0x68] sm:$0xff] }
  0xac   :  { %4503 = vrot.lane.b32.xlu0 %v6442_v51, %s5590_s29  ;;  %4234 = vmatprep.subr.bf16.mxu0 %v5591_v42 }
  0xad   :  { %4281 = vmatpush1.bf16.msra.mxu1 %v4232_v62  ;;  %v2657_v62 = vld [vmem:[%s8369_s1 + $0x50] sm:$0xff] }
  0xae   :  { %4508 = vrot.lane.b32.xlu1 %v6463_v2, %s5590_s29  ;;  %4273 = vmatprep.subr.bf16.mxu1 %v5591_v42  ;;  %v4244_v24 = vpack.c.bf16 %v2658_v48, %v2657_v62  ;;  %v6589_v62 = vld [vmem:[#allocation2 + $0x48] sm:$0xff] }
  0xaf   :  { %4236 = vmatpush1.bf16.msra.mxu0 %v4235_v16 }
  0xb0   :  { %4513 = vrot.lane.b32.xlu0 %v6484_v40, %s5590_s29  ;;  %4237 = vmatprep.subr.bf16.mxu0 %v5591_v42 }
  0xb1   :  { %4282 = vmatpush1.bf16.msra.mxu1 %v4235_v16  ;;  %v2660_v16 = vld [vmem:[%s8369_s1 + $0x68] sm:$0xff] }
  0xb2   :  { %4518 = vrot.lane.b32.xlu1 %v6497_v29, %s5590_s29  ;;  %4274 = vmatprep.subr.bf16.mxu1 %v5591_v42 }
  0xb3   :  { %4239 = vmatpush1.bf16.msra.mxu0 %v4238_v20 }
  0xb4   :  { %4523 = vrot.lane.b32.xlu0 %v6517_v60, %s5590_s29  ;;  %4240 = vmatprep.subr.bf16.mxu0 %v5591_v42 }
  0xb5   :  { %4283 = vmatpush1.bf16.msra.mxu1 %v4238_v20  ;;  %v2662_v20 = vld [vmem:[%s8369_s1 + $0x78] sm:$0xff] }
  0xb6   :  { %4528 = vrot.lane.b32.xlu1 %v6523_v63, %s5590_s29  ;;  %4275 = vmatprep.subr.bf16.mxu1 %v5591_v42 }
  0xb7   :  { %4242 = vmatpush1.bf16.msra.mxu0 %v4241_v36 }
  0xb8   :  { %4533 = vrot.lane.b32.xlu0 %v4532_v19, %s5592_s24  ;;  %4243 = vmatprep.subr.bf16.mxu0 %v5591_v42  ;;  %v4247_v19 = vpack.c.bf16 %v2660_v16, %v2659_v33  ;;  %v2664_v16 = vld [vmem:[%s8369_s1 + $0x88] sm:$0xff] }
  0xb9   :  { %4284 = vmatpush1.bf16.msra.mxu1 %v4241_v36  ;;  %v2663_v36 = vld [vmem:[%s8369_s1 + $0x80] sm:$0xff] }
  0xba   :  { %4538 = vrot.lane.b32.xlu1 %v8567_v38, %s5593_s27  ;;  %v2661_v38 = vld [vmem:[%s8369_s1 + $0x70] sm:$0xff]  ;;  %4276 = vmatprep.subr.bf16.mxu1 %v5591_v42 }
  0xbb   :  { %4245 = vmatpush1.bf16.msra.mxu0 %v4244_v24  ;;  %v4250_v33 = vpack.c.bf16 %v2662_v20, %v2661_v38 }
  0xbc   :  { %4543 = vrot.lane.b32.xlu0 %v6338_v1, %s5594_s6  ;;  %v8568_v1 = vld [vmem:[#allocation9_spill] sm:$0xff]  ;;  %4246 = vmatprep.subr.bf16.mxu0 %v5591_v42 }
  0xbd   :  { %4285 = vmatpush1.bf16.msra.mxu1 %v4244_v24  ;;  %v6616_v24 = vld [vmem:[#allocation2 + $0x60] sm:$0xff] }
  0xbe   :  { %4548 = vrot.lane.b32.xlu1 %v4547_v46, %s5595_s7  ;;  %4277 = vmatprep.subr.bf16.mxu1 %v5591_v42  ;;  %v4597_v38 = vpack.i.bf16 %v6618_v9, %v6616_v24 }
  0xbf   :  { %4248 = vmatpush1.bf16.msra.mxu0 %v4247_v19 }
  0xc0   :  { %4553 = vrot.lane.b32.xlu0 %v8568_v1, %s5596_s12  ;;  %4249 = vmatprep.subr.bf16.mxu0 %v5591_v42 }
  0xc1   :  { %4286 = vmatpush1.bf16.msra.mxu1 %v4247_v19 }
  0xc2   :  { %4558 = vrot.lane.b32.xlu1 %v4547_v46, %s5592_s24  ;;  %v6591_v46 = vld [vmem:[#allocation2 + $0x50] sm:$0xff]  ;;  %4278 = vmatprep.subr.bf16.mxu1 %v5591_v42 }
  0xc3   :  { %v4572_v48 = vpack.i.bf16 %v6591_v46, %v6589_v62  ;;  %4251 = vmatpush1.bf16.msra.mxu0 %v4250_v33 }
  0xc4   :  { %4563 = vrot.lane.b32.xlu0 %v8568_v1, %s5593_s27  ;;  %v4253_v1 = vpack.c.bf16 %v2664_v16, %v2663_v36  ;;  %4252 = vmatprep.subr.bf16.mxu0 %v5591_v42 }
  0xc5   :  { %4287 = vmatpush1.bf16.msra.mxu1 %v4250_v33  ;;  %v6643_v33 = vld [vmem:[#allocation2 + $0x80] sm:$0xff] }
  0xc6   :  { %4568 = vrot.lane.b32.xlu1 %v6352_v53, %s5594_s6  ;;  %v6611_v53 = vpop.permute.xlu0 %4303  ;;  %4279 = vmatprep.subr.bf16.mxu1 %v5591_v42  ;;  %v6641_v42 = vld [vmem:[#allocation2 + $0x78] sm:$0xff] }
  0xc7   :  { %4254 = vmatpush1.bf16.msra.mxu0 %v4253_v1 }
  0xc8   :  { %4573 = vrot.lane.b32.xlu0 %v4572_v48, %s5595_s7 }
  0xc9   :  { %4288 = vmatpush1.bf16.msra.mxu1 %v4253_v1  ;;  %v4622_v1 = vpack.i.bf16 %v6643_v33, %v6641_v42 }
  0xca   :  { %4578 = vrot.lane.b32.xlu1 %v8569_v23, %s5596_s12  ;;  %v6624_v19 = vpop.permute.xlu1 %4313 }
  0xcc   :  { %4583 = vrot.lane.b32.xlu0 %v4572_v48, %s5592_s24  ;;  %v6627_v20 = vpop.permute.xlu0 %4308  ;;  %v8570_v48 = vld [vmem:[#allocation12_spill] sm:$0xff] }
  0xce   :  { %4588 = vrot.lane.b32.xlu1 %v8569_v23, %s5593_s27  ;;  %v6632_v36 = vpop.permute.xlu1 %4318 }
  0xd0   :  { %4593 = vrot.lane.b32.xlu0 %v6367_v61, %s5594_s6  ;;  %v6634_v16 = vpop.permute.xlu0 %4323 }
  0xd2   :  { %4598 = vrot.lane.b32.xlu1 %v4597_v38, %s5595_s7  ;;  %v6639_v61 = vpop.permute.xlu1 %4328 }
  0xd4   :  { %4603 = vrot.lane.b32.xlu0 %v8570_v48, %s5596_s12  ;;  %v6647_v23 = vpop.permute.xlu0 %4333 }
  0xd6   :  { %4608 = vrot.lane.b32.xlu1 %v4597_v38, %s5592_s24  ;;  %v6652_v38 = vpop.permute.xlu1 %4338 }
  0xd7   :  { %8571 = vst [vmem:[#allocation10_spill] sm:$0xff] %v6652_v38 }
  0xd8   :  { %4613 = vrot.lane.b32.xlu0 %v8570_v48, %s5593_s27  ;;  %v6654_v18 = vpop.permute.xlu0 %4343  ;;  %v8573_v48 = vld [vmem:[#allocation13_spill] sm:$0xff] }
  0xd9   :  { %8572 = vst [vmem:[#allocation9_spill] sm:$0xff] %v6654_v18  ;;  %v8617_v18 = vld [vmem:[#allocation29_spill] sm:$0xff] }
  0xda   :  { %4618 = vrot.lane.b32.xlu1 %v6382_v7, %s5594_s6  ;;  %v6659_v4 = vpop.permute.xlu1 %4348  ;;  %v6667_v7 = vld [vmem:[#allocation2 + $0x98] sm:$0xff] }
  0xdb   :  { %8574 = vst [vmem:[#allocation11_spill] sm:$0xff] %v6659_v4  ;;  %v4647_v30 = vpack.i.bf16 %v6667_v7, %v6665_v43  ;;  %v8615_v4 = vld [vmem:[#allocation41_spill] sm:$0xff] }
  0xdc   :  { %4623 = vrot.lane.b32.xlu0 %v4622_v1, %s5595_s7  ;;  %v6661_v21 = vpop.permute.xlu0 %4353 }
  0xdd   :  { %8575 = vst [vmem:[#allocation12_spill] sm:$0xff] %v6661_v21 }
  0xde   :  { %4628 = vrot.lane.b32.xlu1 %v8573_v48, %s5596_s12 }
  0xe0   :  { %4633 = vrot.lane.b32.xlu0 %v4622_v1, %s5592_s24  ;;  %v6673_v58 = vpop.permute.xlu1 %4358 }
  0xe1   :  { %8576 = vst [vmem:[#allocation13_spill] sm:$0xff] %v6673_v58 }
  0xe2   :  { %4638 = vrot.lane.b32.xlu1 %v8573_v48, %s5593_s27 }
  0xe3   :  { %v6675_v1 = vpop.permute.xlu0 %4363 }
  0xe4   :  { %4643 = vrot.lane.b32.xlu0 %v6397_v14, %s5594_s6  ;;  %8577 = vst [vmem:[#allocation63_spill] sm:$0xff] %v6675_v1  ;;  %v6689_v14 = vld [vmem:[#allocation2 + $0xa8] sm:$0xff] }
  0xe5   :  { %v6680_v48 = vpop.permute.xlu1 %4368  ;;  %8582 = vst [vmem:[#allocation66_spill] sm:$0xff] %v6689_v14  ;;  %v4672_v1 = vpack.i.bf16 %v6691_v52, %v6689_v14 }
  0xe6   :  { %4648 = vrot.lane.b32.xlu1 %v4647_v30, %s5595_s7  ;;  %8579 = vst [vmem:[#allocation14_spill] sm:$0xff] %v6680_v48 }
  0xe7   :  { %v6682_v11 = vpop.permute.xlu0 %4373 }
  0xe8   :  { %4653 = vrot.lane.b32.xlu0 %v8578_v0, %s5596_s12  ;;  %8580 = vst [vmem:[#allocation64_spill] sm:$0xff] %v6682_v11 }
  0xe9   :  { %v6687_v17 = vpop.permute.xlu1 %4378 }
  0xea   :  { %4658 = vrot.lane.b32.xlu1 %v4647_v30, %s5592_s24  ;;  %8581 = vst [vmem:[#allocation65_spill] sm:$0xff] %v6687_v17 }
  0xeb   :  { %v6695_v54 = vpop.permute.xlu0 %4383 }
  0xec   :  { %4663 = vrot.lane.b32.xlu0 %v8578_v0, %s5593_s27  ;;  %8584 = vst [vmem:[#allocation68_spill] sm:$0xff] %v6695_v54  ;;  %v8587_v0 = vld [vmem:[#allocation15_spill] sm:$0xff]  ;;  %v6713_v54 = vld [vmem:[#allocation2 + $0xc0] sm:$0xff] }
  0xed   :  { %v6700_v30 = vpop.permute.xlu1 %4388  ;;  %8590 = vst [vmem:[#allocation72_spill] sm:$0xff] %v6713_v54 }
  0xee   :  { %4668 = vrot.lane.b32.xlu1 %v6412_v25, %s5594_s6  ;;  %8585 = vst [vmem:[#allocation69_spill] sm:$0xff] %v6700_v30  ;;  %v6715_v25 = vld [vmem:[#allocation2 + $0xc8] sm:$0xff] }
  0xef   :  { %v6702_v11 = vpop.permute.xlu0 %4393  ;;  %8591 = vst [vmem:[#allocation73_spill] sm:$0xff] %v6715_v25  ;;  %v4697_v30 = vpack.i.bf16 %v6715_v25, %v6713_v54 }
  0xf0   :  { %4673 = vrot.lane.b32.xlu0 %v4672_v1, %s5595_s7  ;;  %8586 = vst [vmem:[#allocation70_spill] sm:$0xff] %v6702_v11 }
  0xf1   :  { %v6707_v17 = vpop.permute.xlu1 %4398 }
  0xf2   :  { %4678 = vrot.lane.b32.xlu1 %v8587_v0, %s5596_s12  ;;  %8588 = vst [vmem:[#allocation15_spill] sm:$0xff] %v6707_v17 }
  0xf3   :  { %v6709_v48 = vpop.permute.xlu0 %4403 }
  0xf4   :  { %4683 = vrot.lane.b32.xlu0 %v4672_v1, %s5592_s24  ;;  %8589 = vst [vmem:[#allocation71_spill] sm:$0xff] %v6709_v48  ;;  %v8594_v48 = vld [vmem:[#allocation16_spill] sm:$0xff] }
  0xf5   :  { %v6721_v11 = vpop.permute.xlu1 %4408 }
  0xf6   :  { %4688 = vrot.lane.b32.xlu1 %v8587_v0, %s5593_s27  ;;  %8592 = vst [vmem:[#allocation74_spill] sm:$0xff] %v6721_v11  ;;  %v5422_v11 = vld [vmem:[#allocation2 + $0xe0] sm:$0xff] }
  0xf8   :  { %4693 = vrot.lane.b32.xlu0 %v6427_v35, %s5594_s6  ;;  %v5421_v35 = vld [vmem:[#allocation2 + $0xd8] sm:$0xff] }
  0xf9   :  { %v4722_v34 = vpack.i.bf16 %v5422_v11, %v5421_v35  ;;  %v5423_v11 = vld [vmem:[#allocation2 + $0xf0] sm:$0xff] }
  0xfa   :  { %v6723_v1 = vpop.permute.xlu0 %4413  ;;  %4698 = vrot.lane.b32.xlu1 %v4697_v30, %s5595_s7 }
  0xfb   :  { %8593 = vst [vmem:[#allocation75_spill] sm:$0xff] %v6723_v1  ;;  %v6728_v0 = vpop.permute.xlu1 %4418 }
  0xfc   :  { %4703 = vrot.lane.b32.xlu0 %v8594_v48, %s5596_s12  ;;  %8595 = vst [vmem:[#allocation16_spill] sm:$0xff] %v6728_v0 }
  0xfe   :  { %v6730_v17 = vpop.permute.xlu0 %4423  ;;  %4708 = vrot.lane.b32.xlu1 %v4697_v30, %s5592_s24  ;;  %v8601_v30 = vld [vmem:[#allocation17_spill] sm:$0xff] }
  0xff   :  { %8596 = vst [vmem:[#allocation76_spill] sm:$0xff] %v6730_v17 }
 0x100   :  { %4713 = vrot.lane.b32.xlu0 %v8594_v48, %s5593_s27  ;;  %v6735_v32 = vpop.permute.xlu1 %4428 }
 0x101   :  { %8597 = vst [vmem:[#allocation77_spill] sm:$0xff] %v6735_v32 }
 0x102   :  { %v6737_v1 = vpop.permute.xlu0 %4433  ;;  %4718 = vrot.lane.b32.xlu1 %v6442_v51, %s5594_s6  ;;  %v5424_v51 = vld [vmem:[#allocation2 + $0xf8] sm:$0xff] }
 0x103   :  { %8598 = vst [vmem:[#allocation78_spill] sm:$0xff] %v6737_v1  ;;  %v4747_v35 = vpack.i.bf16 %v5424_v51, %v5423_v11  ;;  %v5426_v11 = vld [vmem:[#allocation2 + $0x110] sm:$0xff] }
 0x104   :  { %4723 = vrot.lane.b32.xlu0 %v4722_v34, %s5595_s7  ;;  %v6742_v0 = vpop.permute.xlu1 %4438 }
 0x105   :  { %8599 = vst [vmem:[#allocation79_spill] sm:$0xff] %v6742_v0 }
 0x106   :  { %v6744_v17 = vpop.permute.xlu0 %4443  ;;  %4728 = vrot.lane.b32.xlu1 %v8601_v30, %s5596_s12 }
 0x107   :  { %8600 = vst [vmem:[#allocation80_spill] sm:$0xff] %v6744_v17 }
 0x108   :  { %4733 = vrot.lane.b32.xlu0 %v4722_v34, %s5592_s24  ;;  %v6749_v48 = vpop.permute.xlu1 %4448  ;;  %v8605_v34 = vld [vmem:[#allocation21_spill] sm:$0xff] }
 0x109   :  { %8602 = vst [vmem:[#allocation17_spill] sm:$0xff] %v6749_v48 }
 0x10a   :  { %v6751_v32 = vpop.permute.xlu0 %4453  ;;  %4738 = vrot.lane.b32.xlu1 %v8601_v30, %s5593_s27 }
 0x10b   :  { %8603 = vst [vmem:[#allocation81_spill] sm:$0xff] %v6751_v32 }
 0x10c   :  { %4743 = vrot.lane.b32.xlu0 %v6463_v2, %s5594_s6  ;;  %v6757_v0 = vpop.permute.xlu1 %4458  ;;  %v5425_v2 = vld [vmem:[#allocation2 + $0x108] sm:$0xff] }
 0x10d   :  { %8604 = vst [vmem:[#allocation82_spill] sm:$0xff] %v6757_v0  ;;  %v4772_v51 = vpack.i.bf16 %v5426_v11, %v5425_v2  ;;  %v5427_v2 = vld [vmem:[#allocation2 + $0x120] sm:$0xff] }
 0x10e   :  { %v6759_v17 = vpop.permute.xlu0 %4463  ;;  %4748 = vrot.lane.b32.xlu1 %v4747_v35, %s5595_s7 }
 0x10f   :  { %v4466_v54 = vunpack.i.h.bf16 %v6759_v17 }
 0x110   :  { %4753 = vrot.lane.b32.xlu0 %v8605_v34, %s5596_s12  ;;  %v6764_v48 = vpop.permute.xlu1 %4468 }
 0x112   :  { %v6766_v32 = vpop.permute.xlu0 %4473  ;;  %4758 = vrot.lane.b32.xlu1 %v4747_v35, %s5592_s24  ;;  %v8606_v35 = vld [vmem:[#allocation27_spill] sm:$0xff] }
 0x114   :  { %4763 = vrot.lane.b32.xlu0 %v8605_v34, %s5593_s27  ;;  %v6771_v30 = vpop.permute.xlu1 %4478 }
 0x116   :  { %v6773_v0 = vpop.permute.xlu0 %4483  ;;  %4768 = vrot.lane.b32.xlu1 %v6484_v40, %s5594_s6  ;;  %v5428_v40 = vld [vmem:[#allocation2 + $0x128] sm:$0xff] }
 0x117   :  { %v4797_v11 = vpack.i.bf16 %v5428_v40, %v5427_v2  ;;  %v5435_v40 = vld [vmem:[#allocation2] sm:$0xff] }
 0x118   :  { %4773 = vrot.lane.b32.xlu0 %v4772_v51, %s5595_s7  ;;  %v6778_v1 = vpop.permute.xlu1 %4488 }
 0x11a   :  { %v6780_v50 = vpop.permute.xlu0 %4493  ;;  %4778 = vrot.lane.b32.xlu1 %v8606_v35, %s5596_s12 }
 0x11c   :  { %4783 = vrot.lane.b32.xlu0 %v4772_v51, %s5592_s24  ;;  %v6785_v34 = vpop.permute.xlu1 %4498  ;;  %v8611_v51 = vld [vmem:[#allocation28_spill] sm:$0xff] }
 0x11d   :  { %8607 = vst [vmem:[#allocation21_spill] sm:$0xff] %v6785_v34 }
 0x11e   :  { %v6787_v58 = vpop.permute.xlu0 %4503  ;;  %4788 = vrot.lane.b32.xlu1 %v8606_v35, %s5593_s27  ;;  %v6805_v35 = vld [vmem:[#allocation2 + $0x160] sm:$0x3] }
 0x11f   :  { %8608 = vst [vmem:[#allocation27_spill] sm:$0xff] %v6787_v58  ;;  %v6821_v58 = vld [vmem:[#allocation2 + $0x1d8] sm:$0x3] }
 0x120   :  { %4793 = vrot.lane.b32.xlu0 %v6497_v29, %s5594_s6  ;;  %v6793_v13 = vpop.permute.xlu1 %4508  ;;  %v6808_v29 = vld [vmem:[#allocation2 + $0x1c0] sm:$0x3] }
 0x121   :  { %8609 = vst [vmem:[#allocation83_spill] sm:$0xff] %v6793_v13  ;;  %v5432_v13 = vld [vmem:[#allocation2 + $0x140] sm:$0xff] }
 0x122   :  { %v6795_v8 = vpop.permute.xlu0 %4513  ;;  %4798 = vrot.lane.b32.xlu1 %v4797_v11, %s5595_s7 }
 0x123   :  { %8610 = vst [vmem:[#allocation84_spill] sm:$0xff] %v6795_v8  ;;  %v4305_v8 = vunpack.i.l.bf16 %v6611_v53 }
 0x124   :  { %4803 = vrot.lane.b32.xlu0 %v8611_v51, %s5596_s12  ;;  %v6800_v21 = vpop.permute.xlu1 %4518 }
 0x125   :  { %8612 = vst [vmem:[#allocation28_spill] sm:$0xff] %v6800_v21  ;;  %v5431_v21 = vld [vmem:[#allocation2 + $0x138] sm:$0xff]  ;;  %v2193_v2 = vsel %vm32_vm0, %v5435_v40, %v4305_v8  ;;  %v5436_v8 = vld [vmem:[#allocation2 + $0x8] sm:$0xff] }
 0x126   :  { %v6802_v15 = vpop.permute.xlu0 %4523  ;;  %4808 = vrot.lane.b32.xlu1 %v4797_v11, %s5592_s24  ;;  %v767_v11 = vrot.slane %v6222_v28, 2 }
 0x127   :  { %8613 = vst [vmem:[#allocation85_spill] sm:$0xff] %v6802_v15  ;;  %v4822_v15 = vpack.i.bf16 %v5432_v13, %v5431_v21  ;;  %v4306_v21 = vunpack.i.h.bf16 %v6611_v53 }
 0x128   :  { %4813 = vrot.lane.b32.xlu0 %v8611_v51, %s5593_s27  ;;  %v6814_v31 = vpop.permute.xlu1 %4528  ;;  %v4465_v51 = vunpack.i.l.bf16 %v6759_v17  ;;  %v6831_v28 = vsel %vm636_vm3, %v767_v11, %v8487_v41 }
 0x129   :  { %8614 = vst [vmem:[#allocation86_spill] sm:$0xff] %v6814_v31  ;;  %8616 = vst [vmem:[#allocation41_spill] sm:$0xff] %v6831_v28  ;;  %3963 = vmatprep.mubr.msk.f32.mxu1 %vm32_vm0, %v6831_v28  ;;  %v2194_v17 = vsel %vm32_vm0, %v5436_v8, %v4306_v21  ;;  %v4470_v21 = vunpack.i.l.bf16 %v6764_v48 }
 0x12a   :  { %v4534_v31 = vpop.permute.xlu0 %4533  ;;  %4818 = vrot.lane.b32.xlu1 %v6517_v60, %s5594_s6  ;;  %v2258_v25 = vsel %vm2257_vm4, %v2193_v2, %v4465_v51  ;;  %v5438_v2 = vld [vmem:[#allocation2 + $0x158] sm:$0xff]  ;;  %v4310_v51 = vunpack.i.l.bf16 %v6627_v20 }
 0x12b   :  { %v4535_v13 = vunpack.i.l.bf16 %v4534_v31  ;;  %v4536_v44 = vunpack.i.h.bf16 %v4534_v31  ;;  %v4847_v31 = vpack.i.bf16 %v5438_v2, %v5437_v26  ;;  %v708_v14 = vrot.slane %v5438_v2, 2  ;;  %v5439_v2 = vld [vmem:[#allocation2 + $0x18] sm:$0xff] }
 0x12c   :  { %4823 = vrot.lane.b32.xlu0 %v4822_v15, %s5595_s7  ;;  %v4539_v60 = vpop.permute.xlu1 %4538 }
 0x12d   :  { %v4540_v11 = vunpack.i.l.bf16 %v4539_v60  ;;  %v2323_v53 = vsel %vm2322_vm5, %v2258_v25, %v4535_v13  ;;  %v4541_v41 = vunpack.i.h.bf16 %v4539_v60  ;;  %v2259_v25 = vsel %vm2257_vm4, %v2194_v17, %v4466_v54 }
 0x12e   :  { %v4544_v52 = vpop.permute.xlu0 %4543  ;;  %4828 = vrot.lane.b32.xlu1 %v8617_v18, %s5596_s12  ;;  %v707_v60 = vrot.slane %v5437_v26, 2  ;;  %v2324_v34 = vsel %vm2322_vm5, %v2259_v25, %v4536_v44  ;;  %v4311_v26 = vunpack.i.h.bf16 %v6627_v20  ;;  %v2195_v44 = vsel %vm32_vm0, %v5439_v2, %v4310_v51  ;;  %v5442_v2 = vld [vmem:[#allocation2 + $0x20] sm:$0xff] }
 0x12f   :  { %v2388_v40 = vsel %vm2387_vm6, %v2323_v53, %v4540_v11  ;;  %v4545_v28 = vunpack.i.l.bf16 %v4544_v52  ;;  %v4546_v39 = vunpack.i.h.bf16 %v4544_v52  ;;  %v2389_v11 = vsel %vm2387_vm6, %v2324_v34, %v4541_v41 }
 0x130   :  { %4833 = vrot.lane.b32.xlu0 %v4822_v15, %s5592_s24  ;;  %v4549_v13 = vpop.permute.xlu1 %4548  ;;  %v6860_v41 = vsel %vm636_vm3, %v707_v60, %v708_v14  ;;  %v8618_v34 = vrot.slane %v6805_v35, 2  ;;  %v4471_v51 = vunpack.i.h.bf16 %v6764_v48  ;;  %v2260_v25 = vsel %vm2257_vm4, %v2195_v44, %v4470_v21  ;;  %v8621_v21 = vld [vmem:[#allocation30_spill] sm:$0xff] }
 0x131   :  { %v4550_v38 = vunpack.i.l.bf16 %v4549_v13  ;;  %v4551_v53 = vunpack.i.h.bf16 %v4549_v13  ;;  %v2453_v54 = vsel %vm2452_vm7, %v2388_v40, %v4545_v28  ;;  %v2454_v20 = vsel %vm2452_vm7, %v2389_v11, %v4546_v39 }
 0x132   :  { %v4554_v8 = vpop.permute.xlu0 %4553  ;;  %4838 = vrot.lane.b32.xlu1 %v8617_v18, %s5593_s27  ;;  %v6865_v18 = vsel %vm636_vm3, %v708_v14, %v8618_v34  ;;  %v8619_v35 = vrot.slane %v8615_v4, 2  ;;  %v8620_v14 = vrot.slane %v6224_v22, 2  ;;  %v5441_v22 = vld [vmem:[#allocation2 + $0x170] sm:$0xff]  ;;  %v2196_v44 = vsel %vm32_vm0, %v5442_v2, %v4311_v26  ;;  %v6893_v34 = vld [vmem:[#allocation2 + $0x180] sm:$0xff] }
 0x133   :  { %v4555_v17 = vunpack.i.l.bf16 %v4554_v8  ;;  %v2518_v15 = vsel %vm2517_vm8, %v2453_v54, %v4550_v38  ;;  %v4556_v28 = vunpack.i.h.bf16 %v4554_v8  ;;  %v2519_v13 = vsel %vm2517_vm8, %v2454_v20, %v4551_v53  ;;  %v5440_v53 = vld [vmem:[#allocation2 + $0x168] sm:$0xff] }
 0x134   :  { %4843 = vrot.lane.b32.xlu0 %v6523_v63, %s5594_s6  ;;  %v4559_v52 = vpop.permute.xlu1 %4558  ;;  %v6878_v60 = vsel %vm636_vm3, %v8620_v14, %v8619_v35  ;;  %v6885_v48 = vpack.i.bf16 %v6865_v18, %v6860_v41  ;;  %v6889_v54 = vpack.i.bf16 %v5441_v22, %v5440_v53  ;;  %v6900_v14 = vld [vmem:[#allocation2 + $0x190] sm:$0x3] }
 0x135   :  { %v4560_v40 = vunpack.i.l.bf16 %v4559_v52  ;;  %v2583_v38 = vsel %vm2582_vm9, %v2518_v15, %v4555_v17  ;;  %v4561_v8 = vunpack.i.h.bf16 %v4559_v52  ;;  %v712_v17 = vrot.slane %v5440_v53, 2 }
 0x136   :  { %v4564_v63 = vpop.permute.xlu0 %4563  ;;  %2858 = vmatmul.mubr.f32.vlgmr.msra.gmra.mrb[0].mxu0 %v2583_v38  ;;  %4848 = vrot.lane.b32.xlu1 %v4847_v31, %s5595_s7  ;;  %v713_v15 = vrot.slane %v5441_v22, 2  ;;  %v2261_v38 = vsel %vm2257_vm4, %v2196_v44, %v4471_v51  ;;  %v4315_v51 = vunpack.i.l.bf16 %v6624_v19  ;;  %v806_v2 = vrot.slane %v6900_v14, 1 }
 0x137   :  { %v2325_v39 = vsel %vm2322_vm5, %v2260_v25, %v4560_v40  ;;  %v4565_v11 = vunpack.i.l.bf16 %v4564_v63  ;;  %3916 = vmatprep.mubr.msk.f32.mxu0 %vm32_vm0, %v6331_v49  ;;  %v2584_v49 = vsel %vm2582_vm9, %v2519_v13, %v4556_v28  ;;  %v6895_v40 = vld [vmem:[#allocation2 + $0x188] sm:$0xff]  ;;  %v4566_v20 = vunpack.i.h.bf16 %v4564_v63 }
 0x138   :  { %4853 = vrot.lane.b32.xlu0 %v8621_v21, %s5596_s12  ;;  %v4569_v4 = vpop.permute.xlu1 %4568  ;;  %v2326_v26 = vsel %vm2322_vm5, %v2261_v38, %v4561_v8  ;;  %v6910_v13 = vsel %vm636_vm3, %v712_v17, %v713_v15  ;;  %v804_v8 = vrot.slane %v6895_v40, 1 }
 0x139   :  { %v4570_v52 = vunpack.i.l.bf16 %v4569_v4  ;;  %v2390_v25 = vsel %vm2387_vm6, %v2325_v39, %v4565_v11  ;;  %v4571_v53 = vunpack.i.h.bf16 %v4569_v4  ;;  %v4475_v39 = vunpack.i.l.bf16 %v6766_v32 }
 0x13a   :  { %v4574_v35 = vpop.permute.xlu0 %4573  ;;  %2863 = vmatmul.mubr.f32.gmra.mrb[2].mxu0 %v2584_v49  ;;  %4858 = vrot.lane.b32.xlu1 %v4847_v31, %s5592_s24  ;;  %v803_v31 = vrot.slane %v6893_v34, 1  ;;  %v2391_v44 = vsel %vm2387_vm6, %v2326_v26, %v4566_v20 }
 0x13b   :  { %v4575_v22 = vunpack.i.l.bf16 %v4574_v35  ;;  %3917 = vmatprep.mubr.msk.f32.mxu0 %vm32_vm0, %v6341_v47  ;;  %v2455_v28 = vsel %vm2452_vm7, %v2390_v25, %v4570_v52  ;;  %v8622_v47 = vrot.slane %v6818_v10, 2  ;;  %v4576_v17 = vunpack.i.h.bf16 %v4574_v35 }
 0x13c   :  { %4863 = vrot.lane.b32.xlu0 %v8621_v21, %s5593_s27  ;;  %v4579_v63 = vpop.permute.xlu1 %4578  ;;  %v4316_v21 = vunpack.i.h.bf16 %v6624_v19  ;;  %v4476_v19 = vunpack.i.h.bf16 %v6766_v32  ;;  %v805_v35 = vsel %vm475_vm2, %v803_v31, %v804_v8 }
 0x13d   :  { %v4580_v11 = vunpack.i.l.bf16 %v4579_v63  ;;  %v6918_v4 = vsel %vm636_vm3, %v713_v15, %v8622_v47  ;;  %v2520_v49 = vsel %vm2517_vm8, %v2455_v28, %v4575_v22  ;;  %v4581_v38 = vunpack.i.h.bf16 %v4579_v63  ;;  %v8623_v63 = vld [vmem:[#allocation31_spill] sm:$0xff] }
 0x13e   :  { %v4584_v52 = vpop.permute.xlu0 %4583  ;;  %4868 = vrot.lane.b32.xlu1 %v6885_v48, %s5594_s6  ;;  %v2456_v15 = vsel %vm2452_vm7, %v2391_v44, %v4571_v53  ;;  %v2197_v47 = vsel %vm32_vm0, %v6550_v27, %v4315_v51  ;;  %v807_v53 = vsel %vm475_vm2, %v804_v8, %v806_v2  ;;  %v6944_v31 = vpack.i.bf16 %v6918_v4, %v6910_v13 }
 0x13f   :  { %v4585_v25 = vunpack.i.l.bf16 %v4584_v52  ;;  %v2585_v10 = vsel %vm2582_vm9, %v2520_v49, %v4580_v11  ;;  %v2262_v26 = vsel %vm2257_vm4, %v2197_v47, %v4475_v39  ;;  %v4586_v22 = vunpack.i.h.bf16 %v4584_v52 }
 0x140   :  { %4873 = vrot.lane.b32.xlu0 %v6889_v54, %s5595_s7  ;;  %v4589_v20 = vpop.permute.xlu1 %4588  ;;  %2868 = vmatmul.mubr.f32.gmra.mrb[4].mxu0 %v2585_v10  ;;  %v2521_v11 = vsel %vm2517_vm8, %v2456_v15, %v4576_v17  ;;  %v2198_v39 = vsel %vm32_vm0, %v6552_v37, %v4316_v21  ;;  %v4320_v2 = vunpack.i.l.bf16 %v6632_v36  ;;  %v6956_v49 = vpack.i.bf16 %v6895_v40, %v6893_v34 }
 0x141   :  { %v4590_v28 = vunpack.i.l.bf16 %v4589_v20  ;;  %3918 = vmatprep.mubr.msk.f32.mxu0 %vm32_vm0, %v6344_v57  ;;  %v2327_v27 = vsel %vm2322_vm5, %v2262_v26, %v4585_v25  ;;  %v4591_v51 = vunpack.i.h.bf16 %v4589_v20  ;;  %v2586_v8 = vsel %vm2582_vm9, %v2521_v11, %v4581_v38 }
 0x142   :  { %v4594_v32 = vpop.permute.xlu0 %4593  ;;  %4878 = vrot.lane.b32.xlu1 %v8623_v63, %s5596_s12  ;;  %v2263_v52 = vsel %vm2257_vm4, %v2198_v39, %v4476_v19  ;;  %v6958_v25 = vpack.i.bf16 %v807_v53, %v805_v35  ;;  %v4480_v38 = vunpack.i.l.bf16 %v6771_v30  ;;  %v813_v26 = vrot.slane %v6893_v34, 2  ;;  %v6979_v34 = vld [vmem:[#allocation2 + $0x198] sm:$0xff] }
 0x143   :  { %v2392_v57 = vsel %vm2387_vm6, %v2327_v27, %v4590_v28  ;;  %v4595_v44 = vunpack.i.l.bf16 %v4594_v32  ;;  %v2328_v37 = vsel %vm2322_vm5, %v2263_v52, %v4586_v22  ;;  %v4596_v21 = vunpack.i.h.bf16 %v4594_v32 }
 0x144   :  { %4883 = vrot.lane.b32.xlu0 %v6885_v48, %s5590_s29  ;;  %v4599_v17 = vpop.permute.xlu1 %4598  ;;  %2873 = vmatmul.mubr.f32.gmra.mrb[6].mxu0 %v2586_v8  ;;  %v2393_v15 = vsel %vm2387_vm6, %v2328_v37, %v4591_v51  ;;  %v814_v22 = vrot.slane %v6895_v40, 2  ;;  %v2199_v28 = vsel %vm32_vm0, %v6589_v62, %v4320_v2  ;;  %v6981_v40 = vld [vmem:[#allocation2 + $0x1a0] sm:$0xff] }
 0x145   :  { %v4600_v10 = vunpack.i.l.bf16 %v4599_v17  ;;  %3919 = vmatprep.mubr.msk.f32.mxu0 %vm32_vm0, %v6357_v55  ;;  %v4601_v48 = vunpack.i.h.bf16 %v4599_v17  ;;  %v2457_v19 = vsel %vm2452_vm7, %v2392_v57, %v4595_v44  ;;  %v4321_v55 = vunpack.i.h.bf16 %v6632_v36 }
 0x146   :  { %v4604_v47 = vpop.permute.xlu0 %4603  ;;  %4888 = vrot.lane.b32.xlu1 %v6889_v54, %s5592_s24  ;;  %v816_v54 = vrot.slane %v6900_v14, 2  ;;  %v2458_v11 = vsel %vm2452_vm7, %v2393_v15, %v4596_v21  ;;  %v4481_v36 = vunpack.i.h.bf16 %v6771_v30  ;;  %v2264_v62 = vsel %vm2257_vm4, %v2199_v28, %v4480_v38 }
 0x147   :  { %v4605_v20 = vunpack.i.l.bf16 %v4604_v47  ;;  %v2522_v35 = vsel %vm2517_vm8, %v2457_v19, %v4600_v10  ;;  %v4606_v27 = vunpack.i.h.bf16 %v4604_v47  ;;  %v2523_v14 = vsel %vm2517_vm8, %v2458_v11, %v4601_v48 }
 0x148   :  { %4893 = vrot.lane.b32.xlu0 %v8623_v63, %s5593_s27  ;;  %v4609_v53 = vpop.permute.xlu1 %4608  ;;  %v324_v63 = vld [vmem:[#allocation2 + $0x1a8] sm:$0x3]  ;;  %v6992_v2 = vsel %vm636_vm3, %v813_v26, %v814_v22  ;;  %v2200_v30 = vsel %vm32_vm0, %v6591_v46, %v4321_v55  ;;  %v6999_v17 = vsel %vm636_vm3, %v814_v22, %v816_v54  ;;  %v830_v37 = vrot.slane %v6981_v40, 1 }
 0x149   :  { %v4610_v51 = vunpack.i.l.bf16 %v4609_v53  ;;  %v2587_v32 = vsel %vm2582_vm9, %v2522_v35, %v4605_v20  ;;  %v4611_v57 = vunpack.i.h.bf16 %v4609_v53  ;;  %v4932_v21 = vpack.i.bf16 %v6981_v40, %v6979_v34 }
 0x14a   :  { %v4614_v39 = vpop.permute.xlu0 %4613  ;;  %2878 = vmatmul.mubr.f32.gmra.mrb[8].mxu0 %v2587_v32  ;;  %4898 = vrot.lane.b32.xlu1 %v6944_v31, %s5594_s6  ;;  %v829_v38 = vrot.slane %v6979_v34, 1  ;;  %v832_v15 = vrot.slane %v324_v63, 1  ;;  %v4326_v46 = vunpack.i.h.bf16 %v6634_v16  ;;  %v2265_v48 = vsel %vm2257_vm4, %v2200_v30, %v4481_v36  ;;  %v5444_v32 = vld [vmem:[#allocation2 + $0x1b8] sm:$0xff] }
 0x14b   :  { %v2329_v44 = vsel %vm2322_vm5, %v2264_v62, %v4610_v51  ;;  %v4615_v8 = vunpack.i.l.bf16 %v4614_v39  ;;  %3920 = vmatprep.mubr.msk.f32.mxu0 %vm32_vm0, %v6360_v59  ;;  %v2588_v59 = vsel %vm2582_vm9, %v2523_v14, %v4606_v27  ;;  %v4616_v47 = vunpack.i.h.bf16 %v4614_v39  ;;  %v5443_v27 = vld [vmem:[#allocation2 + $0x1b0] sm:$0xff] }
 0x14c   :  { %4903 = vrot.lane.b32.xlu0 %v6956_v49, %s5595_s7  ;;  %v4619_v52 = vpop.permute.xlu1 %4618  ;;  %v2330_v35 = vsel %vm2322_vm5, %v2265_v48, %v4611_v57  ;;  %v4325_v28 = vunpack.i.l.bf16 %v6634_v16  ;;  %v4927_v54 = vpack.i.bf16 %v6999_v17, %v6992_v2  ;;  %v717_v51 = vrot.slane %v5443_v27, 2 }
 0x14d   :  { %v4620_v10 = vunpack.i.l.bf16 %v4619_v52  ;;  %v2394_v19 = vsel %vm2387_vm6, %v2329_v44, %v4615_v8  ;;  %v4621_v26 = vunpack.i.h.bf16 %v4619_v52  ;;  %v718_v11 = vrot.slane %v5444_v32, 2 }
 0x14e   :  { %v4624_v20 = vpop.permute.xlu0 %4623  ;;  %2883 = vmatmul.mubr.f32.gmra.mrb[10].mxu0 %v2588_v59  ;;  %4908 = vrot.lane.b32.xlu1 %v6958_v25, %s5596_s12  ;;  %v4485_v36 = vunpack.i.l.bf16 %v6773_v0  ;;  %v833_v39 = vsel %vm475_vm2, %v830_v37, %v832_v15  ;;  %v2202_v16 = vsel %vm32_vm0, %v6618_v9, %v4326_v46  ;;  %v4486_v9 = vunpack.i.h.bf16 %v6773_v0 }
 0x14f   :  { %v4625_v22 = vunpack.i.l.bf16 %v4624_v20  ;;  %3921 = vmatprep.mubr.msk.f32.mxu0 %vm32_vm0, %v6372_v3  ;;  %v2459_v55 = vsel %vm2452_vm7, %v2394_v19, %v4620_v10  ;;  %v831_v3 = vsel %vm475_vm2, %v829_v38, %v830_v37  ;;  %v4626_v14 = vunpack.i.h.bf16 %v4624_v20  ;;  %v5445_v20 = vld [vmem:[#allocation2 + $0x1c8] sm:$0xff] }
 0x150   :  { %4913 = vrot.lane.b32.xlu0 %v6944_v31, %s5590_s29  ;;  %v4629_v53 = vpop.permute.xlu1 %4628  ;;  %v2395_v31 = vsel %vm2387_vm6, %v2330_v35, %v4616_v47  ;;  %v2201_v37 = vsel %vm32_vm0, %v6616_v24, %v4325_v28  ;;  %v4937_v59 = vpack.i.bf16 %v833_v39, %v831_v3  ;;  %v8624_v48 = vrot.slane %v6808_v29, 2 }
 0x151   :  { %v4630_v62 = vunpack.i.l.bf16 %v4629_v53  ;;  %v2524_v57 = vsel %vm2517_vm8, %v2459_v55, %v4625_v22  ;;  %v4631_v44 = vunpack.i.h.bf16 %v4629_v53  ;;  %v2460_v52 = vsel %vm2452_vm7, %v2395_v31, %v4621_v26 }
 0x152   :  { %v4634_v63 = vpop.permute.xlu0 %4633  ;;  %4918 = vrot.lane.b32.xlu1 %v6956_v49, %s5592_s24  ;;  %v719_v49 = vsel %vm636_vm3, %v717_v51, %v718_v11  ;;  %v2266_v38 = vsel %vm2257_vm4, %v2201_v37, %v4485_v36  ;;  %v721_v24 = vsel %vm636_vm3, %v718_v11, %v8624_v48  ;;  %v2525_v19 = vsel %vm2517_vm8, %v2460_v52, %v4626_v14  ;;  %v8626_v48 = vld [vmem:[#allocation32_spill] sm:$0xff] }
 0x153   :  { %v4635_v8 = vunpack.i.l.bf16 %v4634_v63  ;;  %v2589_v30 = vsel %vm2582_vm9, %v2524_v57, %v4630_v62  ;;  %v4636_v15 = vunpack.i.h.bf16 %v4634_v63  ;;  %v722_v35 = vrot.slane %v5445_v20, 2 }
 0x154   :  { %4923 = vrot.lane.b32.xlu0 %v6958_v25, %s5593_s27  ;;  %v4639_v10 = vpop.permute.xlu1 %4638  ;;  %2888 = vmatmul.mubr.f32.gmra.mrb[12].mxu0 %v2589_v30  ;;  %v2590_v55 = vsel %vm2582_vm9, %v2525_v19, %v4631_v44  ;;  %v4330_v29 = vunpack.i.l.bf16 %v6639_v61  ;;  %v2267_v53 = vsel %vm2257_vm4, %v2202_v16, %v4486_v9  ;;  %v4942_v27 = vpack.i.bf16 %v721_v24, %v719_v49 }
 0x155   :  { %v4640_v46 = vunpack.i.l.bf16 %v4639_v10  ;;  %3922 = vmatprep.mubr.msk.f32.mxu0 %vm32_vm0, %v6375_v6  ;;  %v2331_v0 = vsel %vm2322_vm5, %v2266_v38, %v4635_v8  ;;  %v4641_v47 = vunpack.i.h.bf16 %v4639_v10  ;;  %v5446_v6 = vld [vmem:[#allocation2 + $0x1d0] sm:$0xff]  ;;  %v2332_v51 = vsel %vm2322_vm5, %v2267_v53, %v4636_v15 }
 0x156   :  { %v4644_v25 = vpop.permute.xlu0 %4643  ;;  %4928 = vrot.lane.b32.xlu1 %v4927_v54, %s5594_s6  ;;  %v723_v28 = vrot.slane %v5446_v6, 2  ;;  %v4947_v36 = vpack.i.bf16 %v5446_v6, %v5445_v20  ;;  %v4490_v62 = vunpack.i.l.bf16 %v6778_v1  ;;  %v8625_v14 = vrot.slane %v6821_v58, 2  ;;  %v5447_v15 = vld [vmem:[#allocation2 + $0x1f0] sm:$0x3] }
 0x157   :  { %v2396_v26 = vsel %vm2387_vm6, %v2331_v0, %v4640_v46  ;;  %v4645_v22 = vunpack.i.l.bf16 %v4644_v25  ;;  %v4646_v32 = vunpack.i.h.bf16 %v4644_v25  ;;  %v2397_v3 = vsel %vm2387_vm6, %v2332_v51, %v4641_v47  ;;  %v5448_v0 = vld [vmem:[#allocation2 + $0x1e0] sm:$0xff]  ;;  %v5449_v47 = vld [vmem:[#allocation2 + $0x1e8] sm:$0xff] }
 0x158   :  { %4933 = vrot.lane.b32.xlu0 %v4932_v21, %s5595_s7  ;;  %v4649_v54 = vpop.permute.xlu1 %4648  ;;  %2893 = vmatmul.mubr.f32.gmra.mrb[14].mxu0 %v2590_v55  ;;  %v724_v31 = vsel %vm636_vm3, %v722_v35, %v723_v28  ;;  %v4331_v63 = vunpack.i.h.bf16 %v6639_v61  ;;  %v2203_v57 = vsel %vm32_vm0, %v6641_v42, %v4330_v29  ;;  %v4491_v9 = vunpack.i.h.bf16 %v6778_v1 }
 0x159   :  { %v4650_v11 = vunpack.i.l.bf16 %v4649_v54  ;;  %3923 = vmatprep.mubr.msk.f32.mxu0 %vm32_vm0, %v6385_v56  ;;  %v4651_v39 = vunpack.i.h.bf16 %v4649_v54  ;;  %v2461_v34 = vsel %vm2452_vm7, %v2396_v26, %v4645_v22  ;;  %v726_v56 = vsel %vm636_vm3, %v723_v28, %v8625_v14 }
 0x15a   :  { %v4654_v16 = vpop.permute.xlu0 %4653  ;;  %4938 = vrot.lane.b32.xlu1 %v4937_v59, %s5596_s12  ;;  %v2462_v37 = vsel %vm2452_vm7, %v2397_v3, %v4646_v32  ;;  %v2268_v58 = vsel %vm2257_vm4, %v2203_v57, %v4490_v62  ;;  %v4957_v42 = vpack.i.bf16 %v726_v56, %v724_v31  ;;  %v730_v46 = vrot.slane %v5447_v15, 2 }
 0x15b   :  { %v4655_v40 = vunpack.i.l.bf16 %v4654_v16  ;;  %v2526_v21 = vsel %vm2517_vm8, %v2461_v34, %v4650_v11  ;;  %v4656_v8 = vunpack.i.h.bf16 %v4654_v16  ;;  %v2527_v61 = vsel %vm2517_vm8, %v2462_v37, %v4651_v39 }
 0x15c   :  { %4943 = vrot.lane.b32.xlu0 %v4942_v27, %s5590_s29  ;;  %v4659_v44 = vpop.permute.xlu1 %4658  ;;  %v2204_v1 = vsel %vm32_vm0, %v6643_v33, %v4331_v63  ;;  %v4962_v25 = vpack.i.bf16 %v5449_v47, %v5448_v0  ;;  %v727_v35 = vrot.slane %v5448_v0, 2  ;;  %v728_v26 = vrot.slane %v5449_v47, 2  ;;  %v8629_v0 = vld [vmem:[#allocation59_spill] sm:$0xff] }
 0x15d   :  { %v4660_v30 = vunpack.i.l.bf16 %v4659_v44  ;;  %v2591_v52 = vsel %vm2582_vm9, %v2526_v21, %v4655_v40  ;;  %v4661_v59 = vunpack.i.h.bf16 %v4659_v44  ;;  %v2592_v20 = vsel %vm2582_vm9, %v2527_v61, %v4656_v8 }
 0x15e   :  { %v4664_v10 = vpop.permute.xlu0 %4663  ;;  %2898 = vmatmul.mubr.f32.gmra.mrb[16].mxu0 %v2591_v52  ;;  %4948 = vrot.lane.b32.xlu1 %v4947_v36, %s5592_s24  ;;  %v2269_v22 = vsel %vm2257_vm4, %v2204_v1, %v4491_v9  ;;  %v4336_v54 = vunpack.i.h.bf16 %v6647_v23  ;;  %v4335_v27 = vunpack.i.l.bf16 %v6647_v23  ;;  %v4495_v32 = vunpack.i.l.bf16 %v6780_v50 }
 0x15f   :  { %v2333_v49 = vsel %vm2322_vm5, %v2268_v58, %v4660_v30  ;;  %v4665_v38 = vunpack.i.l.bf16 %v4664_v10  ;;  %3924 = vmatprep.mubr.msk.f32.mxu0 %vm32_vm0, %v6388_v12  ;;  %v4666_v12 = vunpack.i.h.bf16 %v4664_v10  ;;  %v2334_v33 = vsel %vm2322_vm5, %v2269_v22, %v4661_v59  ;;  %v8628_v58 = vld [vmem:[#allocation10_spill] sm:$0xff] }
 0x160   :  { %4953 = vrot.lane.b32.xlu0 %v8626_v48, %s5593_s27  ;;  %v4669_v24 = vpop.permute.xlu1 %4668  ;;  %v7096_v36 = vsel %vm636_vm3, %v727_v35, %v728_v26  ;;  %v7103_v23 = vsel %vm636_vm3, %v728_v26, %v730_v46  ;;  %v2205_v14 = vsel %vm32_vm0, %v6665_v43, %v4335_v27  ;;  %v4496_v56 = vunpack.i.h.bf16 %v6780_v50 }
 0x161   :  { %v4670_v19 = vunpack.i.l.bf16 %v4669_v24  ;;  %v2398_v55 = vsel %vm2387_vm6, %v2333_v49, %v4665_v38  ;;  %v4671_v28 = vunpack.i.h.bf16 %v4669_v24  ;;  %v2399_v62 = vsel %vm2387_vm6, %v2334_v33, %v4666_v12  ;;  %v5450_v49 = vld [vmem:[#allocation2 + $0x1f8] sm:$0xff]  ;;  %v5451_v38 = vld [vmem:[#allocation2 + $0x200] sm:$0xff]  ;;  %v5452_v12 = vld [vmem:[#allocation2 + $0x208] sm:$0x3] }
 0x162   :  { %v4674_v6 = vpop.permute.xlu0 %4673  ;;  %2903 = vmatmul.mubr.f32.gmra.mrb[18].mxu0 %v2592_v20  ;;  %4958 = vrot.lane.b32.xlu1 %v4957_v42, %s5594_s6  ;;  %v2206_v57 = vsel %vm32_vm0, %v6667_v7, %v4336_v54  ;;  %v2270_v44 = vsel %vm2257_vm4, %v2205_v14, %v4495_v32  ;;  %v4987_v9 = vpack.i.bf16 %v7103_v23, %v7096_v36  ;;  %v4340_v7 = vunpack.i.l.bf16 %v8628_v58  ;;  %v8633_v14 = vld [vmem:[#allocation60_spill] sm:$0xff] }
 0x163   :  { %v4675_v29 = vunpack.i.l.bf16 %v4674_v6  ;;  %3925 = vmatprep.mubr.msk.f32.mxu0 %vm32_vm0, %v6400_v5  ;;  %v2463_v53 = vsel %vm2452_vm7, %v2398_v55, %v4670_v19  ;;  %v4676_v3 = vunpack.i.h.bf16 %v4674_v6  ;;  %v8627_v5 = vld [vmem:[#allocation33_spill] sm:$0xff]  ;;  %v2464_v31 = vsel %vm2452_vm7, %v2399_v62, %v4671_v28 }
 0x164   :  { %4963 = vrot.lane.b32.xlu0 %v4962_v25, %s5595_s7  ;;  %v4679_v51 = vpop.permute.xlu1 %4678  ;;  %v4992_v15 = vpack.i.bf16 %v5451_v38, %v5450_v49  ;;  %v732_v46 = vrot.slane %v5450_v49, 2  ;;  %v733_v47 = vrot.slane %v5451_v38, 2  ;;  %v735_v55 = vrot.slane %v5452_v12, 2  ;;  %v8636_v38 = vld [vmem:[#allocation18_spill] sm:$0xff] }
 0x165   :  { %v4680_v11 = vunpack.i.l.bf16 %v4679_v51  ;;  %v2528_v16 = vsel %vm2517_vm8, %v2463_v53, %v4675_v29  ;;  %v4681_v34 = vunpack.i.h.bf16 %v4679_v51  ;;  %v2529_v50 = vsel %vm2517_vm8, %v2464_v31, %v4676_v3  ;;  %v8631_v29 = vld [vmem:[#allocation66_spill] sm:$0xff] }
 0x166   :  { %v4684_v39 = vpop.permute.xlu0 %4683  ;;  %4968 = vrot.lane.b32.xlu1 %v8627_v5, %s5596_s12  ;;  %v4341_v28 = vunpack.i.h.bf16 %v8628_v58  ;;  %v2207_v53 = vsel %vm32_vm0, %v8631_v29, %v4340_v7 }
 0x167   :  { %v4685_v40 = vunpack.i.l.bf16 %v4684_v39  ;;  %v2593_v21 = vsel %vm2582_vm9, %v2528_v16, %v4680_v11  ;;  %v4686_v8 = vunpack.i.h.bf16 %v4684_v39 }
 0x168   :  { %4973 = vrot.lane.b32.xlu0 %v4957_v42, %s5590_s29  ;;  %v4689_v63 = vpop.permute.xlu1 %4688  ;;  %2908 = vmatmul.mubr.f32.gmra.mrb[20].mxu0 %v2593_v21  ;;  %v2594_v42 = vsel %vm2582_vm9, %v2529_v50, %v4681_v34  ;;  %v7147_v34 = vsel %vm636_vm3, %v732_v46, %v733_v47 }
 0x169   :  { %v4690_v30 = vunpack.i.l.bf16 %v4689_v63  ;;  %3926 = vmatprep.mubr.msk.f32.mxu0 %vm32_vm0, %v6403_v45  ;;  %v2335_v52 = vsel %vm2322_vm5, %v2270_v44, %v4685_v40  ;;  %v4691_v37 = vunpack.i.h.bf16 %v4689_v63  ;;  %v2271_v45 = vsel %vm2257_vm4, %v2206_v57, %v4496_v56  ;;  %v8634_v63 = vld [vmem:[#allocation9_spill] sm:$0xff] }
 0x16a   :  { %v4694_v43 = vpop.permute.xlu0 %4693  ;;  %4978 = vrot.lane.b32.xlu1 %v4962_v25, %s5592_s24  ;;  %v2336_v1 = vsel %vm2322_vm5, %v2271_v45, %v4686_v8  ;;  %v8630_v25 = vld [vmem:[#allocation21_spill] sm:$0xff]  ;;  %v7153_v56 = vsel %vm636_vm3, %v733_v47, %v735_v55  ;;  %v4346_v57 = vunpack.i.h.bf16 %v8634_v63  ;;  %v4345_v44 = vunpack.i.l.bf16 %v8634_v63  ;;  %v8639_v47 = vld [vmem:[#allocation11_spill] sm:$0xff] }
 0x16b   :  { %v2400_v10 = vsel %vm2387_vm6, %v2335_v52, %v4690_v30  ;;  %v4695_v61 = vunpack.i.l.bf16 %v4694_v43  ;;  %v4696_v48 = vunpack.i.h.bf16 %v4694_v43  ;;  %v4500_v19 = vunpack.i.l.bf16 %v8630_v25  ;;  %v5453_v30 = vld [vmem:[#allocation2 + $0x220] sm:$0x3] }
 0x16c   :  { %4983 = vrot.lane.b32.xlu0 %v8627_v5, %s5593_s27  ;;  %v4699_v59 = vpop.permute.xlu1 %4698  ;;  %2913 = vmatmul.mubr.f32.gmra.mrb[22].mxu0 %v2594_v42  ;;  %v2401_v20 = vsel %vm2387_vm6, %v2336_v1, %v4691_v37  ;;  %v4501_v62 = vunpack.i.h.bf16 %v8630_v25  ;;  %v8632_v5 = vld [vmem:[#allocation34_spill] sm:$0xff]  ;;  %v740_v52 = vrot.slane %v5453_v30, 2  ;;  %v8635_v37 = vld [vmem:[#allocation67_spill] sm:$0xff]  ;;  %v8637_v1 = vld [vmem:[#allocation73_spill] sm:$0xff] }
 0x16d   :  { %v4700_v24 = vunpack.i.l.bf16 %v4699_v59  ;;  %3927 = vmatprep.mubr.msk.f32.mxu0 %vm32_vm0, %v8629_v0  ;;  %v4701_v35 = vunpack.i.h.bf16 %v4699_v59  ;;  %v2465_v22 = vsel %vm2452_vm7, %v2400_v10, %v4695_v61  ;;  %v2466_v11 = vsel %vm2452_vm7, %v2401_v20, %v4696_v48  ;;  %v5455_v20 = vld [vmem:[#allocation2 + $0x218] sm:$0xff] }
 0x16e   :  { %v4704_v26 = vpop.permute.xlu0 %4703  ;;  %4988 = vrot.lane.b32.xlu1 %v4987_v9, %s5594_s6  ;;  %v2272_v3 = vsel %vm2257_vm4, %v2207_v53, %v4500_v19  ;;  %v2208_v43 = vsel %vm32_vm0, %v8635_v37, %v4341_v28  ;;  %v2210_v48 = vsel %vm32_vm0, %v8637_v1, %v4346_v57  ;;  %v5454_v19 = vld [vmem:[#allocation2 + $0x210] sm:$0xff]  ;;  %v8642_v57 = vld [vmem:[#allocation37_spill] sm:$0xff]  ;;  %v5456_v30 = vld [vmem:[#allocation2 + $0xd8] sm:$0xff] }
 0x16f   :  { %v4705_v6 = vunpack.i.l.bf16 %v4704_v26  ;;  %v2530_v33 = vsel %vm2517_vm8, %v2465_v22, %v4700_v24  ;;  %v4706_v27 = vunpack.i.h.bf16 %v4704_v26  ;;  %v2531_v16 = vsel %vm2517_vm8, %v2466_v11, %v4701_v35  ;;  %v8638_v24 = vld [vmem:[#allocation72_spill] sm:$0xff]  ;;  %v8640_v26 = vld [vmem:[#allocation27_spill] sm:$0xff] }
 0x170   :  { %4993 = vrot.lane.b32.xlu0 %v4992_v15, %s5595_s7  ;;  %v4709_v54 = vpop.permute.xlu1 %4708  ;;  %v2273_v7 = vsel %vm2257_vm4, %v2208_v43, %v4501_v62  ;;  %v2209_v0 = vsel %vm32_vm0, %v8638_v24, %v4345_v44  ;;  %v5022_v35 = vpack.i.bf16 %v5455_v20, %v5454_v19  ;;  %v4505_v22 = vunpack.i.l.bf16 %v8640_v26  ;;  %v204_v1 = vld [vmem:[#allocation3 + $0x1f0] sm:$0xff] }
 0x171   :  { %v4710_v51 = vunpack.i.l.bf16 %v4709_v54  ;;  %v2595_v32 = vsel %vm2582_vm9, %v2530_v33, %v4705_v6  ;;  %v4711_v40 = vunpack.i.h.bf16 %v4709_v54  ;;  %v2596_v58 = vsel %vm2582_vm9, %v2531_v16, %v4706_v27  ;;  %v8644_v24 = vld [vmem:[#allocation83_spill] sm:$0xff]  ;;  %269 = vst.msk [vmem:[#allocation2 + $0x331] sm:$0xff] %vm32_vm0, %v204_v1 }
 0x172   :  { %v4714_v39 = vpop.permute.xlu0 %4713  ;;  %2918 = vmatmul.mubr.f32.gmra.mrb[24].mxu0 %v2595_v32  ;;  %4998 = vrot.lane.b32.xlu1 %v8632_v5, %s5596_s12  ;;  %v737_v55 = vrot.slane %v5454_v19, 2  ;;  %v738_v6 = vrot.slane %v5455_v20, 2  ;;  %v4351_v11 = vunpack.i.h.bf16 %v8639_v47  ;;  %v4506_v62 = vunpack.i.h.bf16 %v8640_v26 }
 0x173   :  { %v2337_v21 = vsel %vm2322_vm5, %v2272_v3, %v4710_v51  ;;  %v4715_v31 = vunpack.i.l.bf16 %v4714_v39  ;;  %3928 = vmatprep.mubr.msk.f32.mxu0 %vm32_vm0, %v8633_v14  ;;  %v4716_v10 = vunpack.i.h.bf16 %v4714_v39  ;;  %v2338_v45 = vsel %vm2322_vm5, %v2273_v7, %v4711_v40  ;;  %v8641_v40 = vld [vmem:[#allocation19_spill] sm:$0xff] }
 0x174   :  { %5003 = vrot.lane.b32.xlu0 %v4987_v9, %s5590_s29  ;;  %v4719_v8 = vpop.permute.xlu1 %4718  ;;  %v5017_v9 = vpack.i.bf16 %v7153_v56, %v7147_v34  ;;  %v2274_v39 = vsel %vm2257_vm4, %v2209_v0, %v4505_v22  ;;  %v2275_v7 = vsel %vm2257_vm4, %v2210_v48, %v4506_v62  ;;  %v205_v48 = vld [vmem:[#allocation3 + $0x1f8] sm:$0xff]  ;;  %v4510_v0 = vunpack.i.l.bf16 %v8644_v24 }
 0x175   :  { %v4720_v50 = vunpack.i.l.bf16 %v4719_v8  ;;  %v2402_v61 = vsel %vm2387_vm6, %v2337_v21, %v4715_v31  ;;  %v4721_v59 = vunpack.i.h.bf16 %v4719_v8  ;;  %v2403_v33 = vsel %vm2387_vm6, %v2338_v45, %v4716_v10  ;;  %270 = vst.msk [vmem:[#allocation2 + $0x339] sm:$0xff] %vm32_vm0, %v205_v48 }
 0x176   :  { %v4724_v42 = vpop.permute.xlu0 %4723  ;;  %2923 = vmatmul.mubr.f32.gmra.mrb[26].mxu0 %v2596_v58  ;;  %5008 = vrot.lane.b32.xlu1 %v4992_v15, %s5592_s24  ;;  %v4350_v15 = vunpack.i.l.bf16 %v8639_v47  ;;  %v7190_v21 = vsel %vm636_vm3, %v737_v55, %v738_v6  ;;  %v7197_v8 = vsel %vm636_vm3, %v738_v6, %v740_v52  ;;  %v7207_v52 = vld [vmem:[#allocation2 + $0x278] sm:$0xff]  ;;  %v7222_v55 = vld [vmem:[#allocation2 + $0x230] sm:$0xff] }
 0x177   :  { %v4725_v49 = vunpack.i.l.bf16 %v4724_v42  ;;  %3929 = vmatprep.mubr.msk.f32.mxu0 %vm32_vm0, %v8636_v38  ;;  %v2467_v46 = vsel %vm2452_vm7, %v2402_v61, %v4720_v50  ;;  %v4726_v28 = vunpack.i.h.bf16 %v4724_v42  ;;  %v2468_v32 = vsel %vm2452_vm7, %v2403_v33, %v4721_v59  ;;  %v7204_v61 = vld [vmem:[#allocation2 + $0x270] sm:$0xff] }
 0x178   :  { %5013 = vrot.lane.b32.xlu0 %v8632_v5, %s5593_s27  ;;  %v4729_v25 = vpop.permute.xlu1 %4728  ;;  %v2211_v37 = vsel %vm32_vm0, %v5456_v30, %v4350_v15  ;;  %v757_v42 = vrot.slane %v7204_v61, 2  ;;  %v758_v45 = vrot.slane %v7207_v52, 2  ;;  %v5463_v30 = vld [vmem:[#allocation2 + $0x280] sm:$0x3] }
 0x179   :  { %v4730_v12 = vunpack.i.l.bf16 %v4729_v25  ;;  %v2532_v53 = vsel %vm2517_vm8, %v2467_v46, %v4725_v49  ;;  %v4731_v54 = vunpack.i.h.bf16 %v4729_v25  ;;  %v2533_v44 = vsel %vm2517_vm8, %v2468_v32, %v4726_v28  ;;  %v8643_v46 = vld [vmem:[#allocation61_spill] sm:$0xff] }
 0x17a   :  { %v4734_v29 = vpop.permute.xlu0 %4733  ;;  %5018 = vrot.lane.b32.xlu1 %v5017_v9, %s5594_s6 }
 0x17b   :  { %v4735_v27 = vunpack.i.l.bf16 %v4734_v29  ;;  %v2597_v51 = vsel %vm2582_vm9, %v2532_v53, %v4730_v12  ;;  %v4736_v5 = vunpack.i.h.bf16 %v4734_v29  ;;  %v2598_v58 = vsel %vm2582_vm9, %v2533_v44, %v4731_v54  ;;  %v5459_v12 = vld [vmem:[#allocation2 + $0x228] sm:$0xff] }
 0x17c   :  { %5023 = vrot.lane.b32.xlu0 %v5022_v35, %s5595_s7  ;;  %v4739_v3 = vpop.permute.xlu1 %4738  ;;  %2928 = vmatmul.mubr.f32.gmra.mrb[28].mxu0 %v2597_v51  ;;  %v5052_v6 = vpack.i.bf16 %v7222_v55, %v5459_v12  ;;  %v742_v28 = vrot.slane %v5459_v12, 2  ;;  %v743_v29 = vrot.slane %v7222_v55, 2  ;;  %v7233_v53 = vld [vmem:[#allocation2 + $0x288] sm:$0xff] }
 0x17d   :  { %v4740_v16 = vunpack.i.l.bf16 %v4739_v3  ;;  %3930 = vmatprep.mubr.msk.f32.mxu0 %vm32_vm0, %v8641_v40  ;;  %v2339_v31 = vsel %vm2322_vm5, %v2274_v39, %v4735_v27  ;;  %v4741_v14 = vunpack.i.h.bf16 %v4739_v3  ;;  %v2340_v59 = vsel %vm2322_vm5, %v2275_v7, %v4736_v5  ;;  %v7242_v40 = vld [vmem:[#allocation2 + $0x290] sm:$0xff]  ;;  %v8645_v44 = vld [vmem:[#allocation62_spill] sm:$0xff] }
 0x17e   :  { %v4744_v63 = vpop.permute.xlu0 %4743  ;;  %5028 = vrot.lane.b32.xlu1 %v8642_v57, %s5596_s12  ;;  %v762_v54 = vrot.slane %v7233_v53, 2  ;;  %v4511_v3 = vunpack.i.h.bf16 %v8644_v24  ;;  %v2276_v39 = vsel %vm2257_vm4, %v2211_v37, %v4510_v0  ;;  %v5464_v37 = vld [vmem:[#allocation2 + $0xe0] sm:$0xff] }
 0x17f   :  { %v2404_v43 = vsel %vm2387_vm6, %v2339_v31, %v4740_v16  ;;  %v4745_v50 = vunpack.i.l.bf16 %v4744_v63  ;;  %v4746_v49 = vunpack.i.h.bf16 %v4744_v63  ;;  %v2405_v15 = vsel %vm2387_vm6, %v2340_v59, %v4741_v14 }
 0x180   :  { %5033 = vrot.lane.b32.xlu0 %v5017_v9, %s5590_s29  ;;  %v4749_v10 = vpop.permute.xlu1 %4748  ;;  %2933 = vmatmul.mubr.f32.gmra.mrb[30].mxu0 %v2598_v58  ;;  %v5047_v9 = vpack.i.bf16 %v7197_v8, %v7190_v21  ;;  %v763_v31 = vrot.slane %v7242_v40, 2  ;;  %v5067_v59 = vpack.i.bf16 %v7233_v53, %v5459_v12  ;;  %v8650_v12 = vld [vmem:[#allocation46_spill] sm:$0xff] }
 0x181   :  { %v4750_v38 = vunpack.i.l.bf16 %v4749_v10  ;;  %3931 = vmatprep.mubr.msk.f32.mxu0 %vm32_vm0, %v8643_v46  ;;  %v4751_v25 = vunpack.i.h.bf16 %v4749_v10  ;;  %v2469_v20 = vsel %vm2452_vm7, %v2404_v43, %v4745_v50  ;;  %v2470_v62 = vsel %vm2452_vm7, %v2405_v15, %v4746_v49  ;;  %v8647_v15 = vld [vmem:[#allocation20_spill] sm:$0xff] }
 0x182   :  { %v4754_v19 = vpop.permute.xlu0 %4753  ;;  %5038 = vrot.lane.b32.xlu1 %v5022_v35, %s5592_s24  ;;  %v7230_v35 = vsel %vm636_vm3, %v757_v42, %v758_v45  ;;  %v760_v43 = vrot.slane %v5463_v30, 2  ;;  %v2212_v50 = vsel %vm32_vm0, %v5464_v37, %v4351_v11  ;;  %v7259_v49 = vsel %vm636_vm3, %v742_v28, %v743_v29  ;;  %v8651_v28 = vld [vmem:[#allocation84_spill] sm:$0xff]  ;;  %v5466_v30 = vld [vmem:[#allocation2 + $0xf0] sm:$0xff] }
 0x183   :  { %v4755_v26 = vunpack.i.l.bf16 %v4754_v19  ;;  %v2534_v22 = vsel %vm2517_vm8, %v2469_v20, %v4750_v38  ;;  %v4756_v27 = vunpack.i.h.bf16 %v4754_v19  ;;  %v2535_v16 = vsel %vm2517_vm8, %v2470_v62, %v4751_v25  ;;  %v8648_v19 = vld [vmem:[#allocation12_spill] sm:$0xff] }
 0x184   :  { %5043 = vrot.lane.b32.xlu0 %v8642_v57, %s5593_s27  ;;  %v4759_v33 = vpop.permute.xlu1 %4758  ;;  %v5062_v7 = vpack.i.bf16 %v7230_v35, %v7190_v21  ;;  %v2277_v47 = vsel %vm2257_vm4, %v2212_v50, %v4511_v3  ;;  %v7268_v1 = vsel %vm636_vm3, %v762_v54, %v763_v31  ;;  %v4355_v20 = vunpack.i.l.bf16 %v8648_v19 }
 0x185   :  { %v4760_v51 = vunpack.i.l.bf16 %v4759_v33  ;;  %v2599_v32 = vsel %vm2582_vm9, %v2534_v22, %v4755_v26  ;;  %v4761_v14 = vunpack.i.h.bf16 %v4759_v33  ;;  %v2600_v42 = vsel %vm2582_vm9, %v2535_v16, %v4756_v27  ;;  %v8649_v22 = vld [vmem:[#allocation35_spill] sm:$0xff] }
 0x186   :  { %v4764_v5 = vpop.permute.xlu0 %4763  ;;  %2938 = vmatmul.mubr.f32.gmra.mrb[32].mxu0 %v2599_v32  ;;  %5048 = vrot.lane.b32.xlu1 %v5047_v9, %s5594_s6  ;;  %v8646_v9 = vld [vmem:[#allocation40_spill] sm:$0xff]  ;;  %v4356_v33 = vunpack.i.h.bf16 %v8648_v19  ;;  %v4515_v54 = vunpack.i.l.bf16 %v8651_v28  ;;  %v4516_v37 = vunpack.i.h.bf16 %v8651_v28 }
 0x187   :  { %v2341_v63 = vsel %vm2322_vm5, %v2276_v39, %v4760_v51  ;;  %v4765_v57 = vunpack.i.l.bf16 %v4764_v5  ;;  %3932 = vmatprep.mubr.msk.f32.mxu0 %vm32_vm0, %v8645_v44  ;;  %v4766_v38 = vunpack.i.h.bf16 %v4764_v5  ;;  %v2342_v48 = vsel %vm2322_vm5, %v2277_v47, %v4761_v14 }
 0x188   :  { %5053 = vrot.lane.b32.xlu0 %v5052_v6, %s5595_s7  ;;  %v4769_v58 = vpop.permute.xlu1 %4768  ;;  %v5072_v6 = vpack.i.bf16 %v8650_v12, %v8649_v22  ;;  %v7283_v51 = vsel %vm636_vm3, %v758_v45, %v760_v43  ;;  %v7290_v5 = vpack.i.bf16 %v7268_v1, %v7259_v49  ;;  %v5465_v45 = vld [vmem:[#allocation2 + $0x238] sm:$0x3]  ;;  %v2213_v43 = vsel %vm32_vm0, %v5466_v30, %v4355_v20 }
 0x189   :  { %v4770_v10 = vunpack.i.l.bf16 %v4769_v58  ;;  %v2406_v11 = vsel %vm2387_vm6, %v2341_v63, %v4765_v57  ;;  %v4771_v24 = vunpack.i.h.bf16 %v4769_v58  ;;  %v2407_v32 = vsel %vm2387_vm6, %v2342_v48, %v4766_v38  ;;  %v8652_v38 = vld [vmem:[#allocation22_spill] sm:$0xff] }
 0x18a   :  { %v4774_v46 = vpop.permute.xlu0 %4773  ;;  %2943 = vmatmul.mubr.f32.gmra.mrb[34].mxu0 %v2600_v42  ;;  %5058 = vrot.lane.b32.xlu1 %v8646_v9, %s5596_s12  ;;  %v745_v44 = vrot.slane %v5465_v45, 2  ;;  %v5082_v58 = vpack.i.bf16 %v7283_v51, %v7197_v8  ;;  %v2278_v42 = vsel %vm2257_vm4, %v2213_v43, %v4515_v54 }
 0x18b   :  { %v4775_v0 = vunpack.i.l.bf16 %v4774_v46  ;;  %3933 = vmatprep.mubr.msk.f32.mxu0 %vm32_vm0, %v8647_v15  ;;  %v2471_v25 = vsel %vm2452_vm7, %v2406_v11, %v4770_v10  ;;  %v4776_v62 = vunpack.i.h.bf16 %v4774_v46  ;;  %v2472_v57 = vsel %vm2452_vm7, %v2407_v32, %v4771_v24  ;;  %v7306_v24 = vld [vmem:[#allocation2 + $0x240] sm:$0xff] }
 0x18c   :  { %5063 = vrot.lane.b32.xlu0 %v5062_v7, %s5590_s29  ;;  %v4779_v26 = vpop.permute.xlu1 %4778  ;;  %v5467_v7 = vld [vmem:[#allocation2 + $0x298] sm:$0x3]  ;;  %v5092_v32 = vpack.i.bf16 %v7242_v40, %v7222_v55  ;;  %v8659_v55 = vld [vmem:[#allocation47_spill] sm:$0xff] }
 0x18d   :  { %v4780_v27 = vunpack.i.l.bf16 %v4779_v26  ;;  %v2536_v39 = vsel %vm2517_vm8, %v2471_v25, %v4775_v0  ;;  %v4781_v16 = vunpack.i.h.bf16 %v4779_v26  ;;  %v765_v10 = vrot.slane %v5467_v7, 2  ;;  %v5469_v0 = vld [vmem:[#allocation2 + $0x2a0] sm:$0xff]  ;;  %v5470_v25 = vld [vmem:[#allocation2 + $0xf8] sm:$0xff] }
 0x18e   :  { %v4784_v3 = vpop.permute.xlu0 %4783  ;;  %5068 = vrot.lane.b32.xlu1 %v5067_v59, %s5592_s24  ;;  %v2537_v48 = vsel %vm2517_vm8, %v2472_v57, %v4776_v62  ;;  %v7309_v15 = vpack.i.bf16 %v5469_v0, %v7306_v24  ;;  %v2214_v19 = vsel %vm32_vm0, %v5470_v25, %v4356_v33  ;;  %v8657_v57 = vld [vmem:[#allocation28_spill] sm:$0xff] }
 0x18f   :  { %v4785_v14 = vunpack.i.l.bf16 %v4784_v3  ;;  %v2601_v63 = vsel %vm2582_vm9, %v2536_v39, %v4780_v27  ;;  %v4786_v59 = vunpack.i.h.bf16 %v4784_v3  ;;  %v2602_v22 = vsel %vm2582_vm9, %v2537_v48, %v4781_v16  ;;  %v8654_v39 = vld [vmem:[#allocation23_spill] sm:$0xff]  ;;  %v8656_v16 = vld [vmem:[#allocation48_spill] sm:$0xff] }
 0x190   :  { %5073 = vrot.lane.b32.xlu0 %v5072_v6, %s5593_s27  ;;  %v4789_v50 = vpop.permute.xlu1 %4788  ;;  %2948 = vmatmul.mubr.f32.gmra.mrb[36].mxu0 %v2601_v63  ;;  %v8653_v6 = vld [vmem:[#allocation13_spill] sm:$0xff]  ;;  %v2279_v54 = vsel %vm2257_vm4, %v2214_v19, %v4516_v37  ;;  %v4520_v45 = vunpack.i.l.bf16 %v8657_v57  ;;  %v8658_v48 = vld [vmem:[#allocation36_spill] sm:$0xff] }
 0x191   :  { %v4790_v47 = vunpack.i.l.bf16 %v4789_v50  ;;  %3934 = vmatprep.mubr.msk.f32.mxu0 %vm32_vm0, %v8652_v38  ;;  %v2343_v11 = vsel %vm2322_vm5, %v2278_v42, %v4785_v14  ;;  %v4791_v46 = vunpack.i.h.bf16 %v4789_v50  ;;  %v4360_v28 = vunpack.i.l.bf16 %v8653_v6  ;;  %v8655_v14 = vld [vmem:[#allocation38_spill] sm:$0xff] }
 0x192   :  { %v4794_v9 = vpop.permute.xlu0 %4793  ;;  %5078 = vrot.lane.b32.xlu1 %v7290_v5, %s5594_s6  ;;  %v2344_v62 = vsel %vm2322_vm5, %v2279_v54, %v4786_v59  ;;  %v7324_v63 = vpack.i.bf16 %v8656_v16, %v8655_v14  ;;  %v7335_v42 = vsel %vm636_vm3, %v743_v29, %v745_v44  ;;  %v7340_v59 = vsel %vm636_vm3, %v763_v31, %v765_v10  ;;  %v5471_v38 = vld [vmem:[#allocation2 + $0x108] sm:$0xff]  ;;  %v8660_v54 = vld [vmem:[#allocation24_spill] sm:$0xff] }
 0x193   :  { %v2408_v20 = vsel %vm2387_vm6, %v2343_v11, %v4790_v47  ;;  %v4795_v26 = vunpack.i.l.bf16 %v4794_v9  ;;  %v4796_v3 = vunpack.i.h.bf16 %v4794_v9  ;;  %v2409_v30 = vsel %vm2387_vm6, %v2344_v62, %v4791_v46  ;;  %v7365_v14 = vld [vmem:[#allocation2 + $0x248] sm:$0xff] }
 0x194   :  { %5083 = vrot.lane.b32.xlu0 %v5082_v58, %s5590_s29  ;;  %v4799_v27 = vpop.permute.xlu1 %4798  ;;  %2953 = vmatmul.mubr.f32.gmra.mrb[38].mxu0 %v2602_v22  ;;  %v4361_v47 = vunpack.i.h.bf16 %v8653_v6  ;;  %v2215_v11 = vsel %vm32_vm0, %v5471_v38, %v4360_v28  ;;  %v4521_v46 = vunpack.i.h.bf16 %v8657_v57  ;;  %v5102_v0 = vpack.i.bf16 %v8659_v55, %v8658_v48  ;;  %v5474_v16 = vld [vmem:[#allocation2 + $0x2a8] sm:$0xff]  ;;  %v8661_v38 = vld [vmem:[#allocation25_spill] sm:$0xff] }
 0x195   :  { %v4800_v33 = vunpack.i.l.bf16 %v4799_v27  ;;  %3935 = vmatprep.mubr.msk.f32.mxu0 %vm32_vm0, %v8654_v39  ;;  %v4801_v43 = vunpack.i.h.bf16 %v4799_v27  ;;  %v2473_v50 = vsel %vm2452_vm7, %v2408_v20, %v4795_v26  ;;  %v2474_v31 = vsel %vm2452_vm7, %v2409_v30, %v4796_v3  ;;  %v5472_v27 = vld [vmem:[#allocation2 + $0x110] sm:$0xff] }
 0x196   :  { %v4804_v37 = vpop.permute.xlu0 %4803  ;;  %5088 = vrot.lane.b32.xlu1 %v7309_v15, %s5595_s7  ;;  %v2280_v10 = vsel %vm2257_vm4, %v2215_v11, %v4520_v45  ;;  %v7356_v26 = vpack.i.bf16 %v7340_v59, %v7335_v42  ;;  %v7368_v57 = vpack.i.bf16 %v5474_v16, %v7365_v14 }
 0x197   :  { %v4805_v58 = vunpack.i.l.bf16 %v4804_v37  ;;  %v2538_v7 = vsel %vm2517_vm8, %v2473_v50, %v4800_v33  ;;  %v4806_v29 = vunpack.i.h.bf16 %v4804_v37  ;;  %v2539_v20 = vsel %vm2517_vm8, %v2474_v31, %v4801_v43  ;;  %v8665_v31 = vld [vmem:[#allocation49_spill] sm:$0xff] }
 0x198   :  { %5093 = vrot.lane.b32.xlu0 %v5092_v32, %s5592_s24  ;;  %v4809_v9 = vpop.permute.xlu1 %4808  ;;  %v2216_v32 = vsel %vm32_vm0, %v5472_v27, %v4361_v47  ;;  %v747_v37 = vrot.slane %v7306_v24, 2  ;;  %v748_v50 = vrot.slane %v7365_v14, 2  ;;  %v8663_v24 = vld [vmem:[#allocation85_spill] sm:$0xff] }
 0x199   :  { %v4810_v44 = vunpack.i.l.bf16 %v4809_v9  ;;  %v2603_v25 = vsel %vm2582_vm9, %v2538_v7, %v4805_v58  ;;  %v4811_v22 = vunpack.i.h.bf16 %v4809_v9  ;;  %v2281_v3 = vsel %vm2257_vm4, %v2216_v32, %v4521_v46  ;;  %v8662_v46 = vld [vmem:[#allocation63_spill] sm:$0xff] }
 0x19a   :  { %v4814_v19 = vpop.permute.xlu0 %4813  ;;  %2958 = vmatmul.mubr.f32.gmra.mrb[40].mxu0 %v2603_v25  ;;  %5098 = vrot.lane.b32.xlu1 %v7324_v63, %s5596_s12  ;;  %v2604_v39 = vsel %vm2582_vm9, %v2539_v20, %v4806_v29  ;;  %v4365_v9 = vunpack.i.l.bf16 %v8662_v46  ;;  %v4525_v29 = vunpack.i.l.bf16 %v8663_v24  ;;  %v8664_v25 = vld [vmem:[#allocation39_spill] sm:$0xff] }
 0x19b   :  { %v2345_v6 = vsel %vm2322_vm5, %v2280_v10, %v4810_v44  ;;  %v4815_v28 = vunpack.i.l.bf16 %v4814_v19  ;;  %3936 = vmatprep.mubr.msk.f32.mxu0 %vm32_vm0, %v8660_v54  ;;  %v4816_v45 = vunpack.i.h.bf16 %v4814_v19  ;;  %v2346_v58 = vsel %vm2322_vm5, %v2281_v3, %v4811_v22 }
 0x19c   :  { %5103 = vrot.lane.b32.xlu0 %v5102_v0, %s5593_s27  ;;  %v4819_v62 = vpop.permute.xlu1 %4818  ;;  %v4366_v0 = vunpack.i.h.bf16 %v8662_v46  ;;  %v7386_v10 = vpack.i.bf16 %v8665_v31, %v8664_v25 }
 0x19d   :  { %v4820_v33 = vunpack.i.l.bf16 %v4819_v62  ;;  %v2410_v30 = vsel %vm2387_vm6, %v2345_v6, %v4815_v28  ;;  %v4821_v7 = vunpack.i.h.bf16 %v4819_v62  ;;  %v2411_v19 = vsel %vm2387_vm6, %v2346_v58, %v4816_v45  ;;  %v5475_v62 = vld [vmem:[#allocation2 + $0x120] sm:$0xff] }
 0x19e   :  { %v4824_v43 = vpop.permute.xlu0 %4823  ;;  %2963 = vmatmul.mubr.f32.gmra.mrb[42].mxu0 %v2604_v39  ;;  %5108 = vrot.lane.b32.xlu1 %v7356_v26, %s5594_s6  ;;  %v2217_v3 = vsel %vm32_vm0, %v5475_v62, %v4365_v9  ;;  %v7431_v62 = vld [vmem:[#allocation2 + $0x2b8] sm:$0xff] }
 0x19f   :  { %v4825_v47 = vunpack.i.l.bf16 %v4824_v43  ;;  %3937 = vmatprep.mubr.msk.f32.mxu0 %vm32_vm0, %v8661_v38  ;;  %v2475_v11 = vsel %vm2452_vm7, %v2410_v30, %v4820_v33  ;;  %v4826_v20 = vunpack.i.h.bf16 %v4824_v43  ;;  %v2476_v32 = vsel %vm2452_vm7, %v2411_v19, %v4821_v7  ;;  %v8666_v43 = vld [vmem:[#allocation26_spill] sm:$0xff] }
 0x1a0   :  { %5113 = vrot.lane.b32.xlu0 %v7290_v5, %s5590_s29  ;;  %v4829_v48 = vpop.permute.xlu1 %4828  ;;  %v7395_v5 = vsel %vm636_vm3, %v747_v37, %v748_v50  ;;  %v4526_v33 = vunpack.i.h.bf16 %v8663_v24  ;;  %v2282_v16 = vsel %vm2257_vm4, %v2217_v3, %v4525_v29  ;;  %v8668_v29 = vld [vmem:[#allocation14_spill] sm:$0xff] }
 0x1a1   :  { %v4830_v44 = vunpack.i.l.bf16 %v4829_v48  ;;  %v2540_v6 = vsel %vm2517_vm8, %v2475_v11, %v4825_v47  ;;  %v4831_v28 = vunpack.i.h.bf16 %v4829_v48  ;;  %v2541_v47 = vsel %vm2517_vm8, %v2476_v32, %v4826_v20  ;;  %v5476_v11 = vld [vmem:[#allocation2 + $0x128] sm:$0xff]  ;;  %v7429_v32 = vld [vmem:[#allocation2 + $0x258] sm:$0xff] }
 0x1a2   :  { %v4834_v22 = vpop.permute.xlu0 %4833  ;;  %5118 = vrot.lane.b32.xlu1 %v7368_v57, %s5595_s7  ;;  %v2218_v46 = vsel %vm32_vm0, %v5476_v11, %v4366_v0  ;;  %v8669_v19 = vld [vmem:[#allocation86_spill] sm:$0xff]  ;;  %v7435_v3 = vpack.i.bf16 %v7431_v62, %v7429_v32 }
 0x1a3   :  { %v4835_v54 = vunpack.i.l.bf16 %v4834_v22  ;;  %v2605_v27 = vsel %vm2582_vm9, %v2540_v6, %v4830_v44  ;;  %v4836_v45 = vunpack.i.h.bf16 %v4834_v22  ;;  %v2606_v24 = vsel %vm2582_vm9, %v2541_v47, %v4831_v28 }
 0x1a4   :  { %5123 = vrot.lane.b32.xlu0 %v7309_v15, %s5592_s24  ;;  %v4839_v39 = vpop.permute.xlu1 %4838  ;;  %2968 = vmatmul.mubr.f32.gmra.mrb[44].mxu0 %v2605_v27  ;;  %v8667_v15 = vld [vmem:[#allocation41_spill] sm:$0xff]  ;;  %v4370_v44 = vunpack.i.l.bf16 %v8668_v29  ;;  %v2283_v25 = vsel %vm2257_vm4, %v2218_v46, %v4526_v33  ;;  %v4530_v20 = vunpack.i.l.bf16 %v8669_v19  ;;  %v5479_v33 = vld [vmem:[#allocation2 + $0x250] sm:$0x3]  ;;  %v4531_v11 = vunpack.i.h.bf16 %v8669_v19 }
 0x1a5   :  { %v4840_v30 = vunpack.i.l.bf16 %v4839_v39  ;;  %3938 = vmatprep.mubr.msk.f32.mxu0 %vm32_vm0, %v8666_v43  ;;  %v2347_v37 = vsel %vm2322_vm5, %v2282_v16, %v4835_v54  ;;  %v4841_v58 = vunpack.i.h.bf16 %v4839_v39  ;;  %v7412_v38 = vpack.i.bf16 %v8667_v15, %v7395_v5 }
 0x1a6   :  { %v4844_v7 = vpop.permute.xlu0 %4843  ;;  %5128 = vrot.lane.b32.xlu1 %v7386_v10, %s5596_s12  ;;  %v2348_v22 = vsel %vm2322_vm5, %v2283_v25, %v4836_v45  ;;  %v750_v39 = vrot.slane %v5479_v33, 2  ;;  %v4371_v45 = vunpack.i.h.bf16 %v8668_v29 }
 0x1a7   :  { %v2412_v9 = vsel %vm2387_vm6, %v2347_v37, %v4840_v30  ;;  %v4845_v48 = vunpack.i.l.bf16 %v4844_v7  ;;  %v4846_v6 = vunpack.i.h.bf16 %v4844_v7  ;;  %v2413_v28 = vsel %vm2387_vm6, %v2348_v22, %v4841_v58  ;;  %v5480_v30 = vld [vmem:[#allocation2 + $0x138] sm:$0xff]  ;;  %v5481_v22 = vld [vmem:[#allocation2 + $0x140] sm:$0xff] }
 0x1a8   :  { %5133 = vrot.lane.b32.xlu0 %v7324_v63, %s5593_s27  ;;  %v4849_v31 = vpop.permute.xlu1 %4848  ;;  %2973 = vmatmul.mubr.f32.gmra.mrb[46].mxu0 %v2606_v24  ;;  %v2219_v43 = vsel %vm32_vm0, %v5480_v30, %v4370_v44  ;;  %v8670_v24 = vld [vmem:[#allocation42_spill] sm:$0xff]  ;;  %v7459_v19 = vsel %vm636_vm3, %v748_v50, %v750_v39  ;;  %v7480_v30 = vld [vmem:[#allocation2 + $0x260] sm:$0xff] }
 0x1a9   :  { %v4850_v0 = vunpack.i.l.bf16 %v4849_v31  ;;  %3939 = vmatprep.mubr.msk.f32.mxu0 %vm32_vm0, %v6860_v41  ;;  %v4851_v54 = vunpack.i.h.bf16 %v4849_v31  ;;  %v2477_v63 = vsel %vm2452_vm7, %v2412_v9, %v4845_v48  ;;  %v2478_v15 = vsel %vm2452_vm7, %v2413_v28, %v4846_v6 }
 0x1aa   :  { %v4854_v27 = vpop.permute.xlu0 %4853  ;;  %5138 = vrot.lane.b32.xlu1 %v7412_v38, %s5594_s6  ;;  %v2284_v46 = vsel %vm2257_vm4, %v2219_v43, %v4530_v20  ;;  %v2220_v6 = vsel %vm32_vm0, %v5481_v22, %v4371_v45  ;;  %v7471_v14 = vpack.i.bf16 %v6878_v60, %v7459_v19  ;;  %v7482_v43 = vld [vmem:[#allocation2 + $0x2c0] sm:$0xff]  ;;  %v8673_v22 = vld [vmem:[#allocation43_spill] sm:$0xff] }
 0x1ab   :  { %v4855_v41 = vunpack.i.l.bf16 %v4854_v27  ;;  %v2542_v16 = vsel %vm2517_vm8, %v2477_v63, %v4850_v0  ;;  %v4856_v58 = vunpack.i.h.bf16 %v4854_v27  ;;  %v2543_v48 = vsel %vm2517_vm8, %v2478_v15, %v4851_v54 }
 0x1ac   :  { %5143 = vrot.lane.b32.xlu0 %v7356_v26, %s5590_s29  ;;  %v4859_v37 = vpop.permute.xlu1 %4858  ;;  %v8671_v26 = vld [vmem:[#allocation50_spill] sm:$0xff]  ;;  %v2285_v54 = vsel %vm2257_vm4, %v2220_v6, %v4531_v11  ;;  %v8674_v6 = vld [vmem:[#allocation51_spill] sm:$0xff] }
 0x1ad   :  { %v4860_v7 = vunpack.i.l.bf16 %v4859_v37  ;;  %v2607_v47 = vsel %vm2582_vm9, %v2542_v16, %v4855_v41  ;;  %v7451_v29 = vpack.i.bf16 %v8671_v26, %v8670_v24  ;;  %v4861_v44 = vunpack.i.h.bf16 %v4859_v37  ;;  %v8672_v41 = vld [vmem:[#allocation64_spill] sm:$0xff] }
 0x1ae   :  { %v4864_v9 = vpop.permute.xlu0 %4863  ;;  %2978 = vmatmul.mubr.f32.gmra.mrb[48].mxu0 %v2607_v47  ;;  %5148 = vrot.lane.b32.xlu1 %v7435_v3, %s5595_s7  ;;  %v2608_v28 = vsel %vm2582_vm9, %v2543_v48, %v4856_v58  ;;  %v4375_v16 = vunpack.i.l.bf16 %v8672_v41  ;;  %v7486_v37 = vpack.i.bf16 %v7482_v43, %v7480_v30  ;;  %v772_v47 = vrot.slane %v7431_v62, 2 }
 0x1af   :  { %v2349_v25 = vsel %vm2322_vm5, %v2284_v46, %v4860_v7  ;;  %v4865_v31 = vunpack.i.l.bf16 %v4864_v9  ;;  %3940 = vmatprep.mubr.msk.f32.mxu0 %vm32_vm0, %v6865_v18  ;;  %v4866_v27 = vunpack.i.h.bf16 %v4864_v9  ;;  %v752_v7 = vrot.slane %v7429_v32, 2 }
 0x1b0   :  { %5153 = vrot.lane.b32.xlu0 %v7368_v57, %s5592_s24  ;;  %v4869_v20 = vpop.permute.xlu1 %4868  ;;  %v2350_v57 = vsel %vm2322_vm5, %v2285_v54, %v4861_v44  ;;  %v773_v9 = vrot.slane %v7482_v43, 2  ;;  %v4376_v44 = vunpack.i.h.bf16 %v8672_v41  ;;  %v5485_v41 = vld [vmem:[#allocation2 + $0x158] sm:$0xff] }
 0x1b1   :  { %v4870_v0 = vunpack.i.l.bf16 %v4869_v20  ;;  %v2414_v18 = vsel %vm2387_vm6, %v2349_v25, %v4865_v31  ;;  %v4871_v50 = vunpack.i.h.bf16 %v4869_v20  ;;  %v2415_v15 = vsel %vm2387_vm6, %v2350_v57, %v4866_v27  ;;  %v5484_v25 = vld [vmem:[#allocation2 + $0x150] sm:$0xff] }
 0x1b2   :  { %v4874_v63 = vpop.permute.xlu0 %4873  ;;  %2983 = vmatmul.mubr.f32.gmra.mrb[50].mxu0 %v2608_v28  ;;  %5158 = vrot.lane.b32.xlu1 %v7451_v29, %s5596_s12  ;;  %v2221_v31 = vsel %vm32_vm0, %v5484_v25, %v4375_v16  ;;  %v2222_v16 = vsel %vm32_vm0, %v5485_v41, %v4376_v44 }
 0x1b3   :  { %v4875_v33 = vunpack.i.l.bf16 %v4874_v63  ;;  %3941 = vmatprep.mubr.msk.f32.mxu0 %vm32_vm0, %v6910_v13  ;;  %v2479_v39 = vsel %vm2452_vm7, %v2414_v18, %v4870_v0  ;;  %v753_v13 = vrot.slane %v7480_v30, 2  ;;  %v4876_v11 = vunpack.i.h.bf16 %v4874_v63 }
 0x1b4   :  { %5163 = vrot.lane.b32.xlu0 %v7386_v10, %s5593_s27  ;;  %v4879_v45 = vpop.permute.xlu1 %4878  ;;  %v2480_v32 = vsel %vm2452_vm7, %v2415_v15, %v4871_v50  ;;  %v7506_v0 = vpack.i.bf16 %v8674_v6, %v8673_v22  ;;  %v5489_v6 = vld [vmem:[#allocation2 + $0x198] sm:$0xff] }
 0x1b5   :  { %v4880_v58 = vunpack.i.l.bf16 %v4879_v45  ;;  %v2544_v46 = vsel %vm2517_vm8, %v2479_v39, %v4875_v33  ;;  %v4881_v48 = vunpack.i.h.bf16 %v4879_v45  ;;  %v7511_v28 = vsel %vm636_vm3, %v752_v7, %v753_v13 }
 0x1b6   :  { %v4884_v10 = vpop.permute.xlu0 %4883  ;;  %5168 = vrot.lane.b32.xlu1 %v7471_v14, %s5594_s6  ;;  %v2545_v18 = vsel %vm2517_vm8, %v2480_v32, %v4876_v11 }
 0x1b7   :  { %v4885_v24 = vunpack.i.l.bf16 %v4884_v10  ;;  %v2609_v26 = vsel %vm2582_vm9, %v2544_v46, %v4880_v58  ;;  %v4886_v54 = vunpack.i.h.bf16 %v4884_v10  ;;  %v2610_v33 = vsel %vm2582_vm9, %v2545_v18, %v4881_v48 }
 0x1b8   :  { %5173 = vrot.lane.b32.xlu0 %v7412_v38, %s5590_s29  ;;  %v4889_v62 = vpop.permute.xlu1 %4888  ;;  %2988 = vmatmul.mubr.f32.gmra.mrb[52].mxu0 %v2609_v26  ;;  %v8675_v26 = vld [vmem:[#allocation65_spill] sm:$0xff] }
 0x1b9   :  { %v4890_v20 = vunpack.i.l.bf16 %v4889_v62  ;;  %3942 = vmatprep.mubr.msk.f32.mxu0 %vm32_vm0, %v6918_v4  ;;  %v2286_v38 = vsel %vm2257_vm4, %v2221_v31, %v4885_v24  ;;  %v7520_v4 = vsel %vm636_vm3, %v772_v47, %v773_v9  ;;  %v4891_v63 = vunpack.i.h.bf16 %v4889_v62  ;;  %v5487_v62 = vld [vmem:[#allocation2 + $0x2c8] sm:$0x3] }
 0x1ba   :  { %v4894_v27 = vpop.permute.xlu0 %4893  ;;  %5178 = vrot.lane.b32.xlu1 %v7486_v37, %s5595_s7  ;;  %v2287_v58 = vsel %vm2257_vm4, %v2222_v16, %v4886_v54  ;;  %v4380_v32 = vunpack.i.l.bf16 %v8675_v26  ;;  %v775_v25 = vrot.slane %v5487_v62, 2  ;;  %v839_v54 = vrot.slane %v5489_v6, 2  ;;  %v5491_v16 = vld [vmem:[#allocation2 + $0x168] sm:$0xff] }
 0x1bb   :  { %v2351_v57 = vsel %vm2322_vm5, %v2286_v38, %v4890_v20  ;;  %v4895_v50 = vunpack.i.l.bf16 %v4894_v27  ;;  %v4896_v7 = vunpack.i.h.bf16 %v4894_v27  ;;  %v2352_v11 = vsel %vm2322_vm5, %v2287_v58, %v4891_v63  ;;  %v7542_v20 = vld [vmem:[#allocation2 + $0x2d0] sm:$0xff]  ;;  %v5490_v63 = vld [vmem:[#allocation2 + $0x1a0] sm:$0xff] }
 0x1bc   :  { %5183 = vrot.lane.b32.xlu0 %v7435_v3, %s5592_s24  ;;  %v4899_v39 = vpop.permute.xlu1 %4898  ;;  %2993 = vmatmul.mubr.f32.gmra.mrb[54].mxu0 %v2610_v33  ;;  %v7535_v3 = vpack.i.bf16 %v7520_v4, %v7511_v28  ;;  %v7546_v22 = vpack.i.bf16 %v7542_v20, %v7204_v61  ;;  %v4381_v41 = vunpack.i.h.bf16 %v8675_v26 }
 0x1bd   :  { %v4900_v45 = vunpack.i.l.bf16 %v4899_v39  ;;  %3943 = vmatprep.mubr.msk.f32.mxu0 %vm32_vm0, %v6992_v2  ;;  %v2416_v47 = vsel %vm2387_vm6, %v2351_v57, %v4895_v50  ;;  %v4901_v10 = vunpack.i.h.bf16 %v4899_v39  ;;  %v5486_v2 = vld [vmem:[#allocation2 + $0x268] sm:$0x3]  ;;  %v2417_v38 = vsel %vm2387_vm6, %v2352_v11, %v4896_v7 }
 0x1be   :  { %v4904_v15 = vpop.permute.xlu0 %4903  ;;  %5188 = vrot.lane.b32.xlu1 %v7506_v0, %s5596_s12  ;;  %v755_v24 = vrot.slane %v5486_v2, 2  ;;  %v840_v57 = vrot.slane %v5490_v63, 2 }
 0x1bf   :  { %v4905_v46 = vunpack.i.l.bf16 %v4904_v15  ;;  %v2481_v48 = vsel %vm2452_vm7, %v2416_v47, %v4900_v45  ;;  %v4906_v27 = vunpack.i.h.bf16 %v4904_v15  ;;  %v2482_v61 = vsel %vm2452_vm7, %v2417_v38, %v4901_v10  ;;  %v8676_v47 = vld [vmem:[#allocation44_spill] sm:$0xff] }
 0x1c0   :  { %5193 = vrot.lane.b32.xlu0 %v7451_v29, %s5593_s27  ;;  %v4909_v44 = vpop.permute.xlu1 %4908  ;;  %v2223_v45 = vsel %vm32_vm0, %v5491_v16, %v4380_v32  ;;  %v8677_v15 = vld [vmem:[#allocation52_spill] sm:$0xff]  ;;  %v7567_v10 = vsel %vm636_vm3, %v753_v13, %v755_v24  ;;  %v841_v26 = vsel %vm636_vm3, %v839_v54, %v840_v57  ;;  %v5492_v32 = vld [vmem:[#allocation2 + $0x170] sm:$0xff] }
 0x1c1   :  { %v4910_v31 = vunpack.i.l.bf16 %v4909_v44  ;;  %v2546_v29 = vsel %vm2517_vm8, %v2481_v48, %v4905_v46  ;;  %v4911_v50 = vunpack.i.h.bf16 %v4909_v44  ;;  %v7562_v11 = vpack.i.bf16 %v8677_v15, %v8676_v47  ;;  %v7598_v16 = vld [vmem:[#allocation2 + $0x2d8] sm:$0xff] }
 0x1c2   :  { %v4914_v18 = vpop.permute.xlu0 %4913  ;;  %5198 = vrot.lane.b32.xlu1 %v7535_v3, %s5594_s6  ;;  %v7572_v46 = vsel %vm636_vm3, %v773_v9, %v775_v25  ;;  %v2224_v44 = vsel %vm32_vm0, %v5492_v32, %v4381_v41  ;;  %v5493_v25 = vld [vmem:[#allocation2 + $0x1a8] sm:$0x3] }
 0x1c3   :  { %v4915_v33 = vunpack.i.l.bf16 %v4914_v18  ;;  %v2611_v39 = vsel %vm2582_vm9, %v2546_v29, %v4910_v31  ;;  %v842_v31 = vrot.slane %v5493_v25, 2 }
 0x1c4   :  { %5203 = vrot.lane.b32.xlu0 %v7471_v14, %s5590_s29  ;;  %v4919_v58 = vpop.permute.xlu1 %4918  ;;  %2998 = vmatmul.mubr.f32.gmra.mrb[56].mxu0 %v2611_v39  ;;  %v4916_v14 = vunpack.i.h.bf16 %v4914_v18 }
 0x1c5   :  { %v4920_v7 = vunpack.i.l.bf16 %v4919_v58  ;;  %3944 = vmatprep.mubr.msk.f32.mxu0 %vm32_vm0, %v6999_v17  ;;  %v2288_v48 = vsel %vm2257_vm4, %v2223_v45, %v4915_v33  ;;  %v2547_v17 = vsel %vm2517_vm8, %v2482_v61, %v4906_v27  ;;  %v4921_v30 = vunpack.i.h.bf16 %v4919_v58  ;;  %v8678_v33 = vld [vmem:[#allocation68_spill] sm:$0xff] }
 0x1c6   :  { %v4924_v2 = vpop.permute.xlu0 %4923  ;;  %5208 = vrot.lane.b32.xlu1 %v7546_v22, %s5595_s7  ;;  %v2612_v43 = vsel %vm2582_vm9, %v2547_v17, %v4911_v50  ;;  %v2289_v6 = vsel %vm2257_vm4, %v2224_v44, %v4916_v14  ;;  %v4385_v39 = vunpack.i.l.bf16 %v8678_v33  ;;  %v7602_v45 = vpack.i.bf16 %v7598_v16, %v7207_v52 }
 0x1c7   :  { %v2353_v13 = vsel %vm2322_vm5, %v2288_v48, %v4920_v7  ;;  %v4925_v24 = vunpack.i.l.bf16 %v4924_v2  ;;  %v4926_v54 = vunpack.i.h.bf16 %v4924_v2  ;;  %v2354_v18 = vsel %vm2322_vm5, %v2289_v6, %v4921_v30  ;;  %v5495_v30 = vld [vmem:[#allocation2 + $0x1b0] sm:$0xff] }
 0x1c8   :  { %5213 = vrot.lane.b32.xlu0 %v7486_v37, %s5592_s24  ;;  %v4929_v9 = vpop.permute.xlu1 %4928  ;;  %3003 = vmatmul.mubr.f32.gmra.mrb[58].mxu0 %v2612_v43  ;;  %v7591_v37 = vpack.i.bf16 %v7572_v46, %v7567_v10  ;;  %v843_v58 = vsel %vm636_vm3, %v840_v57, %v842_v31  ;;  %v777_v7 = vrot.slane %v7542_v20, 2  ;;  %v778_v48 = vrot.slane %v7598_v16, 2  ;;  %v8679_v43 = vld [vmem:[#allocation45_spill] sm:$0xff] }
 0x1c9   :  { %v4930_v62 = vunpack.i.l.bf16 %v4929_v9  ;;  %3945 = vmatprep.mubr.msk.f32.mxu0 %vm32_vm0, %v841_v26  ;;  %v2418_v38 = vsel %vm2387_vm6, %v2353_v13, %v4925_v24  ;;  %v4931_v29 = vunpack.i.h.bf16 %v4929_v9  ;;  %v2419_v47 = vsel %vm2387_vm6, %v2354_v18, %v4926_v54  ;;  %v8680_v9 = vld [vmem:[#allocation53_spill] sm:$0xff] }
 0x1ca   :  { %v4934_v27 = vpop.permute.xlu0 %4933  ;;  %5218 = vrot.lane.b32.xlu1 %v7562_v11, %s5596_s12  ;;  %v4386_v57 = vunpack.i.h.bf16 %v8678_v33  ;;  %v2225_v13 = vsel %vm32_vm0, %v5495_v30, %v4385_v39  ;;  %v7620_v32 = vpack.i.bf16 %v8680_v9, %v8679_v43  ;;  %v7629_v31 = vsel %vm636_vm3, %v777_v7, %v778_v48 }
 0x1cb   :  { %v4935_v63 = vunpack.i.l.bf16 %v4934_v27  ;;  %v2483_v50 = vsel %vm2452_vm7, %v2418_v38, %v4930_v62  ;;  %v4936_v15 = vunpack.i.h.bf16 %v4934_v27  ;;  %v2484_v26 = vsel %vm2452_vm7, %v2419_v47, %v4931_v29  ;;  %v5496_v29 = vld [vmem:[#allocation2 + $0x1b8] sm:$0xff] }
 0x1cc   :  { %5223 = vrot.lane.b32.xlu0 %v7506_v0, %s5593_s27  ;;  %v4939_v61 = vpop.permute.xlu1 %4938 }
 0x1cd   :  { %v4940_v41 = vunpack.i.l.bf16 %v4939_v61  ;;  %v2548_v0 = vsel %vm2517_vm8, %v2483_v50, %v4935_v63  ;;  %v4941_v2 = vunpack.i.h.bf16 %v4939_v61  ;;  %v2226_v63 = vsel %vm32_vm0, %v5496_v29, %v4386_v57 }
 0x1ce   :  { %v4944_v14 = vpop.permute.xlu0 %4943  ;;  %5228 = vrot.lane.b32.xlu1 %v7591_v37, %s5594_s6 }
 0x1cf   :  { %v4945_v17 = vunpack.i.l.bf16 %v4944_v14  ;;  %v2613_v52 = vsel %vm2582_vm9, %v2548_v0, %v4940_v41  ;;  %v4946_v44 = vunpack.i.h.bf16 %v4944_v14  ;;  %v5497_v14 = vld [vmem:[#allocation2 + $0x2e0] sm:$0x3] }
 0x1d0   :  { %5233 = vrot.lane.b32.xlu0 %v7535_v3, %s5590_s29  ;;  %v4949_v20 = vpop.permute.xlu1 %4948  ;;  %3008 = vmatmul.mubr.f32.gmra.mrb[60].mxu0 %v2613_v52  ;;  %v2549_v3 = vsel %vm2517_vm8, %v2484_v26, %v4936_v15  ;;  %v780_v0 = vrot.slane %v5497_v14, 2 }
 0x1d1   :  { %v4950_v24 = vunpack.i.l.bf16 %v4949_v20  ;;  %3946 = vmatprep.mubr.msk.f32.mxu0 %vm32_vm0, %v843_v58  ;;  %v2290_v62 = vsel %vm2257_vm4, %v2225_v13, %v4945_v17  ;;  %v4951_v6 = vunpack.i.h.bf16 %v4949_v20  ;;  %v2614_v27 = vsel %vm2582_vm9, %v2549_v3, %v4941_v2  ;;  %v8681_v2 = vld [vmem:[#allocation69_spill] sm:$0xff]  ;;  %v7652_v13 = vld [vmem:[#allocation2 + $0x2e8] sm:$0xff] }
 0x1d2   :  { %v4954_v25 = vpop.permute.xlu0 %4953  ;;  %5238 = vrot.lane.b32.xlu1 %v7602_v45, %s5595_s7  ;;  %v2291_v33 = vsel %vm2257_vm4, %v2226_v63, %v4946_v44  ;;  %v4390_v17 = vunpack.i.l.bf16 %v8681_v2  ;;  %v5499_v3 = vld [vmem:[#allocation2 + $0x1c8] sm:$0xff]  ;;  %v7672_v63 = vsel %vm636_vm3, %v778_v48, %v780_v0  ;;  %v5501_v0 = vld [vmem:[#allocation2 + $0x2f8] sm:$0x3] }
 0x1d3   :  { %v2355_v54 = vsel %vm2322_vm5, %v2290_v62, %v4950_v24  ;;  %v4955_v38 = vunpack.i.l.bf16 %v4954_v25  ;;  %v4956_v39 = vunpack.i.h.bf16 %v4954_v25  ;;  %v2356_v58 = vsel %vm2322_vm5, %v2291_v33, %v4951_v6 }
 0x1d4   :  { %5243 = vrot.lane.b32.xlu0 %v7546_v22, %s5592_s24  ;;  %v4959_v18 = vpop.permute.xlu1 %4958  ;;  %3013 = vmatmul.mubr.f32.gmra.mrb[62].mxu0 %v2614_v27  ;;  %v5257_v22 = vpack.i.bf16 %v7629_v31, %v7230_v35  ;;  %v5267_v24 = vpack.i.bf16 %v7652_v13, %v7233_v53  ;;  %v4391_v25 = vunpack.i.h.bf16 %v8681_v2  ;;  %v2227_v6 = vsel %vm32_vm0, %v5499_v3, %v4390_v17  ;;  %v8682_v53 = vld [vmem:[#allocation54_spill] sm:$0xff] }
 0x1d5   :  { %v4960_v50 = vunpack.i.l.bf16 %v4959_v18  ;;  %3947 = vmatprep.mubr.msk.f32.mxu0 %vm32_vm0, %v7096_v36  ;;  %v2420_v61 = vsel %vm2387_vm6, %v2355_v54, %v4955_v38  ;;  %v4961_v7 = vunpack.i.h.bf16 %v4959_v18  ;;  %v2421_v26 = vsel %vm2387_vm6, %v2356_v58, %v4956_v39 }
 0x1d6   :  { %v4964_v41 = vpop.permute.xlu0 %4963  ;;  %5248 = vrot.lane.b32.xlu1 %v7620_v32, %s5596_s12  ;;  %v5277_v38 = vpack.i.bf16 %v8682_v53, %v8650_v12  ;;  %v785_v2 = vrot.slane %v5501_v0, 2  ;;  %v5292_v17 = vpack.i.bf16 %v7672_v63, %v7629_v31 }
 0x1d7   :  { %v4965_v47 = vunpack.i.l.bf16 %v4964_v41  ;;  %v2485_v15 = vsel %vm2452_vm7, %v2420_v61, %v4960_v50  ;;  %v4966_v20 = vunpack.i.h.bf16 %v4964_v41  ;;  %v2486_v44 = vsel %vm2452_vm7, %v2421_v26, %v4961_v7  ;;  %v5500_v61 = vld [vmem:[#allocation2 + $0x1d0] sm:$0xff] }
 0x1d8   :  { %5253 = vrot.lane.b32.xlu0 %v7562_v11, %s5593_s27  ;;  %v4969_v36 = vpop.permute.xlu1 %4968  ;;  %v2228_v41 = vsel %vm32_vm0, %v5500_v61, %v4391_v25 }
 0x1d9   :  { %v4970_v52 = vunpack.i.l.bf16 %v4969_v36  ;;  %v2550_v30 = vsel %vm2517_vm8, %v2485_v15, %v4965_v47  ;;  %v4971_v11 = vunpack.i.h.bf16 %v4969_v36 }
 0x1da   :  { %v4974_v57 = vpop.permute.xlu0 %4973  ;;  %5258 = vrot.lane.b32.xlu1 %v5257_v22, %s5594_s6 }
 0x1db   :  { %v4975_v43 = vunpack.i.l.bf16 %v4974_v57  ;;  %v2615_v9 = vsel %vm2582_vm9, %v2550_v30, %v4970_v52  ;;  %v4976_v27 = vunpack.i.h.bf16 %v4974_v57  ;;  %v8683_v52 = vld [vmem:[#allocation70_spill] sm:$0xff]  ;;  %v782_v57 = vrot.slane %v7652_v13, 2  ;;  %v5502_v30 = vld [vmem:[#allocation2 + $0x2f0] sm:$0xff] }
 0x1dc   :  { %5263 = vrot.lane.b32.xlu0 %v7591_v37, %s5590_s29  ;;  %v4979_v62 = vpop.permute.xlu1 %4978  ;;  %3018 = vmatmul.mubr.f32.gmra.mrb[64].mxu0 %v2615_v9  ;;  %v2551_v37 = vsel %vm2517_vm8, %v2486_v44, %v4966_v20  ;;  %v4395_v26 = vunpack.i.l.bf16 %v8683_v52 }
 0x1dd   :  { %v4980_v54 = vunpack.i.l.bf16 %v4979_v62  ;;  %3948 = vmatprep.mubr.msk.f32.mxu0 %vm32_vm0, %v7103_v23  ;;  %v2292_v18 = vsel %vm2257_vm4, %v2227_v6, %v4975_v43  ;;  %v4981_v50 = vunpack.i.h.bf16 %v4979_v62  ;;  %v2616_v39 = vsel %vm2582_vm9, %v2551_v37, %v4971_v11 }
 0x1de   :  { %v4984_v29 = vpop.permute.xlu0 %4983  ;;  %5268 = vrot.lane.b32.xlu1 %v5267_v24, %s5595_s7  ;;  %v2293_v16 = vsel %vm2257_vm4, %v2228_v41, %v4976_v27  ;;  %v783_v24 = vrot.slane %v5502_v30, 2  ;;  %v5503_v27 = vld [vmem:[#allocation2 + $0x1e0] sm:$0xff] }
 0x1df   :  { %v2357_v33 = vsel %vm2322_vm5, %v2292_v18, %v4980_v54  ;;  %v4985_v23 = vunpack.i.l.bf16 %v4984_v29  ;;  %v4986_v48 = vunpack.i.h.bf16 %v4984_v29  ;;  %v2358_v47 = vsel %vm2322_vm5, %v2293_v16, %v4981_v50  ;;  %v5504_v16 = vld [vmem:[#allocation2 + $0x1e8] sm:$0xff] }
 0x1e0   :  { %5273 = vrot.lane.b32.xlu0 %v7602_v45, %s5592_s24  ;;  %v4989_v12 = vpop.permute.xlu1 %4988  ;;  %3023 = vmatmul.mubr.f32.gmra.mrb[66].mxu0 %v2616_v39  ;;  %v5287_v45 = vpack.i.bf16 %v7672_v63, %v7283_v51  ;;  %v4396_v54 = vunpack.i.h.bf16 %v8683_v52  ;;  %v2229_v18 = vsel %vm32_vm0, %v5503_v27, %v4395_v26  ;;  %v7709_v50 = vsel %vm636_vm3, %v782_v57, %v783_v24  ;;  %v5507_v57 = vld [vmem:[#allocation2 + $0x308] sm:$0xff] }
 0x1e1   :  { %v4990_v22 = vunpack.i.l.bf16 %v4989_v12  ;;  %3949 = vmatprep.mubr.msk.f32.mxu0 %vm32_vm0, %v7147_v34  ;;  %v2422_v58 = vsel %vm2387_vm6, %v2357_v33, %v4985_v23  ;;  %v4991_v15 = vunpack.i.h.bf16 %v4989_v12  ;;  %v2423_v11 = vsel %vm2387_vm6, %v2358_v47, %v4986_v48 }
 0x1e2   :  { %v4994_v7 = vpop.permute.xlu0 %4993  ;;  %5278 = vrot.lane.b32.xlu1 %v5277_v38, %s5596_s12  ;;  %v5302_v38 = vpack.i.bf16 %v5502_v30, %v7652_v13  ;;  %v7715_v12 = vsel %vm636_vm3, %v783_v24, %v785_v2  ;;  %v2230_v48 = vsel %vm32_vm0, %v5504_v16, %v4396_v54  ;;  %v8686_v24 = vld [vmem:[#allocation15_spill] sm:$0xff] }
 0x1e3   :  { %v4995_v36 = vunpack.i.l.bf16 %v4994_v7  ;;  %v2487_v14 = vsel %vm2452_vm7, %v2422_v58, %v4990_v22  ;;  %v4996_v43 = vunpack.i.h.bf16 %v4994_v7  ;;  %v2488_v6 = vsel %vm2452_vm7, %v2423_v11, %v4991_v15 }
 0x1e4   :  { %5283 = vrot.lane.b32.xlu0 %v7620_v32, %s5593_s27  ;;  %v4999_v34 = vpop.permute.xlu1 %4998  ;;  %v5297_v32 = vpack.i.bf16 %v5502_v30, %v7242_v40  ;;  %v8684_v40 = vld [vmem:[#allocation55_spill] sm:$0xff]  ;;  %v4400_v11 = vunpack.i.l.bf16 %v8686_v24  ;;  %v4401_v27 = vunpack.i.h.bf16 %v8686_v24 }
 0x1e5   :  { %v5000_v20 = vunpack.i.l.bf16 %v4999_v34  ;;  %v2552_v44 = vsel %vm2517_vm8, %v2487_v14, %v4995_v36  ;;  %v5001_v62 = vunpack.i.h.bf16 %v4999_v34  ;;  %v5307_v37 = vpack.i.bf16 %v8684_v40, %v8659_v55 }
 0x1e6   :  { %v5004_v9 = vpop.permute.xlu0 %5003  ;;  %5288 = vrot.lane.b32.xlu1 %v5287_v45, %s5594_s6  ;;  %v2553_v13 = vsel %vm2517_vm8, %v2488_v6, %v4996_v43  ;;  %v5317_v36 = vpack.i.bf16 %v7715_v12, %v7709_v50 }
 0x1e7   :  { %v5005_v25 = vunpack.i.l.bf16 %v5004_v9  ;;  %v2617_v3 = vsel %vm2582_vm9, %v2552_v44, %v5000_v20  ;;  %v5006_v33 = vunpack.i.h.bf16 %v5004_v9  ;;  %v2618_v55 = vsel %vm2582_vm9, %v2553_v13, %v5001_v62  ;;  %v5506_v20 = vld [vmem:[#allocation2 + $0x300] sm:$0xff] }
 0x1e8   :  { %5293 = vrot.lane.b32.xlu0 %v5292_v17, %s5590_s29  ;;  %v5009_v53 = vpop.permute.xlu1 %5008  ;;  %3028 = vmatmul.mubr.f32.gmra.mrb[68].mxu0 %v2617_v3  ;;  %v5505_v17 = vld [vmem:[#allocation2 + $0x310] sm:$0x3]  ;;  %v5322_v30 = vpack.i.bf16 %v5507_v57, %v5506_v20  ;;  %v787_v9 = vrot.slane %v5506_v20, 2  ;;  %v788_v44 = vrot.slane %v5507_v57, 2  ;;  %v5512_v57 = vld [vmem:[#allocation2 + $0x328] sm:$0x3] }
 0x1e9   :  { %v5010_v29 = vunpack.i.l.bf16 %v5009_v53  ;;  %3950 = vmatprep.mubr.msk.f32.mxu0 %vm32_vm0, %v7153_v56  ;;  %v2294_v23 = vsel %vm2257_vm4, %v2229_v18, %v5005_v25  ;;  %v5011_v61 = vunpack.i.h.bf16 %v5009_v53  ;;  %v2295_v7 = vsel %vm2257_vm4, %v2230_v48, %v5006_v33 }
 0x1ea   :  { %v5014_v39 = vpop.permute.xlu0 %5013  ;;  %5298 = vrot.lane.b32.xlu1 %v5297_v32, %s5595_s7  ;;  %v790_v52 = vrot.slane %v5505_v17, 2  ;;  %v7744_v33 = vsel %vm636_vm3, %v787_v9, %v788_v44  ;;  %v795_v24 = vrot.slane %v5512_v57, 2 }
 0x1eb   :  { %v2359_v56 = vsel %vm2322_vm5, %v2294_v23, %v5010_v29  ;;  %v5015_v41 = vunpack.i.l.bf16 %v5014_v39  ;;  %v5016_v45 = vunpack.i.h.bf16 %v5014_v39  ;;  %v2360_v14 = vsel %vm2322_vm5, %v2295_v7, %v5011_v61  ;;  %v5508_v29 = vld [vmem:[#allocation2 + $0x1f8] sm:$0xff]  ;;  %v8687_v61 = vld [vmem:[#allocation57_spill] sm:$0xff] }
 0x1ec   :  { %5303 = vrot.lane.b32.xlu0 %v5302_v38, %s5592_s24  ;;  %v5019_v22 = vpop.permute.xlu1 %5018  ;;  %3033 = vmatmul.mubr.f32.gmra.mrb[70].mxu0 %v2618_v55  ;;  %v2231_v40 = vsel %vm32_vm0, %v5508_v29, %v4400_v11 }
 0x1ed   :  { %v5020_v58 = vunpack.i.l.bf16 %v5019_v22  ;;  %3951 = vmatprep.mubr.msk.f32.mxu0 %vm32_vm0, %v7190_v21  ;;  %v2424_v47 = vsel %vm2387_vm6, %v2359_v56, %v5015_v41  ;;  %v5021_v0 = vunpack.i.h.bf16 %v5019_v22  ;;  %v8685_v21 = vld [vmem:[#allocation56_spill] sm:$0xff]  ;;  %v2425_v32 = vsel %vm2387_vm6, %v2360_v14, %v5016_v45 }
 0x1ee   :  { %v5024_v15 = vpop.permute.xlu0 %5023  ;;  %5308 = vrot.lane.b32.xlu1 %v5307_v37, %s5596_s12  ;;  %v7751_v41 = vsel %vm636_vm3, %v788_v44, %v790_v52 }
 0x1ef   :  { %v5025_v2 = vunpack.i.l.bf16 %v5024_v15  ;;  %v2489_v34 = vsel %vm2452_vm7, %v2424_v47, %v5020_v58  ;;  %v5026_v62 = vunpack.i.h.bf16 %v5024_v15  ;;  %v2490_v38 = vsel %vm2452_vm7, %v2425_v32, %v5021_v0  ;;  %v5509_v58 = vld [vmem:[#allocation2 + $0x200] sm:$0xff] }
 0x1f0   :  { %5313 = vrot.lane.b32.xlu0 %v8685_v21, %s5593_s27  ;;  %v5029_v26 = vpop.permute.xlu1 %5028  ;;  %v2232_v7 = vsel %vm32_vm0, %v5509_v58, %v4401_v27  ;;  %v5510_v21 = vld [vmem:[#allocation2 + $0x318] sm:$0xff]  ;;  %v7778_v27 = vld [vmem:[#allocation2 + $0x340] sm:$0x3] }
 0x1f1   :  { %v5030_v43 = vunpack.i.l.bf16 %v5029_v26  ;;  %v2554_v3 = vsel %vm2517_vm8, %v2489_v34, %v5025_v2  ;;  %v5031_v6 = vunpack.i.h.bf16 %v5029_v26  ;;  %v2555_v56 = vsel %vm2517_vm8, %v2490_v38, %v5026_v62  ;;  %v5511_v26 = vld [vmem:[#allocation2 + $0x320] sm:$0xff]  ;;  %v7776_v38 = vld [vmem:[#allocation2 + $0x338] sm:$0xff] }
 0x1f2   :  { %v5034_v25 = vpop.permute.xlu0 %5033  ;;  %5318 = vrot.lane.b32.xlu1 %v5317_v36, %s5594_s6  ;;  %v5352_v20 = vpack.i.bf16 %v5511_v26, %v5510_v21  ;;  %v793_v62 = vrot.slane %v5511_v26, 2 }
 0x1f3   :  { %v5035_v54 = vunpack.i.l.bf16 %v5034_v25  ;;  %v2619_v53 = vsel %vm2582_vm9, %v2554_v3, %v5030_v43  ;;  %v5036_v23 = vunpack.i.h.bf16 %v5034_v25 }
 0x1f4   :  { %5323 = vrot.lane.b32.xlu0 %v5322_v30, %s5595_s7  ;;  %v5039_v18 = vpop.permute.xlu1 %5038  ;;  %3038 = vmatmul.mubr.f32.gmra.mrb[72].mxu0 %v2619_v53 }
 0x1f5   :  { %v5040_v37 = vunpack.i.l.bf16 %v5039_v18  ;;  %3952 = vmatprep.mubr.msk.f32.mxu0 %vm32_vm0, %v7197_v8  ;;  %v2296_v39 = vsel %vm2257_vm4, %v2231_v40, %v5035_v54  ;;  %v5041_v55 = vunpack.i.h.bf16 %v5039_v18  ;;  %v2620_v8 = vsel %vm2582_vm9, %v2555_v56, %v5031_v6  ;;  %v7773_v54 = vld [vmem:[#allocation2 + $0x330] sm:$0xff]  ;;  %v8689_v40 = vld [vmem:[#allocation76_spill] sm:$0xff] }
 0x1f6   :  { %v5044_v13 = vpop.permute.xlu0 %5043  ;;  %5328 = vrot.lane.b32.xlu1 %v8687_v61, %s5596_s12  ;;  %v2297_v47 = vsel %vm2257_vm4, %v2232_v7, %v5036_v23  ;;  %v8688_v18 = vld [vmem:[#allocation71_spill] sm:$0xff]  ;;  %v7791_v56 = vsel %vm636_vm3, %v793_v62, %v795_v24 }
 0x1f7   :  { %v2361_v22 = vsel %vm2322_vm5, %v2296_v39, %v5040_v37  ;;  %v5045_v16 = vunpack.i.l.bf16 %v5044_v13  ;;  %v5046_v15 = vunpack.i.h.bf16 %v5044_v13  ;;  %v2362_v2 = vsel %vm2322_vm5, %v2297_v47, %v5041_v55  ;;  %v8690_v39 = vld [vmem:[#allocation58_spill] sm:$0xff]  ;;  %v5513_v47 = vld [vmem:[#allocation2 + $0x210] sm:$0xff] }
 0x1f8   :  { %5333 = vrot.lane.b32.xlu0 %v5317_v36, %s5590_s29  ;;  %v5049_v48 = vpop.permute.xlu1 %5048  ;;  %3043 = vmatmul.mubr.f32.gmra.mrb[74].mxu0 %v2620_v8  ;;  %v5347_v36 = vpack.i.bf16 %v7751_v41, %v7744_v33  ;;  %v4405_v29 = vunpack.i.l.bf16 %v8688_v18  ;;  %v4425_v37 = vunpack.i.l.bf16 %v8689_v40  ;;  %v808_v55 = vrot.slane %v7773_v54, 1 }
 0x1f9   :  { %v5050_v45 = vunpack.i.l.bf16 %v5049_v48  ;;  %3953 = vmatprep.mubr.msk.f32.mxu0 %vm32_vm0, %v7259_v49  ;;  %v2426_v14 = vsel %vm2387_vm6, %v2361_v22, %v5045_v16  ;;  %v5051_v34 = vunpack.i.h.bf16 %v5049_v48  ;;  %v2427_v43 = vsel %vm2387_vm6, %v2362_v2, %v5046_v15 }
 0x1fa   :  { %v5054_v0 = vpop.permute.xlu0 %5053  ;;  %5338 = vrot.lane.b32.xlu1 %v5322_v30, %s5592_s24  ;;  %v792_v30 = vrot.slane %v5510_v21, 2  ;;  %v809_v8 = vrot.slane %v7776_v38, 1  ;;  %v2233_v15 = vsel %vm32_vm0, %v5513_v47, %v4405_v29  ;;  %v818_v47 = vrot.slane %v7773_v54, 2 }
 0x1fb   :  { %v5055_v17 = vunpack.i.l.bf16 %v5054_v0  ;;  %v2491_v52 = vsel %vm2452_vm7, %v2426_v14, %v5050_v45  ;;  %v5056_v9 = vunpack.i.h.bf16 %v5054_v0  ;;  %v2492_v6 = vsel %vm2452_vm7, %v2427_v43, %v5051_v34  ;;  %v5514_v14 = vld [vmem:[#allocation2 + $0x270] sm:$0xff]  ;;  %v3242_v34 = vld [vmem:[%s8370_s2] sm:$0xff] }
 0x1fc   :  { %5343 = vrot.lane.b32.xlu0 %v8687_v61, %s5593_s27  ;;  %v5059_v49 = vpop.permute.xlu1 %5058  ;;  %v7788_v61 = vsel %vm636_vm3, %v792_v30, %v793_v62  ;;  %v2241_v0 = vsel %vm32_vm0, %v5514_v14, %v4425_v37 }
 0x1fd   :  { %v5060_v11 = vunpack.i.l.bf16 %v5059_v49  ;;  %v2556_v32 = vsel %vm2517_vm8, %v2491_v52, %v5055_v17  ;;  %v5061_v25 = vunpack.i.h.bf16 %v5059_v49  ;;  %v2557_v13 = vsel %vm2517_vm8, %v2492_v6, %v5056_v9 }
 0x1fe   :  { %v5064_v44 = vpop.permute.xlu0 %5063  ;;  %5348 = vrot.lane.b32.xlu1 %v5347_v36, %s5594_s6  ;;  %v5382_v52 = vpack.i.bf16 %v7776_v38, %v7773_v54  ;;  %v810_v49 = vsel %vm475_vm2, %v808_v55, %v809_v8  ;;  %v4426_v54 = vunpack.i.h.bf16 %v8689_v40 }
 0x1ff   :  { %v2621_v3 = vsel %vm2582_vm9, %v2556_v32, %v5060_v11  ;;  %v5065_v22 = vunpack.i.l.bf16 %v5064_v44  ;;  %v2622_v16 = vsel %vm2582_vm9, %v2557_v13, %v5061_v25  ;;  %v5066_v48 = vunpack.i.h.bf16 %v5064_v44 }
 0x200   :  { %5353 = vrot.lane.b32.xlu0 %v5352_v20, %s5595_s7  ;;  %v5069_v53 = vpop.permute.xlu1 %5068  ;;  %3048 = vmatmul.mubr.f32.gmra.mrb[76].mxu0 %v2621_v3 }
 0x201   :  { %3954 = vmatprep.mubr.msk.f32.mxu0 %vm32_vm0, %v7335_v42  ;;  %v811_v42 = vrot.slane %v7778_v27, 1  ;;  %v5071_v7 = vunpack.i.h.bf16 %v5069_v53  ;;  %v5070_v45 = vunpack.i.l.bf16 %v5069_v53  ;;  %v2298_v17 = vsel %vm2257_vm4, %v2233_v15, %v5065_v22 }
 0x202   :  { %v5074_v23 = vpop.permute.xlu0 %5073  ;;  %5358 = vrot.lane.b32.xlu1 %v8690_v39, %s5596_s12  ;;  %v2306_v26 = vsel %vm2257_vm4, %v2241_v0, %v5066_v48  ;;  %v819_v15 = vrot.slane %v7776_v38, 2  ;;  %v3246_v38 = vld [vmem:[%s8370_s2 + $0x20] sm:$0xff] }
 0x203   :  { %v812_v21 = vsel %vm475_vm2, %v809_v8, %v811_v42  ;;  %v5075_v57 = vunpack.i.l.bf16 %v5074_v23  ;;  %v2363_v30 = vsel %vm2322_vm5, %v2298_v17, %v5070_v45  ;;  %v2371_v43 = vsel %vm2322_vm5, %v2306_v26, %v5071_v7  ;;  %v3244_v8 = vld [vmem:[%s8370_s2 + $0x10] sm:$0xff]  ;;  %v3245_v42 = vld [vmem:[%s8370_s2 + $0x18] sm:$0xff] }
 0x204   :  { %5363 = vrot.lane.b32.xlu0 %v5347_v36, %s5590_s29  ;;  %v5079_v58 = vpop.permute.xlu1 %5078  ;;  %3053 = vmatmul.mubr.f32.gmra.mrb[78].mxu0 %v2622_v16  ;;  %v5377_v36 = vpack.i.bf16 %v7791_v56, %v7788_v61  ;;  %v5387_v53 = vpack.i.bf16 %v812_v21, %v810_v49  ;;  %v7853_v17 = vld [vmem:[#allocation2 + $0x350] sm:$0xff]  ;;  %v4259_v49 = vpack.c.bf16 %v3245_v42, %v3244_v8  ;;  %v4406_v21 = vunpack.i.h.bf16 %v8688_v18 }
 0x205   :  { %3955 = vmatprep.mubr.msk.f32.mxu0 %vm32_vm0, %v7395_v5  ;;  %v3243_v5 = vld [vmem:[%s8370_s2 + $0x8] sm:$0xff]  ;;  %v5081_v9 = vunpack.i.h.bf16 %v5079_v58  ;;  %v5080_v44 = vunpack.i.l.bf16 %v5079_v58  ;;  %v2428_v29 = vsel %vm2387_vm6, %v2363_v30, %v5075_v57  ;;  %v7871_v18 = vsel %vm636_vm3, %v818_v47, %v819_v15 }
 0x206   :  { %v7802_v2 = vpop.permute.xlu0 %5083  ;;  %5368 = vrot.lane.b32.xlu1 %v5352_v20, %s5592_s24  ;;  %v5076_v20 = vunpack.i.h.bf16 %v5074_v23  ;;  %v4255_v11 = vpack.c.bf16 %v3243_v5, %v3242_v34  ;;  %v7851_v5 = vld [vmem:[#allocation2 + $0x348] sm:$0xff] }
 0x207   :  { %v2493_v22 = vsel %vm2452_vm7, %v2428_v29, %v5080_v44  ;;  %v5086_v26 = vunpack.i.h.bf16 %v7802_v2  ;;  %v834_v30 = vrot.slane %v7851_v5, 1 }
 0x208   :  { %5373 = vrot.lane.b32.xlu0 %v8690_v39, %s5593_s27  ;;  %v5089_v24 = vpop.permute.xlu1 %5088  ;;  %4256 = vmatprep.subr.bf16.mxu1 %v4255_v11  ;;  %v2436_v37 = vsel %vm2387_vm6, %v2371_v43, %v5076_v20  ;;  %v5085_v20 = vunpack.i.l.bf16 %v7802_v2  ;;  %v835_v2 = vrot.slane %v7853_v17, 1 }
 0x209   :  { %v7823_v32 = vpop.f32.mrb[0].mxu0  ;;  %v5091_v62 = vunpack.i.h.bf16 %v5089_v24  ;;  %v5090_v25 = vunpack.i.l.bf16 %v5089_v24  ;;  %v2501_v16 = vsel %vm2452_vm7, %v2436_v37, %v5081_v9 }
 0x20a   :  { %v7825_v3 = vpop.permute.xlu0 %5093  ;;  %v2861_v6 = vpop.f32.mrb[1].mxu0  ;;  %5378 = vrot.lane.b32.xlu1 %v5377_v36, %s5594_s6 }
 0x20b   :  { %v2558_v7 = vsel %vm2517_vm8, %v2493_v22, %v5090_v25  ;;  %v2566_v45 = vsel %vm2517_vm8, %v2501_v16, %v5091_v62  ;;  %v5095_v40 = vunpack.i.l.bf16 %v7825_v3  ;;  %v821_v62 = vrot.slane %v7778_v27, 2  ;;  %v5515_v25 = vld [vmem:[#allocation2 + $0x218] sm:$0xff] }
 0x20c   :  { %5383 = vrot.lane.b32.xlu0 %v5382_v52, %s5595_s7  ;;  %v5099_v23 = vpop.permute.xlu1 %5098  ;;  %v5516_v6 = vld [vmem:[#allocation2 + $0x278] sm:$0xff] }
 0x20d   :  { %v5101_v39 = vunpack.i.h.bf16 %v5099_v23  ;;  %v5100_v13 = vunpack.i.l.bf16 %v5099_v23  ;;  %v7831_v55 = vpop.f32.mrb[2].mxu0  ;;  %v2242_v29 = vsel %vm32_vm0, %v5516_v6, %v4426_v54  ;;  %v7887_v23 = vld [vmem:[#allocation2 + $0x358] sm:$0x3] }
 0x20e   :  { %v5104_v48 = vpop.permute.xlu0 %5103  ;;  %v2866_v58 = vpop.f32.mrb[3].mxu0  ;;  %5388 = vrot.lane.b32.xlu1 %v5387_v53, %s5596_s12 }
 0x20f   :  { %v2623_v14 = vsel %vm2582_vm9, %v2558_v7, %v5100_v13  ;;  %v2631_v0 = vsel %vm2582_vm9, %v2566_v45, %v5101_v39  ;;  %v5106_v43 = vunpack.i.h.bf16 %v5104_v48  ;;  %v5105_v9 = vunpack.i.l.bf16 %v5104_v48 }
 0x210   :  { %5393 = vrot.lane.b32.xlu0 %v5377_v36, %s5590_s29  ;;  %v7849_v34 = vpop.permute.xlu1 %5108  ;;  %3058 = vmatmul.mubr.f32.gmra.mrb[80].mxu0 %v2623_v14  ;;  %v3247_v36 = vld [vmem:[%s8370_s2 + $0x28] sm:$0xff]  ;;  %v2307_v39 = vsel %vm2257_vm4, %v2242_v29, %v5086_v26  ;;  %v836_v48 = vsel %vm475_vm2, %v834_v30, %v835_v2  ;;  %v7905_v14 = vsel %vm636_vm3, %v819_v15, %v821_v62 }
 0x211   :  { %3098 = vmatmul.mubr.f32.vlgmr.msra.gmra.mrb[0].mxu1 %v2631_v0  ;;  %3956 = vmatprep.mubr.msk.f32.mxu0 %vm32_vm0, %v7459_v19  ;;  %v5096_v19 = vunpack.i.h.bf16 %v7825_v3  ;;  %v2234_v3 = vsel %vm32_vm0, %v5515_v25, %v4406_v21  ;;  %v5111_v37 = vunpack.i.h.bf16 %v7849_v34  ;;  %v837_v0 = vrot.slane %v7887_v23, 1 }
 0x212   :  { %v7867_v57 = vpop.permute.xlu0 %5113  ;;  %5398 = vrot.lane.b32.xlu1 %v5382_v52, %s5592_s24  ;;  %3964 = vmatprep.mubr.msk.f32.mxu1 %vm32_vm0, %v6878_v60  ;;  %v4263_v60 = vpack.c.bf16 %v3247_v36, %v3246_v38 }
 0x213   :  { %v7877_v24 = vpop.f32.mrb[4].mxu0  ;;  %4258 = vmatpush3.bf16.msra.mxu1 %v4255_v11  ;;  %v5110_v11 = vunpack.i.l.bf16 %v7849_v34  ;;  %v2372_v8 = vsel %vm2322_vm5, %v2307_v39, %v5096_v19  ;;  %v3248_v34 = vld [vmem:[%s8370_s2 + $0x30] sm:$0xff]  ;;  %v5115_v6 = vunpack.i.l.bf16 %v7867_v57 }
 0x214   :  { %5403 = vrot.lane.b32.xlu0 %v5387_v53, %s5593_s27  ;;  %v5119_v52 = vpop.permute.xlu1 %5118  ;;  %v2871_v44 = vpop.f32.mrb[5].mxu0  ;;  %4260 = vmatprep.subr.bf16.mxu1 %v4259_v49  ;;  %v2299_v53 = vsel %vm2257_vm4, %v2234_v3, %v5085_v20  ;;  %v2437_v7 = vsel %vm2387_vm6, %v2372_v8, %v5106_v43  ;;  %v838_v3 = vsel %vm475_vm2, %v835_v2, %v837_v0 }
 0x215   :  { %v5121_v13 = vunpack.i.h.bf16 %v5119_v52  ;;  %v5120_v27 = vunpack.i.l.bf16 %v5119_v52  ;;  %v2364_v16 = vsel %vm2322_vm5, %v2299_v53, %v5095_v40  ;;  %v2502_v36 = vsel %vm2452_vm7, %v2437_v7, %v5111_v37  ;;  %v8692_v44 = vld [vmem:[#allocation77_spill] sm:$0xff] }
 0x216   :  { %v7891_v22 = vpop.permute.xlu0 %5123  ;;  %1741 = vrot.lane.b32.xlu1 %v7871_v18, %s5594_s6  ;;  %v2429_v58 = vsel %vm2387_vm6, %v2364_v16, %v5105_v9  ;;  %v8691_v9 = vld [vmem:[#allocation74_spill] sm:$0xff]  ;;  %v4430_v62 = vunpack.i.l.bf16 %v8692_v44 }
 0x217   :  { %v7897_v42 = vpop.f32.mrb[6].mxu0  ;;  %4262 = vmatpush3.bf16.msra.mxu1 %v4259_v49  ;;  %v3249_v49 = vld [vmem:[%s8370_s2 + $0x38] sm:$0xff]  ;;  %v2494_v38 = vsel %vm2452_vm7, %v2429_v58, %v5110_v11  ;;  %v2567_v20 = vsel %vm2517_vm8, %v2502_v36, %v5121_v13  ;;  %v4410_v52 = vunpack.i.l.bf16 %v8691_v9  ;;  %v5126_v11 = vunpack.i.h.bf16 %v7891_v22 }
 0x218   :  { %1933 = vrot.lane.b32.xlu0 %v7851_v5, %s5595_s7  ;;  %v5129_v45 = vpop.permute.xlu1 %5128  ;;  %v2876_v47 = vpop.f32.mrb[7].mxu0  ;;  %4264 = vmatprep.subr.bf16.mxu1 %v4263_v60  ;;  %v2559_v15 = vsel %vm2517_vm8, %v2494_v38, %v5120_v27  ;;  %v4267_v30 = vpack.c.bf16 %v3249_v49, %v3248_v34  ;;  %v5125_v2 = vunpack.i.l.bf16 %v7891_v22  ;;  %v5518_v27 = vld [vmem:[#allocation2 + $0x288] sm:$0xff] }
 0x219   :  { %v5131_v21 = vunpack.i.h.bf16 %v5129_v45  ;;  %v5130_v54 = vunpack.i.l.bf16 %v5129_v45  ;;  %v2243_v16 = vsel %vm32_vm0, %v5518_v27, %v4430_v62 }
 0x21a   :  { %v5134_v26 = vpop.permute.xlu0 %5133  ;;  %2125 = vrot.lane.b32.xlu1 %v836_v48, %s5596_s12 }
 0x21b   :  { %v2624_v19 = vsel %vm2582_vm9, %v2559_v15, %v5130_v54  ;;  %v2632_v40 = vsel %vm2582_vm9, %v2567_v20, %v5131_v21  ;;  %4266 = vmatpush3.bf16.msra.mxu1 %v4263_v60  ;;  %v5116_v60 = vunpack.i.h.bf16 %v7867_v57  ;;  %v5136_v53 = vunpack.i.h.bf16 %v5134_v26  ;;  %v5517_v57 = vld [vmem:[#allocation2 + $0x228] sm:$0xff] }
 0x21c   :  { %1743 = vrot.lane.b32.xlu0 %v7905_v14, %s5594_s6  ;;  %v5139_v43 = vpop.permute.xlu1 %5138  ;;  %3063 = vmatmul.mubr.f32.gmra.mrb[82].mxu0 %v2624_v19  ;;  %v2235_v13 = vsel %vm32_vm0, %v5517_v57, %v4410_v52 }
 0x21d   :  { %v7925_v25 = vpop.f32.mrb[8].mxu0  ;;  %3103 = vmatmul.mubr.f32.gmra.mrb[2].mxu1 %v2632_v40  ;;  %3957 = vmatprep.mubr.msk.f32.mxu0 %vm32_vm0, %v7511_v28  ;;  %v5135_v28 = vunpack.i.l.bf16 %v5134_v26  ;;  %v5141_v8 = vunpack.i.h.bf16 %v5139_v43  ;;  %v5140_v48 = vunpack.i.l.bf16 %v5139_v43  ;;  %v2308_v58 = vsel %vm2257_vm4, %v2243_v16, %v5116_v60 }
 0x21e   :  { %v7932_v29 = vpop.permute.xlu0 %5143  ;;  %v2881_v37 = vpop.f32.mrb[9].mxu0  ;;  %1935 = vrot.lane.b32.xlu1 %v7853_v17, %s5595_s7  ;;  %3965 = vmatprep.mubr.msk.f32.mxu1 %vm32_vm0, %v7520_v4  ;;  %v2300_v22 = vsel %vm2257_vm4, %v2235_v13, %v5115_v6  ;;  %v2373_v49 = vsel %vm2322_vm5, %v2308_v58, %v5126_v11  ;;  %v4411_v6 = vunpack.i.h.bf16 %v8691_v9 }
 0x21f   :  { %4268 = vmatprep.subr.bf16.mxu1 %v4267_v30  ;;  %v2365_v34 = vsel %vm2322_vm5, %v2300_v22, %v5125_v2  ;;  %v2438_v54 = vsel %vm2387_vm6, %v2373_v49, %v5136_v53  ;;  %v4431_v37 = vunpack.i.h.bf16 %v8692_v44  ;;  %v5146_v11 = vunpack.i.h.bf16 %v7932_v29  ;;  %v5519_v44 = vld [vmem:[#allocation2 + $0x230] sm:$0xff] }
 0x220   :  { %2127 = vrot.lane.b32.xlu0 %v838_v3, %s5596_s12  ;;  %v5149_v39 = vpop.permute.xlu1 %5148  ;;  %4270 = vmatpush3.bf16.msra.mxu1 %v4267_v30  ;;  %v2430_v21 = vsel %vm2387_vm6, %v2365_v34, %v5135_v28  ;;  %v2503_v20 = vsel %vm2452_vm7, %v2438_v54, %v5141_v8  ;;  %v5145_v2 = vunpack.i.l.bf16 %v7932_v29  ;;  %v2236_v8 = vsel %vm32_vm0, %v5519_v44, %v4411_v6  ;;  %v8693_v6 = vld [vmem:[#allocation75_spill] sm:$0xff] }
 0x221   :  { %v7943_v4 = vpop.f32.mrb[10].mxu0  ;;  %v5151_v7 = vunpack.i.h.bf16 %v5149_v39  ;;  %v5150_v45 = vunpack.i.l.bf16 %v5149_v39  ;;  %v2495_v15 = vsel %vm2452_vm7, %v2430_v21, %v5140_v48 }
 0x222   :  { %v5154_v47 = vpop.permute.xlu0 %5153  ;;  %v2886_v0 = vpop.f32.mrb[11].mxu0  ;;  %v2301_v29 = vsel %vm2257_vm4, %v2236_v8, %v5145_v2 }
 0x223   :  { %v2560_v40 = vsel %vm2517_vm8, %v2495_v15, %v5150_v45  ;;  %v2568_v30 = vsel %vm2517_vm8, %v2503_v20, %v5151_v7  ;;  %v5156_v28 = vunpack.i.h.bf16 %v5154_v47  ;;  %v5155_v39 = vunpack.i.l.bf16 %v5154_v47 }
 0x224   :  { %v5159_v38 = vpop.permute.xlu1 %5158 }
 0x225   :  { %v5161_v36 = vunpack.i.h.bf16 %v5159_v38  ;;  %v5160_v26 = vunpack.i.l.bf16 %v5159_v38  ;;  %v2366_v0 = vsel %vm2322_vm5, %v2301_v29, %v5155_v39 }
 0x226   :  { %v5164_v19 = vpop.permute.xlu0 %5163 }
 0x227   :  { %v7955_v43 = vpop.f32.mrb[12].mxu0  ;;  %v2625_v52 = vsel %vm2582_vm9, %v2560_v40, %v5160_v26  ;;  %v2633_v62 = vsel %vm2582_vm9, %v2568_v30, %v5161_v36  ;;  %v5166_v13 = vunpack.i.h.bf16 %v5164_v19  ;;  %v5165_v27 = vunpack.i.l.bf16 %v5164_v19 }
 0x228   :  { %v5169_v3 = vpop.permute.xlu1 %5168  ;;  %v2891_v60 = vpop.f32.mrb[13].mxu0  ;;  %3068 = vmatmul.mubr.f32.gmra.mrb[84].mxu0 %v2625_v52  ;;  %3108 = vmatmul.mubr.f32.gmra.mrb[4].mxu1 %v2633_v62 }
 0x229   :  { %3958 = vmatprep.mubr.msk.f32.mxu0 %vm32_vm0, %v7567_v10  ;;  %3966 = vmatprep.mubr.msk.f32.mxu1 %vm32_vm0, %v7572_v46  ;;  %v5520_v10 = vld [vmem:[#allocation2 + $0x290] sm:$0xff]  ;;  %v5171_v46 = vunpack.i.h.bf16 %v5169_v3  ;;  %v5170_v58 = vunpack.i.l.bf16 %v5169_v3  ;;  %v2431_v49 = vsel %vm2387_vm6, %v2366_v0, %v5165_v27 }
 0x22a   :  { %v5174_v53 = vpop.permute.xlu0 %5173  ;;  %v2244_v48 = vsel %vm32_vm0, %v5520_v10, %v4431_v37  ;;  %v4415_v37 = vunpack.i.l.bf16 %v8693_v6 }
 0x22b   :  { %v7967_v57 = vpop.f32.mrb[14].mxu0  ;;  %v2309_v22 = vsel %vm2257_vm4, %v2244_v48, %v5146_v11  ;;  %v2496_v15 = vsel %vm2452_vm7, %v2431_v49, %v5170_v58  ;;  %v8694_v11 = vld [vmem:[#allocation78_spill] sm:$0xff]  ;;  %v5176_v39 = vunpack.i.h.bf16 %v5174_v53 }
 0x22c   :  { %v5179_v9 = vpop.permute.xlu1 %5178  ;;  %v2896_v16 = vpop.f32.mrb[15].mxu0  ;;  %v2374_v34 = vsel %vm2322_vm5, %v2309_v22, %v5156_v28  ;;  %v4435_v2 = vunpack.i.l.bf16 %v8694_v11  ;;  %v5522_v22 = vld [vmem:[#allocation2 + $0x2a0] sm:$0xff] }
 0x22d   :  { %v5181_v7 = vunpack.i.h.bf16 %v5179_v9  ;;  %v5180_v45 = vunpack.i.l.bf16 %v5179_v9  ;;  %v2439_v21 = vsel %vm2387_vm6, %v2374_v34, %v5166_v13  ;;  %v5175_v13 = vunpack.i.l.bf16 %v5174_v53 }
 0x22e   :  { %v5184_v47 = vpop.permute.xlu0 %5183  ;;  %v2504_v20 = vsel %vm2452_vm7, %v2439_v21, %v5171_v46  ;;  %v5521_v46 = vld [vmem:[#allocation2 + $0x240] sm:$0xff]  ;;  %v2245_v29 = vsel %vm32_vm0, %v5522_v22, %v4435_v2 }
 0x22f   :  { %v2561_v30 = vsel %vm2517_vm8, %v2496_v15, %v5180_v45  ;;  %v2569_v52 = vsel %vm2517_vm8, %v2504_v20, %v5181_v7  ;;  %v5186_v16 = vunpack.i.h.bf16 %v5184_v47  ;;  %v5185_v44 = vunpack.i.l.bf16 %v5184_v47 }
 0x230   :  { %v5189_v54 = vpop.permute.xlu1 %5188  ;;  %v2237_v58 = vsel %vm32_vm0, %v5521_v46, %v4415_v37 }
 0x231   :  { %v5191_v38 = vunpack.i.h.bf16 %v5189_v54  ;;  %v5190_v36 = vunpack.i.l.bf16 %v5189_v54  ;;  %v7977_v26 = vpop.f32.mrb[16].mxu0  ;;  %v2302_v45 = vsel %vm2257_vm4, %v2237_v58, %v5175_v13 }
 0x232   :  { %v5194_v19 = vpop.permute.xlu0 %5193  ;;  %v2901_v40 = vpop.f32.mrb[17].mxu0  ;;  %v2367_v47 = vsel %vm2322_vm5, %v2302_v45, %v5185_v44 }
 0x233   :  { %v2626_v62 = vsel %vm2582_vm9, %v2561_v30, %v5190_v36  ;;  %v2634_v3 = vsel %vm2582_vm9, %v2569_v52, %v5191_v38  ;;  %v5196_v8 = vunpack.i.h.bf16 %v5194_v19  ;;  %v5195_v10 = vunpack.i.l.bf16 %v5194_v19 }
 0x234   :  { %v5199_v60 = vpop.permute.xlu1 %5198  ;;  %3073 = vmatmul.mubr.f32.gmra.mrb[86].mxu0 %v2626_v62  ;;  %3113 = vmatmul.mubr.f32.gmra.mrb[6].mxu1 %v2634_v3 }
 0x235   :  { %v7987_v28 = vpop.f32.mrb[18].mxu0  ;;  %3959 = vmatprep.mubr.msk.f32.mxu0 %vm32_vm0, %v7230_v35  ;;  %3967 = vmatprep.mubr.msk.f32.mxu1 %vm32_vm0, %v7629_v31  ;;  %v5201_v7 = vunpack.i.h.bf16 %v5199_v60  ;;  %v5200_v35 = vunpack.i.l.bf16 %v5199_v60  ;;  %v2310_v31 = vsel %vm2257_vm4, %v2245_v29, %v5176_v39  ;;  %v2432_v54 = vsel %vm2387_vm6, %v2367_v47, %v5195_v10 }
 0x236   :  { %v5204_v27 = vpop.permute.xlu0 %5203  ;;  %v2906_v9 = vpop.f32.mrb[19].mxu0  ;;  %v2375_v49 = vsel %vm2322_vm5, %v2310_v31, %v5186_v16  ;;  %v4436_v16 = vunpack.i.h.bf16 %v8694_v11 }
 0x237   :  { %v2440_v38 = vsel %vm2387_vm6, %v2375_v49, %v5196_v8  ;;  %v2497_v40 = vsel %vm2452_vm7, %v2432_v54, %v5200_v35  ;;  %v4416_v9 = vunpack.i.h.bf16 %v8693_v6  ;;  %v5206_v44 = vunpack.i.h.bf16 %v5204_v27  ;;  %v5524_v6 = vld [vmem:[#allocation2 + $0x2a8] sm:$0xff] }
 0x238   :  { %v5209_v48 = vpop.permute.xlu1 %5208  ;;  %v2505_v30 = vsel %vm2452_vm7, %v2440_v38, %v5201_v7  ;;  %v5205_v8 = vunpack.i.l.bf16 %v5204_v27  ;;  %v5523_v7 = vld [vmem:[#allocation2 + $0x248] sm:$0xff]  ;;  %v2246_v11 = vsel %vm32_vm0, %v5524_v6, %v4436_v16  ;;  %v8695_v16 = vld [vmem:[#allocation16_spill] sm:$0xff] }
 0x239   :  { %v5211_v53 = vunpack.i.h.bf16 %v5209_v48  ;;  %v5210_v0 = vunpack.i.l.bf16 %v5209_v48  ;;  %v2238_v35 = vsel %vm32_vm0, %v5523_v7, %v4416_v9  ;;  %v2311_v27 = vsel %vm2257_vm4, %v2246_v11, %v5206_v44 }
 0x23a   :  { %v5214_v34 = vpop.permute.xlu0 %5213  ;;  %v4420_v44 = vunpack.i.l.bf16 %v8695_v16 }
 0x23b   :  { %v7999_v21 = vpop.f32.mrb[20].mxu0  ;;  %v2562_v62 = vsel %vm2517_vm8, %v2497_v40, %v5210_v0  ;;  %v2570_v3 = vsel %vm2517_vm8, %v2505_v30, %v5211_v53  ;;  %v5216_v48 = vunpack.i.h.bf16 %v5214_v34  ;;  %v5215_v46 = vunpack.i.l.bf16 %v5214_v34 }
 0x23c   :  { %v5219_v36 = vpop.permute.xlu1 %5218  ;;  %v2911_v15 = vpop.f32.mrb[21].mxu0 }
 0x23d   :  { %v5221_v20 = vunpack.i.h.bf16 %v5219_v36  ;;  %v5220_v19 = vunpack.i.l.bf16 %v5219_v36  ;;  %v2376_v54 = vsel %vm2322_vm5, %v2311_v27, %v5216_v48 }
 0x23e   :  { %v5224_v52 = vpop.permute.xlu0 %5223 }
 0x23f   :  { %v8007_v60 = vpop.f32.mrb[22].mxu0  ;;  %v2627_v37 = vsel %vm2582_vm9, %v2562_v62, %v5220_v19  ;;  %v2635_v2 = vsel %vm2582_vm9, %v2570_v3, %v5221_v20  ;;  %v5226_v58 = vunpack.i.h.bf16 %v5224_v52  ;;  %v5225_v22 = vunpack.i.l.bf16 %v5224_v52 }
 0x240   :  { %v5229_v39 = vpop.permute.xlu1 %5228  ;;  %v2916_v13 = vpop.f32.mrb[23].mxu0  ;;  %3078 = vmatmul.mubr.f32.gmra.mrb[88].mxu0 %v2627_v37  ;;  %3118 = vmatmul.mubr.f32.gmra.mrb[8].mxu1 %v2635_v2 }
 0x241   :  { %3960 = vmatprep.mubr.msk.f32.mxu0 %vm32_vm0, %v7283_v51  ;;  %3968 = vmatprep.mubr.msk.f32.mxu1 %vm32_vm0, %v7672_v63  ;;  %v5231_v45 = vunpack.i.h.bf16 %v5229_v39  ;;  %v5230_v31 = vunpack.i.l.bf16 %v5229_v39  ;;  %v2303_v63 = vsel %vm2257_vm4, %v2238_v35, %v5205_v8  ;;  %v2441_v36 = vsel %vm2387_vm6, %v2376_v54, %v5226_v58  ;;  %v8696_v8 = vld [vmem:[#allocation79_spill] sm:$0xff] }
 0x242   :  { %v5234_v10 = vpop.permute.xlu0 %5233  ;;  %v2368_v49 = vsel %vm2322_vm5, %v2303_v63, %v5215_v46  ;;  %v4440_v48 = vunpack.i.l.bf16 %v8696_v8  ;;  %v5525_v63 = vld [vmem:[#allocation2 + $0x258] sm:$0xff] }
 0x243   :  { %v2433_v38 = vsel %vm2387_vm6, %v2368_v49, %v5225_v22  ;;  %v2506_v52 = vsel %vm2452_vm7, %v2441_v36, %v5231_v45  ;;  %v5236_v46 = vunpack.i.h.bf16 %v5234_v10  ;;  %v5235_v58 = vunpack.i.l.bf16 %v5234_v10 }
 0x244   :  { %v5239_v29 = vpop.permute.xlu1 %5238  ;;  %v2498_v30 = vsel %vm2452_vm7, %v2433_v38, %v5230_v31  ;;  %v2239_v27 = vsel %vm32_vm0, %v5525_v63, %v4420_v44 }
 0x245   :  { %v8019_v51 = vpop.f32.mrb[24].mxu0  ;;  %v5241_v53 = vunpack.i.h.bf16 %v5239_v29  ;;  %v5240_v0 = vunpack.i.l.bf16 %v5239_v29  ;;  %v2304_v10 = vsel %vm2257_vm4, %v2239_v27, %v5235_v58 }
 0x246   :  { %v5244_v34 = vpop.permute.xlu0 %5243  ;;  %v2921_v47 = vpop.f32.mrb[25].mxu0 }
 0x247   :  { %v2563_v37 = vsel %vm2517_vm8, %v2498_v30, %v5240_v0  ;;  %v2571_v2 = vsel %vm2517_vm8, %v2506_v52, %v5241_v53  ;;  %v5246_v29 = vunpack.i.h.bf16 %v5244_v34  ;;  %v5245_v7 = vunpack.i.l.bf16 %v5244_v34  ;;  %v5526_v53 = vld [vmem:[#allocation2 + $0x2b8] sm:$0xff] }
 0x248   :  { %v5249_v15 = vpop.permute.xlu1 %5248 }
 0x249   :  { %v5251_v20 = vunpack.i.h.bf16 %v5249_v15  ;;  %v5250_v19 = vunpack.i.l.bf16 %v5249_v15  ;;  %v8027_v40 = vpop.f32.mrb[26].mxu0  ;;  %v2369_v38 = vsel %vm2322_vm5, %v2304_v10, %v5245_v7 }
 0x24a   :  { %v5254_v62 = vpop.permute.xlu0 %5253  ;;  %v2926_v3 = vpop.f32.mrb[27].mxu0 }
 0x24b   :  { %v2628_v39 = vsel %vm2582_vm9, %v2563_v37, %v5250_v19  ;;  %v2636_v13 = vsel %vm2582_vm9, %v2571_v2, %v5251_v20  ;;  %v5256_v6 = vunpack.i.h.bf16 %v5254_v62  ;;  %v5255_v11 = vunpack.i.l.bf16 %v5254_v62 }
 0x24c   :  { %v5259_v9 = vpop.permute.xlu1 %5258  ;;  %3083 = vmatmul.mubr.f32.gmra.mrb[90].mxu0 %v2628_v39  ;;  %3123 = vmatmul.mubr.f32.gmra.mrb[10].mxu1 %v2636_v13 }
 0x24d   :  { %3961 = vmatprep.mubr.msk.f32.mxu0 %vm32_vm0, %v7268_v1  ;;  %3969 = vmatprep.mubr.msk.f32.mxu1 %vm32_vm0, %v7709_v50  ;;  %v2247_v1 = vsel %vm32_vm0, %v5526_v53, %v4440_v48  ;;  %v5261_v0 = vunpack.i.h.bf16 %v5259_v9  ;;  %v5260_v47 = vunpack.i.l.bf16 %v5259_v9  ;;  %v2434_v20 = vsel %vm2387_vm6, %v2369_v38, %v5255_v11  ;;  %v5527_v53 = vld [vmem:[#allocation2 + $0x260] sm:$0xff] }
 0x24e   :  { %v5264_v22 = vpop.permute.xlu0 %5263  ;;  %v2312_v50 = vsel %vm2257_vm4, %v2247_v1, %v5236_v46  ;;  %v4421_v46 = vunpack.i.h.bf16 %v8695_v16 }
 0x24f   :  { %v8041_v35 = vpop.f32.mrb[28].mxu0  ;;  %v2377_v36 = vsel %vm2322_vm5, %v2312_v50, %v5246_v29  ;;  %v2499_v37 = vsel %vm2452_vm7, %v2434_v20, %v5260_v47  ;;  %v4441_v29 = vunpack.i.h.bf16 %v8696_v8  ;;  %v5265_v7 = vunpack.i.l.bf16 %v5264_v22  ;;  %v5528_v50 = vld [vmem:[#allocation2 + $0x2c0] sm:$0xff] }
 0x250   :  { %v5269_v45 = vpop.permute.xlu1 %5268  ;;  %v2931_v31 = vpop.f32.mrb[29].mxu0  ;;  %v2442_v19 = vsel %vm2387_vm6, %v2377_v36, %v5256_v6  ;;  %v5266_v11 = vunpack.i.h.bf16 %v5264_v22  ;;  %v2240_v1 = vsel %vm32_vm0, %v5527_v53, %v4421_v46 }
 0x251   :  { %v5271_v49 = vunpack.i.h.bf16 %v5269_v45  ;;  %v5270_v34 = vunpack.i.l.bf16 %v5269_v45  ;;  %v2507_v2 = vsel %vm2452_vm7, %v2442_v19, %v5261_v0  ;;  %v2248_v10 = vsel %vm32_vm0, %v5528_v50, %v4441_v29  ;;  %v8697_v19 = vld [vmem:[#allocation80_spill] sm:$0xff] }
 0x252   :  { %v5274_v54 = vpop.permute.xlu0 %5273  ;;  %v4446_v46 = vunpack.i.h.bf16 %v8697_v19 }
 0x253   :  { %v8049_v15 = vpop.f32.mrb[30].mxu0  ;;  %v2564_v13 = vsel %vm2517_vm8, %v2499_v37, %v5270_v34  ;;  %v2572_v9 = vsel %vm2517_vm8, %v2507_v2, %v5271_v49  ;;  %v5275_v45 = vunpack.i.l.bf16 %v5274_v54  ;;  %v5276_v27 = vunpack.i.h.bf16 %v5274_v54 }
 0x254   :  { %v5279_v30 = vpop.permute.xlu1 %5278  ;;  %v2936_v52 = vpop.f32.mrb[31].mxu0 }
 0x255   :  { %v5281_v62 = vunpack.i.h.bf16 %v5279_v30  ;;  %v5280_v3 = vunpack.i.l.bf16 %v5279_v30  ;;  %v4445_v30 = vunpack.i.l.bf16 %v8697_v19 }
 0x256   :  { %v5284_v39 = vpop.permute.xlu0 %5283 }
 0x257   :  { %v2629_v44 = vsel %vm2582_vm9, %v2564_v13, %v5280_v3  ;;  %v2637_v48 = vsel %vm2582_vm9, %v2572_v9, %v5281_v62  ;;  %v5285_v16 = vunpack.i.l.bf16 %v5284_v39  ;;  %v5286_v0 = vunpack.i.h.bf16 %v5284_v39 }
 0x258   :  { %v5289_v58 = vpop.permute.xlu1 %5288  ;;  %3088 = vmatmul.mubr.f32.gmra.mrb[92].mxu0 %v2629_v44  ;;  %3128 = vmatmul.mubr.f32.gmra.mrb[12].mxu1 %v2637_v48 }
 0x259   :  { %v8061_v6 = vpop.f32.mrb[32].mxu0  ;;  %3962 = vmatprep.mubr.msk.f32.mxu0 %vm32_vm0, %v7340_v59  ;;  %3970 = vmatprep.mubr.msk.f32.mxu1 %vm32_vm0, %v7715_v12  ;;  %v5290_v8 = vunpack.i.l.bf16 %v5289_v58  ;;  %v2305_v59 = vsel %vm2257_vm4, %v2240_v1, %v5265_v7  ;;  %v5291_v49 = vunpack.i.h.bf16 %v5289_v58  ;;  %v2313_v12 = vsel %vm2257_vm4, %v2248_v10, %v5266_v11  ;;  %v5529_v11 = vld [vmem:[#allocation2 + $0x2d0] sm:$0xff] }
 0x25a   :  { %v5294_v31 = vpop.permute.xlu0 %5293  ;;  %v2941_v63 = vpop.f32.mrb[33].mxu0  ;;  %v2370_v22 = vsel %vm2322_vm5, %v2305_v59, %v5275_v45  ;;  %v2378_v52 = vsel %vm2322_vm5, %v2313_v12, %v5276_v27  ;;  %v2249_v45 = vsel %vm32_vm0, %v5529_v11, %v4445_v30 }
 0x25b   :  { %v2435_v62 = vsel %vm2387_vm6, %v2370_v22, %v5285_v16  ;;  %v2443_v3 = vsel %vm2387_vm6, %v2378_v52, %v5286_v0  ;;  %v5295_v37 = vunpack.i.l.bf16 %v5294_v31  ;;  %v5296_v1 = vunpack.i.h.bf16 %v5294_v31 }
 0x25c   :  { %v5299_v47 = vpop.permute.xlu1 %5298  ;;  %v2500_v39 = vsel %vm2452_vm7, %v2435_v62, %v5290_v8  ;;  %v2508_v48 = vsel %vm2452_vm7, %v2443_v3, %v5291_v49  ;;  %v8698_v3 = vld [vmem:[#allocation17_spill] sm:$0xff] }
 0x25d   :  { %v8070_v34 = vpop.f32.mrb[34].mxu0  ;;  %v5301_v54 = vunpack.i.h.bf16 %v5299_v47  ;;  %v5300_v38 = vunpack.i.l.bf16 %v5299_v47  ;;  %v2314_v0 = vsel %vm2257_vm4, %v2249_v45, %v5295_v37  ;;  %v4450_v37 = vunpack.i.l.bf16 %v8698_v3  ;;  %v5531_v45 = vld [vmem:[#allocation2 + $0x2e8] sm:$0xff] }
 0x25e   :  { %v5304_v36 = vpop.permute.xlu0 %5303  ;;  %v2946_v20 = vpop.f32.mrb[35].mxu0  ;;  %v4451_v11 = vunpack.i.h.bf16 %v8698_v3 }
 0x25f   :  { %v5305_v13 = vunpack.i.l.bf16 %v5304_v36  ;;  %v2565_v29 = vsel %vm2517_vm8, %v2500_v39, %v5300_v38  ;;  %v2573_v7 = vsel %vm2517_vm8, %v2508_v48, %v5301_v54  ;;  %v5306_v50 = vunpack.i.h.bf16 %v5304_v36  ;;  %v5530_v54 = vld [vmem:[#allocation2 + $0x2d8] sm:$0xff] }
 0x260   :  { %v5309_v2 = vpop.permute.xlu1 %5308  ;;  %v2250_v31 = vsel %vm32_vm0, %v5530_v54, %v4446_v46  ;;  %v5532_v54 = vld [vmem:[#allocation2 + $0x2f0] sm:$0xff] }
 0x261   :  { %v5311_v9 = vunpack.i.h.bf16 %v5309_v2  ;;  %v5310_v44 = vunpack.i.l.bf16 %v5309_v2  ;;  %v2379_v10 = vsel %vm2322_vm5, %v2314_v0, %v5305_v13  ;;  %v2315_v36 = vsel %vm2257_vm4, %v2250_v31, %v5296_v1 }
 0x262   :  { %v5314_v58 = vpop.permute.xlu0 %5313  ;;  %v2252_v31 = vsel %vm32_vm0, %v5532_v54, %v4451_v11 }
 0x263   :  { %v5315_v63 = vunpack.i.l.bf16 %v5314_v58  ;;  %v8084_v27 = vpop.f32.mrb[36].mxu0  ;;  %v2630_v16 = vsel %vm2582_vm9, %v2565_v29, %v5310_v44  ;;  %v2638_v53 = vsel %vm2582_vm9, %v2573_v7, %v5311_v9  ;;  %v5316_v49 = vunpack.i.h.bf16 %v5314_v58 }
 0x264   :  { %v5319_v8 = vpop.permute.xlu1 %5318  ;;  %v2951_v47 = vpop.f32.mrb[37].mxu0  ;;  %3093 = vmatmul.mubr.f32.gmra.mrb[94].mxu0 %v2630_v16  ;;  %3133 = vmatmul.mubr.f32.gmra.mrb[14].mxu1 %v2638_v53 }
 0x265   :  { %v5320_v59 = vunpack.i.l.bf16 %v5319_v8  ;;  %3971 = vmatprep.mubr.msk.f32.mxu1 %vm32_vm0, %v7744_v33  ;;  %v2444_v12 = vsel %vm2387_vm6, %v2379_v10, %v5315_v63  ;;  %v5321_v38 = vunpack.i.h.bf16 %v5319_v8  ;;  %v2380_v33 = vsel %vm2322_vm5, %v2315_v36, %v5306_v50 }
 0x266   :  { %v5324_v22 = vpop.permute.xlu0 %5323  ;;  %v2445_v39 = vsel %vm2387_vm6, %v2380_v33, %v5316_v49  ;;  %v2251_v63 = vsel %vm32_vm0, %v5531_v45, %v4450_v37 }
 0x267   :  { %v5325_v20 = vunpack.i.l.bf16 %v5324_v22  ;;  %v8094_v19 = vpop.f32.mrb[38].mxu0  ;;  %v2509_v30 = vsel %vm2452_vm7, %v2444_v12, %v5320_v59  ;;  %v5326_v13 = vunpack.i.h.bf16 %v5324_v22  ;;  %v2510_v29 = vsel %vm2452_vm7, %v2445_v39, %v5321_v38 }
 0x268   :  { %v5329_v52 = vpop.permute.xlu1 %5328  ;;  %v2956_v62 = vpop.f32.mrb[39].mxu0 }
 0x269   :  { %v5330_v2 = vunpack.i.l.bf16 %v5329_v52  ;;  %v2574_v44 = vsel %vm2517_vm8, %v2509_v30, %v5325_v20  ;;  %v5331_v48 = vunpack.i.h.bf16 %v5329_v52  ;;  %v2575_v50 = vsel %vm2517_vm8, %v2510_v29, %v5326_v13  ;;  %v8699_v13 = vld [vmem:[#allocation81_spill] sm:$0xff] }
 0x26a   :  { %v5334_v9 = vpop.permute.xlu0 %5333 }
 0x26b   :  { %v5335_v46 = vunpack.i.l.bf16 %v5334_v9  ;;  %v2639_v58 = vsel %vm2582_vm9, %v2574_v44, %v5330_v2  ;;  %v5336_v1 = vunpack.i.h.bf16 %v5334_v9  ;;  %v2640_v12 = vsel %vm2582_vm9, %v2575_v50, %v5331_v48 }
 0x26c   :  { %v5339_v7 = vpop.permute.xlu1 %5338  ;;  %3138 = vmatmul.mubr.f32.gmra.mrb[16].mxu1 %v2639_v58  ;;  %v4455_v9 = vunpack.i.l.bf16 %v8699_v13 }
 0x26d   :  { %v5340_v16 = vunpack.i.l.bf16 %v5339_v7  ;;  %v8106_v53 = vpop.f32.mrb[40].mxu0  ;;  %3972 = vmatprep.mubr.msk.f32.mxu1 %vm32_vm0, %v7751_v41  ;;  %v2316_v0 = vsel %vm2257_vm4, %v2251_v63, %v5335_v46  ;;  %v5341_v10 = vunpack.i.h.bf16 %v5339_v7  ;;  %v2317_v20 = vsel %vm2257_vm4, %v2252_v31, %v5336_v1 }
 0x26e   :  { %v5344_v8 = vpop.permute.xlu0 %5343  ;;  %v2961_v47 = vpop.f32.mrb[41].mxu0 }
 0x26f   :  { %v2381_v59 = vsel %vm2322_vm5, %v2316_v0, %v5340_v16  ;;  %v5345_v49 = vunpack.i.l.bf16 %v5344_v8  ;;  %v5346_v30 = vunpack.i.h.bf16 %v5344_v8  ;;  %v2382_v3 = vsel %vm2322_vm5, %v2317_v20, %v5341_v10  ;;  %v5533_v8 = vld [vmem:[#allocation2 + $0x300] sm:$0xff] }
 0x270   :  { %v5349_v22 = vpop.permute.xlu1 %5348  ;;  %3143 = vmatmul.mubr.f32.gmra.mrb[18].mxu1 %v2640_v12  ;;  %v4456_v0 = vunpack.i.h.bf16 %v8699_v13  ;;  %v2253_v47 = vsel %vm32_vm0, %v5533_v8, %v4455_v9 }
 0x271   :  { %v5350_v38 = vunpack.i.l.bf16 %v5349_v22  ;;  %v8115_v41 = vpop.f32.mrb[42].mxu0  ;;  %3973 = vmatprep.mubr.msk.f32.mxu1 %vm32_vm0, %v7788_v61  ;;  %v2446_v36 = vsel %vm2387_vm6, %v2381_v59, %v5345_v49  ;;  %v5351_v37 = vunpack.i.h.bf16 %v5349_v22  ;;  %v2447_v48 = vsel %vm2387_vm6, %v2382_v3, %v5346_v30 }
 0x272   :  { %v5354_v52 = vpop.permute.xlu0 %5353  ;;  %v2966_v62 = vpop.f32.mrb[43].mxu0 }
 0x273   :  { %v5355_v33 = vunpack.i.l.bf16 %v5354_v52  ;;  %v2511_v2 = vsel %vm2452_vm7, %v2446_v36, %v5350_v38  ;;  %v5356_v61 = vunpack.i.h.bf16 %v5354_v52  ;;  %v2512_v63 = vsel %vm2452_vm7, %v2447_v48, %v5351_v37  ;;  %v5534_v52 = vld [vmem:[#allocation2 + $0x308] sm:$0xff] }
 0x274   :  { %v5359_v39 = vpop.permute.xlu1 %5358 }
 0x275   :  { %v5360_v44 = vunpack.i.l.bf16 %v5359_v39  ;;  %v2576_v58 = vsel %vm2517_vm8, %v2511_v2, %v5355_v33  ;;  %v5361_v29 = vunpack.i.h.bf16 %v5359_v39  ;;  %v2577_v12 = vsel %vm2517_vm8, %v2512_v63, %v5356_v61  ;;  %v8700_v61 = vld [vmem:[#allocation82_spill] sm:$0xff] }
 0x276   :  { %v5364_v46 = vpop.permute.xlu0 %5363 }
 0x277   :  { %v5365_v7 = vunpack.i.l.bf16 %v5364_v46  ;;  %v8126_v11 = vpop.f32.mrb[44].mxu0  ;;  %v2641_v45 = vsel %vm2582_vm9, %v2576_v58, %v5360_v44  ;;  %v5366_v10 = vunpack.i.h.bf16 %v5364_v46  ;;  %v2642_v20 = vsel %vm2582_vm9, %v2577_v12, %v5361_v29 }
 0x278   :  { %v5369_v16 = vpop.permute.xlu1 %5368  ;;  %v2971_v1 = vpop.f32.mrb[45].mxu0  ;;  %3148 = vmatmul.mubr.f32.gmra.mrb[20].mxu1 %v2641_v45  ;;  %v4460_v46 = vunpack.i.l.bf16 %v8700_v61  ;;  %v844_v58 = vrot.slane %v7851_v5, 2  ;;  %v5535_v5 = vld [vmem:[#allocation2 + $0x318] sm:$0xff] }
 0x279   :  { %v5370_v50 = vunpack.i.l.bf16 %v5369_v16  ;;  %3974 = vmatprep.mubr.msk.f32.mxu1 %vm32_vm0, %v7791_v56  ;;  %v2318_v59 = vsel %vm2257_vm4, %v2253_v47, %v5365_v7  ;;  %v5371_v22 = vunpack.i.h.bf16 %v5369_v16  ;;  %v2254_v56 = vsel %vm32_vm0, %v5534_v52, %v4456_v0 }
 0x27a   :  { %v5374_v49 = vpop.permute.xlu0 %5373  ;;  %v2319_v3 = vsel %vm2257_vm4, %v2254_v56, %v5366_v10  ;;  %v845_v0 = vrot.slane %v7853_v17, 2 }
 0x27b   :  { %v2383_v54 = vsel %vm2322_vm5, %v2318_v59, %v5370_v50  ;;  %v5375_v31 = vunpack.i.l.bf16 %v5374_v49  ;;  %v8137_v38 = vpop.f32.mrb[46].mxu0  ;;  %v5376_v37 = vunpack.i.h.bf16 %v5374_v49  ;;  %v2384_v39 = vsel %vm2322_vm5, %v2319_v3, %v5371_v22 }
 0x27c   :  { %v5379_v30 = vpop.permute.xlu1 %5378  ;;  %v2976_v36 = vpop.f32.mrb[47].mxu0  ;;  %3153 = vmatmul.mubr.f32.gmra.mrb[22].mxu1 %v2642_v20  ;;  %v2255_v49 = vsel %vm32_vm0, %v5535_v5, %v4460_v46 }
 0x27d   :  { %v5380_v62 = vunpack.i.l.bf16 %v5379_v30  ;;  %3975 = vmatprep.mubr.msk.f32.mxu1 %vm32_vm0, %v7871_v18  ;;  %v2448_v33 = vsel %vm2387_vm6, %v2383_v54, %v5375_v31  ;;  %v5381_v13 = vunpack.i.h.bf16 %v5379_v30  ;;  %v2449_v18 = vsel %vm2387_vm6, %v2384_v39, %v5376_v37  ;;  %v5536_v39 = vld [vmem:[#allocation2 + $0x320] sm:$0xff] }
 0x27e   :  { %v5384_v2 = vpop.permute.xlu0 %5383  ;;  %v4461_v54 = vunpack.i.h.bf16 %v8700_v61  ;;  %v846_v36 = vsel %vm636_vm3, %v844_v58, %v845_v0 }
 0x27f   :  { %v5385_v9 = vunpack.i.l.bf16 %v5384_v2  ;;  %v2513_v44 = vsel %vm2452_vm7, %v2448_v33, %v5380_v62  ;;  %v5386_v45 = vunpack.i.h.bf16 %v5384_v2  ;;  %v2514_v10 = vsel %vm2452_vm7, %v2449_v18, %v5381_v13 }
 0x280   :  { %v5389_v48 = vpop.permute.xlu1 %5388  ;;  %v2256_v13 = vsel %vm32_vm0, %v5536_v39, %v4461_v54  ;;  %v3180_v54 = vmax.f32 %v7877_v24, 0.0  ;;  %v3184_v24 = vmax.f32 %v7955_v43, 0.0  ;;  %v3197_v39 = vmax.f32 %v8094_v19, 0.0 }
 0x281   :  { %v5390_v29 = vunpack.i.l.bf16 %v5389_v48  ;;  %v8149_v7 = vpop.f32.mrb[48].mxu0  ;;  %v2578_v1 = vsel %vm2517_vm8, %v2513_v44, %v5385_v9  ;;  %v5391_v8 = vunpack.i.h.bf16 %v5389_v48  ;;  %v2579_v30 = vsel %vm2517_vm8, %v2514_v10, %v5386_v45 }
 0x282   :  { %v5394_v63 = vpop.permute.xlu0 %5393  ;;  %v2981_v16 = vpop.f32.mrb[49].mxu0  ;;  %v3201_v19 = vmax.f32 %v8137_v38, 0.0 }
 0x283   :  { %v5395_v47 = vunpack.i.l.bf16 %v5394_v63  ;;  %v2643_v50 = vsel %vm2582_vm9, %v2578_v1, %v5390_v29  ;;  %v5396_v52 = vunpack.i.h.bf16 %v5394_v63  ;;  %v2644_v3 = vsel %vm2582_vm9, %v2579_v30, %v5391_v8 }
 0x284   :  { %v5399_v59 = vpop.permute.xlu1 %5398  ;;  %3158 = vmatmul.mubr.f32.gmra.mrb[24].mxu1 %v2643_v50 }
 0x285   :  { %v5400_v12 = vunpack.i.l.bf16 %v5399_v59  ;;  %v8157_v22 = vpop.f32.mrb[50].mxu0  ;;  %3976 = vmatprep.mubr.msk.f32.mxu1 %vm32_vm0, %v7905_v14  ;;  %v2320_v17 = vsel %vm2257_vm4, %v2255_v49, %v5395_v47  ;;  %v5401_v37 = vunpack.i.h.bf16 %v5399_v59  ;;  %v847_v14 = vrot.slane %v7887_v23, 2 }
 0x286   :  { %v5404_v31 = vpop.permute.xlu0 %5403  ;;  %v2986_v20 = vpop.f32.mrb[51].mxu0  ;;  %v2321_v48 = vsel %vm2257_vm4, %v2256_v13, %v5396_v52  ;;  %v3178_v49 = vmax.f32 %v7823_v32, 0.0  ;;  %v3182_v32 = vmax.f32 %v7925_v25, 0.0  ;;  %v3185_v52 = vmax.f32 %v7967_v57, 0.0 }
 0x287   :  { %v5405_v56 = vunpack.i.l.bf16 %v5404_v31  ;;  %v2385_v62 = vsel %vm2322_vm5, %v2320_v17, %v5400_v12  ;;  %v5406_v61 = vunpack.i.h.bf16 %v5404_v31  ;;  %v2386_v23 = vsel %vm2322_vm5, %v2321_v48, %v5401_v37 }
 0x288   :  { %v1742_v33 = vpop.permute.xlu1 %1741  ;;  %3163 = vmatmul.mubr.f32.gmra.mrb[26].mxu1 %v2644_v3  ;;  %v848_v45 = vsel %vm636_vm3, %v845_v0, %v847_v14  ;;  %v3179_v12 = vmax.f32 %v7831_v55, 0.0  ;;  %v3181_v20 = vmax.f32 %v7897_v42, 0.0  ;;  %v3183_v55 = vmax.f32 %v7943_v4, 0.0 }
 0x289   :  { %v2450_v2 = vsel %vm2387_vm6, %v2385_v62, %v5405_v56  ;;  %3977 = vmatprep.mubr.msk.f32.mxu1 %vm32_vm0, %v846_v36  ;;  %v2451_v1 = vsel %vm2387_vm6, %v2386_v23, %v5406_v61  ;;  %v3186_v42 = vmax.f32 %v7977_v26, 0.0  ;;  %v3187_v62 = vmax.f32 %v7987_v28, 0.0 }
 0x28a   :  { %v2515_v9 = vsel %vm2452_vm7, %v2450_v2, %v1742_v33  ;;  %v1934_v44 = vpop.permute.xlu0 %1933  ;;  %v3188_v4 = vmax.f32 %v7999_v21, 0.0  ;;  %v3189_v57 = vmax.f32 %v8007_v60, 0.0  ;;  %v3190_v26 = vmax.f32 %v8019_v51, 0.0 }
 0x28b   :  { %v8173_v46 = vpop.f32.mrb[52].mxu0  ;;  %v2580_v58 = vsel %vm2517_vm8, %v2515_v9, %v1934_v44  ;;  %v3191_v37 = vmax.f32 %v8027_v40, 0.0  ;;  %v3192_v28 = vmax.f32 %v8041_v35, 0.0  ;;  %v3193_v14 = vmax.f32 %v8049_v15, 0.0 }
 0x28c   :  { %v2126_v29 = vpop.permute.xlu1 %2125  ;;  %v2991_v18 = vpop.f32.mrb[53].mxu0  ;;  %v3194_v60 = vmax.f32 %v8061_v6, 0.0  ;;  %v3195_v40 = vmax.f32 %v8070_v34, 0.0  ;;  %v3196_v35 = vmax.f32 %v8084_v27, 0.0  ;;  %v3198_v15 = vmax.f32 %v8106_v53, 0.0 }
 0x28d   :  { %v2645_v63 = vsel %vm2582_vm9, %v2580_v58, %v2126_v29  ;;  %v3199_v9 = vmax.f32 %v8115_v41, 0.0  ;;  %v3200_v34 = vmax.f32 %v8126_v11, 0.0  ;;  %v3202_v53 = vmax.f32 %v8149_v7, 0.0 }
 0x28e   :  { %v1744_v16 = vpop.permute.xlu0 %1743  ;;  %3168 = vmatmul.mubr.f32.gmra.mrb[28].mxu1 %v2645_v63  ;;  %v3203_v48 = vmax.f32 %v8157_v22, 0.0  ;;  %v3204_v41 = vmax.f32 %v8173_v46, 0.0 }
 0x28f   :  { %v8180_v8 = vpop.f32.mrb[54].mxu0  ;;  %3978 = vmatprep.mubr.msk.f32.mxu1 %vm32_vm0, %v848_v45  ;;  %v2516_v47 = vsel %vm2452_vm7, %v2451_v1, %v1744_v16 }
 0x290   :  { %v1936_v50 = vpop.permute.xlu1 %1935  ;;  %v2996_v10 = vpop.f32.mrb[55].mxu0  ;;  %v3205_v58 = vmax.f32 %v8180_v8, 0.0 }
 0x291   :  { %v2581_v59 = vsel %vm2517_vm8, %v2516_v47, %v1936_v50 }
 0x292   :  { %v2128_v5 = vpop.permute.xlu0 %2127 }
 0x293   :  { %v2646_v0 = vsel %vm2582_vm9, %v2581_v59, %v2128_v5 }
 0x294   :  { %3173 = vmatmul.mubr.f32.gmra.mrb[30].mxu1 %v2646_v0 }
 0x295   :  { %4132 = vmatprep.mubr.msk.f32.mxu1 %vm2387_vm6, %v3178_v49 }
 0x297   :  { %v8190_v17 = vpop.f32.mrb[56].mxu0 }
 0x298   :  { %4133 = vmatmul.mubr.msk.f32.vlgmr.msra.gmra.mrb[32].mxu1 %vm2387_vm6, %v3179_v12  ;;  %v3001_v31 = vpop.f32.mrb[57].mxu0  ;;  %v3206_v38 = vmax.f32 %v8190_v17, 0.0 }
 0x299   :  { %4135 = vmatprep.mubr.msk.f32.mxu1 %vm2387_vm6, %v3180_v54 }
 0x29b   :  { %v8196_v30 = vpop.f32.mrb[58].mxu0 }
 0x29c   :  { %4136 = vmatmul.mubr.msk.f32.gmra.mrb[34].mxu1 %vm2387_vm6, %v3181_v20  ;;  %v3006_v36 = vpop.f32.mrb[59].mxu0  ;;  %v3207_v22 = vmax.f32 %v8196_v30, 0.0 }
 0x29d   :  { %4138 = vmatprep.mubr.msk.f32.mxu1 %vm2387_vm6, %v3182_v32 }
 0x2a0   :  { %4139 = vmatmul.mubr.msk.f32.gmra.mrb[36].mxu1 %vm2387_vm6, %v3183_v55 }
 0x2a1   :  { %4141 = vmatprep.mubr.msk.f32.mxu1 %vm2387_vm6, %v3184_v24 }
 0x2a3   :  { %v3009_v25 = vpop.f32.mrb[60].mxu0 }
 0x2a4   :  { %4142 = vmatmul.mubr.msk.f32.gmra.mrb[38].mxu1 %vm2387_vm6, %v3185_v52  ;;  %v3011_v56 = vpop.f32.mrb[61].mxu0  ;;  %v3208_v23 = vmax.f32 %v3009_v25, 0.0 }
 0x2a5   :  { %4144 = vmatprep.mubr.msk.f32.mxu1 %vm2387_vm6, %v3186_v42 }
 0x2a7   :  { %v3014_v3 = vpop.f32.mrb[62].mxu0 }
 0x2a8   :  { %4145 = vmatmul.mubr.msk.f32.gmra.mrb[40].mxu1 %vm2387_vm6, %v3187_v62  ;;  %v3016_v43 = vpop.f32.mrb[63].mxu0  ;;  %v3209_v46 = vmax.f32 %v3014_v3, 0.0 }
 0x2a9   :  { %4147 = vmatprep.mubr.msk.f32.mxu1 %vm2387_vm6, %v3188_v4 }
 0x2ac   :  { %4148 = vmatmul.mubr.msk.f32.gmra.mrb[42].mxu1 %vm2387_vm6, %v3189_v57 }
 0x2ad   :  { %4150 = vmatprep.mubr.msk.f32.mxu1 %vm2387_vm6, %v3190_v26 }
 0x2af   :  { %v3019_v33 = vpop.f32.mrb[64].mxu0 }
 0x2b0   :  { %4151 = vmatmul.mubr.msk.f32.gmra.mrb[44].mxu1 %vm2387_vm6, %v3191_v37  ;;  %v3021_v21 = vpop.f32.mrb[65].mxu0  ;;  %v3210_v18 = vmax.f32 %v3019_v33, 0.0 }
 0x2b1   :  { %4153 = vmatprep.mubr.msk.f32.mxu1 %vm2387_vm6, %v3192_v28 }
 0x2b3   :  { %v3024_v2 = vpop.f32.mrb[66].mxu0 }
 0x2b4   :  { %4154 = vmatmul.mubr.msk.f32.gmra.mrb[46].mxu1 %vm2387_vm6, %v3193_v14  ;;  %v3026_v51 = vpop.f32.mrb[67].mxu0  ;;  %v3211_v16 = vmax.f32 %v3024_v2, 0.0 }
 0x2b5   :  { %4156 = vmatprep.mubr.msk.f32.mxu1 %vm2387_vm6, %v3194_v60 }
 0x2b8   :  { %4157 = vmatmul.mubr.msk.f32.gmra.mrb[48].mxu1 %vm2387_vm6, %v3195_v40 }
 0x2b9   :  { %4159 = vmatprep.mubr.msk.f32.mxu1 %vm2387_vm6, %v3196_v35 }
 0x2bb   :  { %v3029_v13 = vpop.f32.mrb[68].mxu0 }
 0x2bc   :  { %4160 = vmatmul.mubr.msk.f32.gmra.mrb[50].mxu1 %vm2387_vm6, %v3197_v39  ;;  %v3031_v6 = vpop.f32.mrb[69].mxu0  ;;  %v3212_v1 = vmax.f32 %v3029_v13, 0.0 }
 0x2bd   :  { %4162 = vmatprep.mubr.msk.f32.mxu1 %vm2387_vm6, %v3198_v15 }
 0x2bf   :  { %v3034_v44 = vpop.f32.mrb[70].mxu0 }
 0x2c0   :  { %4163 = vmatmul.mubr.msk.f32.gmra.mrb[52].mxu1 %vm2387_vm6, %v3199_v9  ;;  %v3036_v27 = vpop.f32.mrb[71].mxu0  ;;  %v3213_v50 = vmax.f32 %v3034_v44, 0.0 }
 0x2c1   :  { %4165 = vmatprep.mubr.msk.f32.mxu1 %vm2387_vm6, %v3200_v34 }
 0x2c4   :  { %4166 = vmatmul.mubr.msk.f32.gmra.mrb[54].mxu1 %vm2387_vm6, %v3201_v19 }
 0x2c5   :  { %4168 = vmatprep.mubr.msk.f32.mxu1 %vm2387_vm6, %v3202_v53 }
 0x2c7   :  { %v3039_v61 = vpop.f32.mrb[72].mxu0 }
 0x2c8   :  { %4169 = vmatmul.mubr.msk.f32.gmra.mrb[56].mxu1 %vm2387_vm6, %v3203_v48  ;;  %v3041_v11 = vpop.f32.mrb[73].mxu0  ;;  %v3214_v10 = vmax.f32 %v3039_v61, 0.0 }
 0x2c9   :  { %4171 = vmatprep.mubr.msk.f32.mxu1 %vm2387_vm6, %v3204_v41 }
 0x2cb   :  { %v3044_v29 = vpop.f32.mrb[74].mxu0 }
 0x2cc   :  { %4172 = vmatmul.mubr.msk.f32.gmra.mrb[58].mxu1 %vm2387_vm6, %v3205_v58  ;;  %v3046_v7 = vpop.f32.mrb[75].mxu0  ;;  %v3215_v59 = vmax.f32 %v3044_v29, 0.0 }
 0x2cd   :  { %4174 = vmatprep.mubr.msk.f32.mxu1 %vm2387_vm6, %v3206_v38 }
 0x2d0   :  { %4175 = vmatmul.mubr.msk.f32.gmra.mrb[60].mxu1 %vm2387_vm6, %v3207_v22 }
 0x2d1   :  { %4177 = vmatprep.mubr.msk.f32.mxu1 %vm2387_vm6, %v3208_v23 }
 0x2d3   :  { %v3049_v45 = vpop.f32.mrb[76].mxu0 }
 0x2d4   :  { %4178 = vmatmul.mubr.msk.f32.gmra.mrb[62].mxu1 %vm2387_vm6, %v3209_v46  ;;  %v3051_v63 = vpop.f32.mrb[77].mxu0  ;;  %v3216_v5 = vmax.f32 %v3049_v45, 0.0 }
 0x2d5   :  { %4180 = vmatprep.mubr.msk.f32.mxu1 %vm2387_vm6, %v3210_v18 }
 0x2d7   :  { %v3054_v8 = vpop.f32.mrb[78].mxu0 }
 0x2d8   :  { %4181 = vmatmul.mubr.msk.f32.gmra.mrb[64].mxu1 %vm2387_vm6, %v3211_v16  ;;  %v3056_v47 = vpop.f32.mrb[79].mxu0  ;;  %v3217_v49 = vmax.f32 %v3054_v8, 0.0 }
 0x2d9   :  { %4183 = vmatprep.mubr.msk.f32.mxu1 %vm2387_vm6, %v3212_v1 }
 0x2dc   :  { %4184 = vmatmul.mubr.msk.f32.gmra.mrb[66].mxu1 %vm2387_vm6, %v3213_v50 }
 0x2dd   :  { %4186 = vmatprep.mubr.msk.f32.mxu1 %vm2387_vm6, %v3214_v10 }
 0x2e0   :  { %4187 = vmatmul.mubr.msk.f32.gmra.mrb[68].mxu1 %vm2387_vm6, %v3215_v59 }
 0x2e1   :  { %4189 = vmatprep.mubr.msk.f32.mxu1 %vm2387_vm6, %v3216_v5 }
 0x2e3   :  { %v3059_v0 = vpop.f32.mrb[80].mxu0 }
 0x2e4   :  { %v3218_v12 = vmax.f32 %v3059_v0, 0.0  ;;  %v3099_v54 = vpop.f32.mrb[0].mxu1  ;;  %4190 = vmatmul.mubr.msk.f32.gmra.mrb[70].mxu1 %vm2387_vm6, %v3217_v49  ;;  %v3061_v17 = vpop.f32.mrb[81].mxu0 }
 0x2e5   :  { %v3101_v31 = vpop.f32.mrb[1].mxu1  ;;  %v3226_v53 = vmax.f32 %v3099_v54, 0.0 }
 0x2e6   :  { %4192 = vmatprep.mubr.msk.f32.mxu1 %vm2387_vm6, %v3218_v12 }
 0x2ef   :  { %v3064_v20 = vpop.f32.mrb[82].mxu0 }
 0x2f0   :  { %v3219_v32 = vmax.f32 %v3064_v20, 0.0  ;;  %v3104_v30 = vpop.f32.mrb[2].mxu1  ;;  %v3066_v36 = vpop.f32.mrb[83].mxu0 }
 0x2f1   :  { %v3106_v55 = vpop.f32.mrb[3].mxu1  ;;  %v3227_v48 = vmax.f32 %v3104_v30, 0.0  ;;  %v8286_v36 = vld [vmem:[%s8371_s3] ss:$0 sm:$0xff]  ;;  %s5597_s3 = smov [#allocation6]  }
 0x2f2   :  { %4193 = vmatmul.mubr.msk.f32.gmra.mrb[72].mxu1 %vm2387_vm6, %v3219_v32  ;;  %s3903_s7 = sshll.u32 %s5597_s3, 4  ;;  %s3904_s7 = int_to_ptr.vmem [resolvable:$true] %s3903_s7 }
 0x2f3   :  { %s5559_s12 = scalar_lea.vmem %s3904_s7, 8192  ;;  %p5564_p9 = scmp.lt.s32.totalorder %s3904_s7, %s3904_s7 }
 0x2f4   :  { %p5560_p8 = scmp.ne.s32.totalorder %s3904_s7, %s5559_s12  ;;  %p5565_p10 = scmp.lt.s32.totalorder %s5559_s12, %s5559_s12 }
 0x2f6   :  { %p5566_p11 = por %p5565_p10, %p5564_p9 }
 0x2f8   :  { %p5567_p12 = pnand %p5566_p11, %p5560_p8 }
 0x2fb   :  { %v3069_v24 = vpop.f32.mrb[84].mxu0  ;;  %v3109_v52 = vpop.f32.mrb[4].mxu1 }
 0x2fc   :  { %v3220_v42 = vmax.f32 %v3069_v24, 0.0  ;;  %v3071_v25 = vpop.f32.mrb[85].mxu0  ;;  %v3111_v56 = vpop.f32.mrb[5].mxu1  ;;  %v3228_v41 = vmax.f32 %v3109_v52, 0.0 }
 0x2fe   :  { %4195 = vmatprep.mubr.msk.f32.mxu1 %vm2387_vm6, %v3220_v42 }
 0x307   :  { %v3074_v62 = vpop.f32.mrb[86].mxu0  ;;  %v3114_v4 = vpop.f32.mrb[6].mxu1 }
 0x308   :  { %v3221_v3 = vmax.f32 %v3074_v62, 0.0  ;;  %v3076_v43 = vpop.f32.mrb[87].mxu0  ;;  %v3116_v57 = vpop.f32.mrb[7].mxu1  ;;  %v3229_v11 = vmax.f32 %v3114_v4, 0.0 }
 0x30a   :  { %4196 = vmatmul.mubr.msk.f32.gmra.mrb[74].mxu1 %vm2387_vm6, %v3221_v3 }
 0x313   :  { %v3079_v26 = vpop.f32.mrb[88].mxu0  ;;  %v3119_v37 = vpop.f32.mrb[8].mxu1 }
 0x314   :  { %v3222_v28 = vmax.f32 %v3079_v26, 0.0  ;;  %v3081_v33 = vpop.f32.mrb[89].mxu0  ;;  %v3121_v21 = vpop.f32.mrb[9].mxu1  ;;  %v3230_v38 = vmax.f32 %v3119_v37, 0.0 }
 0x316   :  { %4198 = vmatprep.mubr.msk.f32.mxu1 %vm2387_vm6, %v3222_v28 }
 0x31f   :  { %v3084_v14 = vpop.f32.mrb[90].mxu0  ;;  %v3124_v60 = vpop.f32.mrb[10].mxu1 }
 0x320   :  { %v3223_v2 = vmax.f32 %v3084_v14, 0.0  ;;  %v3086_v51 = vpop.f32.mrb[91].mxu0  ;;  %v3126_v40 = vpop.f32.mrb[11].mxu1  ;;  %v3231_v7 = vmax.f32 %v3124_v60, 0.0 }
 0x322   :  { %4199 = vmatmul.mubr.msk.f32.gmra.mrb[76].mxu1 %vm2387_vm6, %v3223_v2 }
 0x32b   :  { %v3089_v35 = vpop.f32.mrb[92].mxu0  ;;  %v3129_v39 = vpop.f32.mrb[12].mxu1 }
 0x32c   :  { %v3224_v15 = vmax.f32 %v3089_v35, 0.0  ;;  %v3091_v13 = vpop.f32.mrb[93].mxu0  ;;  %v3131_v6 = vpop.f32.mrb[13].mxu1  ;;  %v3232_v23 = vmax.f32 %v3129_v39, 0.0 }
 0x32e   :  { %4201 = vmatprep.mubr.msk.f32.mxu1 %vm2387_vm6, %v3224_v15 }
 0x337   :  { %v3094_v9 = vpop.f32.mrb[94].mxu0  ;;  %v3134_v34 = vpop.f32.mrb[14].mxu1 }
 0x338   :  { %v3225_v44 = vmax.f32 %v3094_v9, 0.0  ;;  %v3096_v27 = vpop.f32.mrb[95].mxu0  ;;  %v3136_v19 = vpop.f32.mrb[15].mxu1  ;;  %v3233_v46 = vmax.f32 %v3134_v34, 0.0 }
 0x33a   :  { %4202 = vmatmul.mubr.msk.f32.gmra.mrb[78].mxu1 %vm2387_vm6, %v3225_v44 }
 0x33b   :  { %4204 = vmatprep.mubr.msk.f32.mxu1 %vm2387_vm6, %v3226_v53 }
 0x33e   :  { %4205 = vmatmul.mubr.msk.f32.gmra.mrb[80].mxu1 %vm2387_vm6, %v3227_v48 }
 0x33f   :  { %v3139_v61 = vpop.f32.mrb[16].mxu1  ;;  %4207 = vmatprep.mubr.msk.f32.mxu1 %vm2387_vm6, %v3228_v41 }
 0x340   :  { %v3141_v58 = vpop.f32.mrb[17].mxu1  ;;  %v3234_v18 = vmax.f32 %v3139_v61, 0.0 }
 0x342   :  { %4208 = vmatmul.mubr.msk.f32.gmra.mrb[82].mxu1 %vm2387_vm6, %v3229_v11 }
 0x343   :  { %v3144_v29 = vpop.f32.mrb[18].mxu1  ;;  %4210 = vmatprep.mubr.msk.f32.mxu1 %vm2387_vm6, %v3230_v38 }
 0x344   :  { %v3146_v22 = vpop.f32.mrb[19].mxu1  ;;  %v3235_v63 = vmax.f32 %v3144_v29, 0.0 }
 0x346   :  { %4211 = vmatmul.mubr.msk.f32.gmra.mrb[84].mxu1 %vm2387_vm6, %v3231_v7 }
 0x347   :  { %4213 = vmatprep.mubr.msk.f32.mxu1 %vm2387_vm6, %v3232_v23 }
 0x34a   :  { %4214 = vmatmul.mubr.msk.f32.gmra.mrb[86].mxu1 %vm2387_vm6, %v3233_v46 }
 0x34b   :  { %v3149_v45 = vpop.f32.mrb[20].mxu1  ;;  %4216 = vmatprep.mubr.msk.f32.mxu1 %vm2387_vm6, %v3234_v18 }
 0x34c   :  { %v3236_v16 = vmax.f32 %v3149_v45, 0.0  ;;  %v3151_v1 = vpop.f32.mrb[21].mxu1 }
 0x34e   :  { %4217 = vmatmul.mubr.msk.f32.gmra.mrb[88].mxu1 %vm2387_vm6, %v3235_v63 }
 0x34f   :  { %v3154_v8 = vpop.f32.mrb[22].mxu1  ;;  %4219 = vmatprep.mubr.msk.f32.mxu1 %vm2387_vm6, %v3236_v16 }
 0x350   :  { %v3237_v47 = vmax.f32 %v3154_v8, 0.0  ;;  %v3156_v50 = vpop.f32.mrb[23].mxu1 }
 0x352   :  { %4220 = vmatmul.mubr.msk.f32.gmra.mrb[90].mxu1 %vm2387_vm6, %v3237_v47 }
 0x357   :  { %v3159_v10 = vpop.f32.mrb[24].mxu1 }
 0x358   :  { %v3238_v59 = vmax.f32 %v3159_v10, 0.0  ;;  %v3161_v5 = vpop.f32.mrb[25].mxu1 }
 0x35a   :  { %4222 = vmatprep.mubr.msk.f32.mxu1 %vm2387_vm6, %v3238_v59 }
 0x35b   :  { %v3164_v49 = vpop.f32.mrb[26].mxu1 }
 0x35c   :  { %v3239_v0 = vmax.f32 %v3164_v49, 0.0  ;;  %v3166_v12 = vpop.f32.mrb[27].mxu1 }
 0x35e   :  { %4223 = vmatmul.mubr.msk.f32.gmra.mrb[92].mxu1 %vm2387_vm6, %v3239_v0 }
 0x361   :  { %v3169_v54 = vpop.f32.mrb[28].mxu1 }
 0x362   :  { %v3240_v17 = vmax.f32 %v3169_v54, 0.0  ;;  %v3171_v31 = vpop.f32.mrb[29].mxu1 }
 0x364   :  { %4225 = vmatprep.mubr.msk.f32.mxu1 %vm2387_vm6, %v3240_v17 }
 0x367   :  { %v3174_v20 = vpop.f32.mrb[30].mxu1 }
 0x368   :  { %v3241_v32 = vmax.f32 %v3174_v20, 0.0  ;;  %v3176_v30 = vpop.f32.mrb[31].mxu1 }
 0x36a   :  { %4226 = vmatmul.mubr.msk.f32.gmra.mrb[94].mxu1 %vm2387_vm6, %v3241_v32 }
 0x36b   :  { %v4134_v55 = vpop.f32.mrb[32].mxu1 }
 0x36c   :  { %v3521_v24 = vadd.f32 %v4134_v55, %v8286_v36  ;;  %v3515_v52 = vpop.f32.mrb[33].mxu1 }
 0x36d   :  { %v3516_v42 = vadd.f32 %v8286_v36, %v3515_v52 }
 0x36e   :  { %3835 = vst [vmem:[#allocation6 + $0x8] sm:$0xff] %v3521_v24 }
 0x36f   :  { %3834 = vst [vmem:[#allocation6] sm:$0xff] %v3516_v42  ;;  %v4137_v25 = vpop.f32.mrb[34].mxu1 }
 0x370   :  { %v3531_v56 = vadd.f32 %v4137_v25, %v8286_v36  ;;  %v3525_v62 = vpop.f32.mrb[35].mxu1 }
 0x371   :  { %v3526_v4 = vadd.f32 %v8286_v36, %v3525_v62 }
 0x372   :  { %3837 = vst [vmem:[#allocation6 + $0x18] sm:$0xff] %v3531_v56 }
 0x373   :  { %3836 = vst [vmem:[#allocation6 + $0x10] sm:$0xff] %v3526_v4  ;;  %v4140_v3 = vpop.f32.mrb[36].mxu1 }
 0x374   :  { %v3541_v43 = vadd.f32 %v4140_v3, %v8286_v36  ;;  %v3535_v57 = vpop.f32.mrb[37].mxu1 }
 0x375   :  { %v3536_v26 = vadd.f32 %v8286_v36, %v3535_v57 }
 0x376   :  { %3839 = vst [vmem:[#allocation6 + $0x28] sm:$0xff] %v3541_v43 }
 0x377   :  { %3838 = vst [vmem:[#allocation6 + $0x20] sm:$0xff] %v3536_v26  ;;  %v4143_v37 = vpop.f32.mrb[38].mxu1 }
 0x378   :  { %v3551_v28 = vadd.f32 %v4143_v37, %v8286_v36  ;;  %v3545_v33 = vpop.f32.mrb[39].mxu1 }
 0x379   :  { %v3546_v21 = vadd.f32 %v8286_v36, %v3545_v33 }
 0x37a   :  { %3841 = vst [vmem:[#allocation6 + $0x38] sm:$0xff] %v3551_v28 }
 0x37b   :  { %3840 = vst [vmem:[#allocation6 + $0x30] sm:$0xff] %v3546_v21  ;;  %v4146_v14 = vpop.f32.mrb[40].mxu1 }
 0x37c   :  { %v3561_v60 = vadd.f32 %v4146_v14, %v8286_v36  ;;  %v3555_v2 = vpop.f32.mrb[41].mxu1 }
 0x37d   :  { %v3556_v51 = vadd.f32 %v8286_v36, %v3555_v2 }
 0x37e   :  { %3843 = vst [vmem:[#allocation6 + $0x48] sm:$0xff] %v3561_v60 }
 0x37f   :  { %3842 = vst [vmem:[#allocation6 + $0x40] sm:$0xff] %v3556_v51  ;;  %v4149_v40 = vpop.f32.mrb[42].mxu1 }
 0x380   :  { %v3571_v35 = vadd.f32 %v4149_v40, %v8286_v36  ;;  %v3565_v39 = vpop.f32.mrb[43].mxu1 }
 0x381   :  { %v3566_v15 = vadd.f32 %v8286_v36, %v3565_v39 }
 0x382   :  { %3845 = vst [vmem:[#allocation6 + $0x58] sm:$0xff] %v3571_v35 }
 0x383   :  { %3844 = vst [vmem:[#allocation6 + $0x50] sm:$0xff] %v3566_v15  ;;  %v4152_v13 = vpop.f32.mrb[44].mxu1 }
 0x384   :  { %v3581_v6 = vadd.f32 %v4152_v13, %v8286_v36  ;;  %v3575_v9 = vpop.f32.mrb[45].mxu1 }
 0x385   :  { %v3576_v34 = vadd.f32 %v8286_v36, %v3575_v9 }
 0x386   :  { %3847 = vst [vmem:[#allocation6 + $0x68] sm:$0xff] %v3581_v6 }
 0x387   :  { %3846 = vst [vmem:[#allocation6 + $0x60] sm:$0xff] %v3576_v34  ;;  %v4155_v44 = vpop.f32.mrb[46].mxu1 }
 0x388   :  { %v3591_v27 = vadd.f32 %v4155_v44, %v8286_v36  ;;  %v3585_v19 = vpop.f32.mrb[47].mxu1 }
 0x389   :  { %v3586_v53 = vadd.f32 %v8286_v36, %v3585_v19 }
 0x38a   :  { %3849 = vst [vmem:[#allocation6 + $0x78] sm:$0xff] %v3591_v27 }
 0x38b   :  { %3848 = vst [vmem:[#allocation6 + $0x70] sm:$0xff] %v3586_v53  ;;  %v4158_v48 = vpop.f32.mrb[48].mxu1 }
 0x38c   :  { %v3601_v41 = vadd.f32 %v4158_v48, %v8286_v36  ;;  %v3595_v61 = vpop.f32.mrb[49].mxu1 }
 0x38d   :  { %v3596_v11 = vadd.f32 %v8286_v36, %v3595_v61 }
 0x38e   :  { %3851 = vst [vmem:[#allocation6 + $0x88] sm:$0xff] %v3601_v41 }
 0x38f   :  { %3850 = vst [vmem:[#allocation6 + $0x80] sm:$0xff] %v3596_v11  ;;  %v4161_v58 = vpop.f32.mrb[50].mxu1 }
 0x390   :  { %v3611_v38 = vadd.f32 %v4161_v58, %v8286_v36  ;;  %v3605_v29 = vpop.f32.mrb[51].mxu1 }
 0x391   :  { %v3606_v7 = vadd.f32 %v8286_v36, %v3605_v29 }
 0x392   :  { %3853 = vst [vmem:[#allocation6 + $0x98] sm:$0xff] %v3611_v38 }
 0x393   :  { %3852 = vst [vmem:[#allocation6 + $0x90] sm:$0xff] %v3606_v7  ;;  %v4164_v22 = vpop.f32.mrb[52].mxu1 }
 0x394   :  { %v3621_v23 = vadd.f32 %v4164_v22, %v8286_v36  ;;  %v3615_v46 = vpop.f32.mrb[53].mxu1 }
 0x395   :  { %v3616_v18 = vadd.f32 %v8286_v36, %v3615_v46 }
 0x396   :  { %3855 = vst [vmem:[#allocation6 + $0xa8] sm:$0xff] %v3621_v23 }
 0x397   :  { %3854 = vst [vmem:[#allocation6 + $0xa0] sm:$0xff] %v3616_v18  ;;  %v4167_v45 = vpop.f32.mrb[54].mxu1 }
 0x398   :  { %v3631_v63 = vadd.f32 %v4167_v45, %v8286_v36  ;;  %v3625_v16 = vpop.f32.mrb[55].mxu1 }
 0x399   :  { %v3626_v1 = vadd.f32 %v8286_v36, %v3625_v16 }
 0x39a   :  { %3857 = vst [vmem:[#allocation6 + $0xb8] sm:$0xff] %v3631_v63 }
 0x39b   :  { %3856 = vst [vmem:[#allocation6 + $0xb0] sm:$0xff] %v3626_v1  ;;  %v4170_v8 = vpop.f32.mrb[56].mxu1 }
 0x39c   :  { %v3641_v47 = vadd.f32 %v4170_v8, %v8286_v36  ;;  %v3635_v50 = vpop.f32.mrb[57].mxu1 }
 0x39d   :  { %v3636_v10 = vadd.f32 %v8286_v36, %v3635_v50 }
 0x39e   :  { %3859 = vst [vmem:[#allocation6 + $0xc8] sm:$0xff] %v3641_v47 }
 0x39f   :  { %3858 = vst [vmem:[#allocation6 + $0xc0] sm:$0xff] %v3636_v10  ;;  %v4173_v59 = vpop.f32.mrb[58].mxu1 }
 0x3a0   :  { %v3651_v5 = vadd.f32 %v4173_v59, %v8286_v36  ;;  %v3645_v49 = vpop.f32.mrb[59].mxu1 }
 0x3a1   :  { %v3646_v0 = vadd.f32 %v8286_v36, %v3645_v49 }
 0x3a2   :  { %3861 = vst [vmem:[#allocation6 + $0xd8] sm:$0xff] %v3651_v5 }
 0x3a3   :  { %3860 = vst [vmem:[#allocation6 + $0xd0] sm:$0xff] %v3646_v0  ;;  %v4176_v12 = vpop.f32.mrb[60].mxu1 }
 0x3a4   :  { %v3661_v54 = vadd.f32 %v4176_v12, %v8286_v36  ;;  %v3655_v17 = vpop.f32.mrb[61].mxu1 }
 0x3a5   :  { %v3656_v31 = vadd.f32 %v8286_v36, %v3655_v17 }
 0x3a6   :  { %3863 = vst [vmem:[#allocation6 + $0xe8] sm:$0xff] %v3661_v54 }
 0x3a7   :  { %3862 = vst [vmem:[#allocation6 + $0xe0] sm:$0xff] %v3656_v31  ;;  %v4179_v20 = vpop.f32.mrb[62].mxu1 }
 0x3a8   :  { %v3671_v32 = vadd.f32 %v4179_v20, %v8286_v36  ;;  %v3665_v30 = vpop.f32.mrb[63].mxu1 }
 0x3a9   :  { %v3666_v55 = vadd.f32 %v8286_v36, %v3665_v30 }
 0x3aa   :  { %3865 = vst [vmem:[#allocation6 + $0xf8] sm:$0xff] %v3671_v32 }
 0x3ab   :  { %3864 = vst [vmem:[#allocation6 + $0xf0] sm:$0xff] %v3666_v55  ;;  %v4182_v24 = vpop.f32.mrb[64].mxu1 }
 0x3ac   :  { %v3681_v52 = vadd.f32 %v4182_v24, %v8286_v36  ;;  %v3675_v42 = vpop.f32.mrb[65].mxu1 }
 0x3ad   :  { %v3676_v25 = vadd.f32 %v8286_v36, %v3675_v42 }
 0x3ae   :  { %3867 = vst [vmem:[#allocation6 + $0x108] sm:$0xff] %v3681_v52 }
 0x3af   :  { %3866 = vst [vmem:[#allocation6 + $0x100] sm:$0xff] %v3676_v25  ;;  %v4185_v56 = vpop.f32.mrb[66].mxu1 }
 0x3b0   :  { %v3691_v62 = vadd.f32 %v4185_v56, %v8286_v36  ;;  %v3685_v4 = vpop.f32.mrb[67].mxu1 }
 0x3b1   :  { %v3686_v3 = vadd.f32 %v8286_v36, %v3685_v4 }
 0x3b2   :  { %3869 = vst [vmem:[#allocation6 + $0x118] sm:$0xff] %v3691_v62 }
 0x3b3   :  { %3868 = vst [vmem:[#allocation6 + $0x110] sm:$0xff] %v3686_v3  ;;  %v4188_v43 = vpop.f32.mrb[68].mxu1 }
 0x3b4   :  { %v3701_v57 = vadd.f32 %v4188_v43, %v8286_v36  ;;  %v3695_v26 = vpop.f32.mrb[69].mxu1 }
 0x3b5   :  { %v3696_v37 = vadd.f32 %v8286_v36, %v3695_v26 }
 0x3b6   :  { %3871 = vst [vmem:[#allocation6 + $0x128] sm:$0xff] %v3701_v57 }
 0x3b7   :  { %3870 = vst [vmem:[#allocation6 + $0x120] sm:$0xff] %v3696_v37  ;;  %v4191_v28 = vpop.f32.mrb[70].mxu1 }
 0x3b8   :  { %v3711_v33 = vadd.f32 %v4191_v28, %v8286_v36  ;;  %v3705_v21 = vpop.f32.mrb[71].mxu1 }
 0x3b9   :  { %v3706_v14 = vadd.f32 %v8286_v36, %v3705_v21 }
 0x3ba   :  { %3873 = vst [vmem:[#allocation6 + $0x138] sm:$0xff] %v3711_v33 }
 0x3bb   :  { %3872 = vst [vmem:[#allocation6 + $0x130] sm:$0xff] %v3706_v14 }
 0x3c5   :  { %v4194_v60 = vpop.f32.mrb[72].mxu1 }
 0x3c6   :  { %v3721_v2 = vadd.f32 %v4194_v60, %v8286_v36  ;;  %v3715_v51 = vpop.f32.mrb[73].mxu1 }
 0x3c7   :  { %v3716_v40 = vadd.f32 %v8286_v36, %v3715_v51 }
 0x3c8   :  { %3875 = vst [vmem:[#allocation6 + $0x148] sm:$0xff] %v3721_v2 }
 0x3c9   :  { %3874 = vst [vmem:[#allocation6 + $0x140] sm:$0xff] %v3716_v40 }
 0x3dd   :  { %v4197_v35 = vpop.f32.mrb[74].mxu1 }
 0x3de   :  { %v3731_v39 = vadd.f32 %v4197_v35, %v8286_v36  ;;  %v3725_v15 = vpop.f32.mrb[75].mxu1 }
 0x3df   :  { %v3726_v13 = vadd.f32 %v8286_v36, %v3725_v15 }
 0x3e0   :  { %3877 = vst [vmem:[#allocation6 + $0x158] sm:$0xff] %v3731_v39 }
 0x3e1   :  { %3876 = vst [vmem:[#allocation6 + $0x150] sm:$0xff] %v3726_v13 }
 0x3f5   :  { %v4200_v6 = vpop.f32.mrb[76].mxu1 }
 0x3f6   :  { %v3741_v9 = vadd.f32 %v4200_v6, %v8286_v36  ;;  %v3735_v34 = vpop.f32.mrb[77].mxu1 }
 0x3f7   :  { %v3736_v44 = vadd.f32 %v8286_v36, %v3735_v34 }
 0x3f8   :  { %3879 = vst [vmem:[#allocation6 + $0x168] sm:$0xff] %v3741_v9 }
 0x3f9   :  { %3878 = vst [vmem:[#allocation6 + $0x160] sm:$0xff] %v3736_v44 }
 0x40d   :  { %v4203_v27 = vpop.f32.mrb[78].mxu1 }
 0x40e   :  { %v3751_v19 = vadd.f32 %v4203_v27, %v8286_v36  ;;  %v3745_v53 = vpop.f32.mrb[79].mxu1 }
 0x40f   :  { %v3746_v48 = vadd.f32 %v8286_v36, %v3745_v53 }
 0x410   :  { %3881 = vst [vmem:[#allocation6 + $0x178] sm:$0xff] %v3751_v19 }
 0x411   :  { %3880 = vst [vmem:[#allocation6 + $0x170] sm:$0xff] %v3746_v48  ;;  %v4206_v41 = vpop.f32.mrb[80].mxu1 }
 0x412   :  { %v3761_v61 = vadd.f32 %v4206_v41, %v8286_v36  ;;  %v3755_v11 = vpop.f32.mrb[81].mxu1 }
 0x413   :  { %v3756_v58 = vadd.f32 %v8286_v36, %v3755_v11 }
 0x414   :  { %3883 = vst [vmem:[#allocation6 + $0x188] sm:$0xff] %v3761_v61 }
 0x415   :  { %3882 = vst [vmem:[#allocation6 + $0x180] sm:$0xff] %v3756_v58  ;;  %v4209_v38 = vpop.f32.mrb[82].mxu1 }
 0x416   :  { %v3771_v29 = vadd.f32 %v4209_v38, %v8286_v36  ;;  %v3765_v7 = vpop.f32.mrb[83].mxu1 }
 0x417   :  { %v3766_v22 = vadd.f32 %v8286_v36, %v3765_v7 }
 0x418   :  { %3885 = vst [vmem:[#allocation6 + $0x198] sm:$0xff] %v3771_v29 }
 0x419   :  { %3884 = vst [vmem:[#allocation6 + $0x190] sm:$0xff] %v3766_v22  ;;  %v4212_v23 = vpop.f32.mrb[84].mxu1 }
 0x41a   :  { %v3781_v46 = vadd.f32 %v4212_v23, %v8286_v36  ;;  %v3775_v18 = vpop.f32.mrb[85].mxu1 }
 0x41b   :  { %v3776_v45 = vadd.f32 %v8286_v36, %v3775_v18 }
 0x41c   :  { %3887 = vst [vmem:[#allocation6 + $0x1a8] sm:$0xff] %v3781_v46 }
 0x41d   :  { %3886 = vst [vmem:[#allocation6 + $0x1a0] sm:$0xff] %v3776_v45  ;;  %v4215_v63 = vpop.f32.mrb[86].mxu1 }
 0x41e   :  { %v3791_v16 = vadd.f32 %v4215_v63, %v8286_v36  ;;  %v3785_v1 = vpop.f32.mrb[87].mxu1 }
 0x41f   :  { %v3786_v8 = vadd.f32 %v8286_v36, %v3785_v1 }
 0x420   :  { %3889 = vst [vmem:[#allocation6 + $0x1b8] sm:$0xff] %v3791_v16 }
 0x421   :  { %3888 = vst [vmem:[#allocation6 + $0x1b0] sm:$0xff] %v3786_v8  ;;  %v4218_v47 = vpop.f32.mrb[88].mxu1 }
 0x422   :  { %v3801_v50 = vadd.f32 %v4218_v47, %v8286_v36  ;;  %v3795_v10 = vpop.f32.mrb[89].mxu1 }
 0x423   :  { %v3796_v59 = vadd.f32 %v8286_v36, %v3795_v10 }
 0x424   :  { %3891 = vst [vmem:[#allocation6 + $0x1c8] sm:$0xff] %v3801_v50 }
 0x425   :  { %3890 = vst [vmem:[#allocation6 + $0x1c0] sm:$0xff] %v3796_v59  ;;  %v4221_v5 = vpop.f32.mrb[90].mxu1 }
 0x426   :  { %v3811_v49 = vadd.f32 %v4221_v5, %v8286_v36  ;;  %v3805_v0 = vpop.f32.mrb[91].mxu1 }
 0x427   :  { %v3806_v12 = vadd.f32 %v8286_v36, %v3805_v0 }
 0x428   :  { %3893 = vst [vmem:[#allocation6 + $0x1d8] sm:$0xff] %v3811_v49 }
 0x429   :  { %3892 = vst [vmem:[#allocation6 + $0x1d0] sm:$0xff] %v3806_v12 }
 0x431   :  { %v4224_v54 = vpop.f32.mrb[92].mxu1 }
 0x432   :  { %v3821_v17 = vadd.f32 %v4224_v54, %v8286_v36  ;;  %v3815_v31 = vpop.f32.mrb[93].mxu1 }
 0x433   :  { %v3816_v20 = vadd.f32 %v8286_v36, %v3815_v31 }
 0x434   :  { %3895 = vst [vmem:[#allocation6 + $0x1e8] sm:$0xff] %v3821_v17 }
 0x435   :  { %3894 = vst [vmem:[#allocation6 + $0x1e0] sm:$0xff] %v3816_v20 }
 0x43d   :  { %v4227_v32 = vpop.f32.mrb[94].mxu1 }
 0x43e   :  { %v3831_v30 = vadd.f32 %v4227_v32, %v8286_v36  ;;  %v3825_v55 = vpop.f32.mrb[95].mxu1 }
 0x43f   :  { %v3826_v24 = vadd.f32 %v8286_v36, %v3825_v55 }
 0x440   :  { %3897 = vst [vmem:[#allocation6 + $0x1f8] sm:$0xff] %v3831_v30 }
 0x441   :  { %3896 = vst [vmem:[#allocation6 + $0x1f0] sm:$0xff] %v3826_v24 }
 0x442   :  { %5570 = shalt.err (!%p5567_p12)
}
 0x443   :  { %s5571_s16 = scalar_lea.hbm %s8372_s4, 8192 }
 0x444   :  { %p5572_p13 = scmp.ne.s32.totalorder %s8372_s4, %s5571_s16  ;;  %p5575_p0 = scmp.lt.u32.totalorder %s5571_s16, %s8372_s4 }
 0x446   :  { %p5577_p1 = pnand %p5575_p0, %p5572_p13 }
 0x448   :  { %5580 = shalt.err (!%p5577_p1)
}
 0x449   :  { %3909 = dma.vmem_to_hbm [thread:$0]  %s3904_s7, 8192, %s8372_s4, [#allocation5], %s5586_s25, %s5586_s25, %s5587_s26  }
 0x44a   :  { %5583 = dma.done.wait [#allocation5], 8192  }
 0x44b   :  { %5584 = vsyncadd [#allocation5], 4294959104 }
 0x44c   :  { %3913 = vsyncpa [#allocation4], 1 }
 0x44d   :  { %3914 = vsyncpa [#allocation5], 1 }

</bundles_post_ra>
